<compile_context>
chip_gen: v6e
topology: v6e:2x2x1
jax: 0.10.0
libtpu: 0.0.40
codegen_flags: <defaults>
</compile_context>

<pallas_src>
import functools
import random

import numpy as np
import jax
import jax.numpy as jnp
from jax import lax
from jax.experimental import pallas as pl
from jax.experimental.pallas import tpu as pltpu

LANE = 128
BTILE = 8          # batch rows per grid step (one sublane group)


def _round_up(x, m):
    return ((x + m - 1) // m) * m


# ----------------------------- Pallas kernel --------------------------------


def seq2seq_kernel(H, v_real,
                   tf_ref,          # SMEM (T-1,) int32 scalar-prefetch: 1 -> teacher force
                   src_proj_ref,    # (S, BT, G4)  pre-projected encoder inputs
                   trg_proj_ref,    # (T, BT, G4)  pre-projected teacher-forced inputs
                   enc_wh_ref,      # (Hp, G4)
                   enc_b_ref,       # (1, G4)
                   dec_wh_ref,      # (Hp, G4)
                   dec_b_ref,       # (1, G4)
                   dec_emb_wx_ref,  # (Vp, G4)  dec_emb @ Wx_dec  (greedy input proj)
                   wout_ref,        # (Hp, Vp)
                   bout_ref,        # (1, Vp)
                   out_ref,         # (T, BT, Vp)
                   h_sc,            # (BT, Hp)  hidden state; lanes >= H stay exactly 0
                   c_sc,            # (BT, H)   cell state
                   tok_sc):         # (BT, Vp)  previous greedy token (one-hot)
    BT, Hp = h_sc.shape
    Vp = out_ref.shape[-1]
    S = src_proj_ref.shape[0]
    T = out_ref.shape[0]

    # ---- per-batch-tile init ----
    h_sc[...] = jnp.zeros_like(h_sc)
    c_sc[...] = jnp.zeros_like(c_sc)
    tok_sc[...] = jnp.zeros_like(tok_sc)
    out_ref[0] = jnp.zeros((BT, Vp), out_ref.dtype)      # outputs[0] stays zero only

    # ---- loop invariants (hoisted: unrolled bodies would re-emit them) ----
    enc_b = enc_b_ref[...]
    dec_b = dec_b_ref[...]
    bout = bout_ref[...]
    col_iota = lax.broadcasted_iota(jnp.int32, (BT, Vp), 1)
    vocab_mask = jnp.where(col_iota < v_real, 0.0, -1e30).astype(jnp.float32)

    def gate_math(gates, c_prev):
        """gates: (BT, G4), real gate columns ordered (i, f, o, g), each H wide."""
        sig = jax.nn.sigmoid(gates)
        tnh = jnp.tanh(gates)
        i_g = sig[:, 0 * H:1 * H]
        f_g = sig[:, 1 * H:2 * H]
        o_g = sig[:, 2 * H:3 * H]
        g_g = tnh[:, 3 * H:4 * H]
        c_new = f_g * c_prev + i_g * g_g
        h_new = o_g * jnp.tanh(c_new)
        return h_new, c_new                               # both (BT, H)

    # ---- encoder: only h @ W_h is on the serial critical path ----
    def enc_body(t, carry):
        gates = (jnp.dot(h_sc[...], enc_wh_ref[...],
                         preferred_element_type=jnp.float32)
                 + src_proj_ref[t] + enc_b)
        h_new, c_new = gate_math(gates, c_sc[...])
        c_sc[...] = c_new
        h_sc[:, 0:H] = h_new                              # padded lanes stay exactly 0
        return carry

    lax.fori_loop(0, S, enc_body, 0, unroll=True if S <= 16 else 4)

    # ---- decoder: teacher-forcing / greedy loop ----
    def dec_body(g, carry):
        use_teacher = tf_ref[g] != 0
        greedy_proj = jnp.dot(tok_sc[...], dec_emb_wx_ref[...],
                              preferred_element_type=jnp.float32)
        x_proj = jnp.where(use_teacher, trg_proj_ref[g], greedy_proj)
        gates = (jnp.dot(h_sc[...], dec_wh_ref[...],
                         preferred_element_type=jnp.float32)
                 + x_proj + dec_b)
        h_new, c_new = gate_math(gates, c_sc[...])
        c_sc[...] = c_new
        h_sc[:, 0:H] = h_new
        logits = jnp.dot(h_sc[...], wout_ref[...],
                         preferred_element_type=jnp.float32) + bout
        out_ref[g + 1] = logits

        # greedy argmax (first maximal index) over the real vocab only
        lm = logits + vocab_mask
        m = jnp.max(lm, axis=1, keepdims=True)
        idx = jnp.min(jnp.where(lm == m, col_iota, Vp), axis=1, keepdims=True)
        tok_sc[...] = (col_iota == idx).astype(jnp.float32)
        return carry

    lax.fori_loop(0, T - 1, dec_body, 0, unroll=True if T <= 17 else 4)


# ------------------------------- Wrappers ------------------------------------


def _projections(src, trg, arrs):
    """Embedding gathers + input-side LSTM projections, batch-padded to BTILE multiple."""
    S, batch = src.shape
    T = trg.shape[0]
    G4 = arrs["enc_wx"].shape[1]
    Bp = _round_up(max(batch, BTILE), BTILE)
    src_proj = jnp.einsum("sbe,eg->sbg", arrs["enc_emb"][src], arrs["enc_wx"])
    trg_proj = jnp.einsum("tbe,eg->tbg", arrs["dec_emb"][trg], arrs["dec_wx"])
    src_proj_p = jnp.zeros((S, Bp, G4), jnp.float32).at[:, :batch].set(src_proj)
    trg_proj_p = jnp.zeros((T, Bp, G4), jnp.float32).at[:, :batch].set(trg_proj)
    return src_proj_p, trg_proj_p, Bp, batch


@functools.partial(jax.jit, static_argnames=("v_real", "hid"))
def _forward_jit(tf_arr, src, trg, arrs, *, v_real, hid):
    src_proj_p, trg_proj_p, Bp, batch = _projections(src, trg, arrs)
    S = src.shape[0]
    T = trg.shape[0]
    enc_wh, enc_b = arrs["enc_wh"], arrs["enc_b"]
    dec_wh, dec_b = arrs["dec_wh"], arrs["dec_b"]
    dec_emb_wx = arrs["dec_emb_wx"]
    wout, bout = arrs["wout"], arrs["bout"]
    Hp, G4 = enc_wh.shape
    Vp = wout.shape[1]

    kernel = functools.partial(seq2seq_kernel, hid, v_real)
    out_p = pl.pallas_call(
        kernel,
        out_shape=jax.ShapeDtypeStruct((T, Bp, Vp), jnp.float32),
        grid_spec=pltpu.PrefetchScalarGridSpec(
            num_scalar_prefetch=1,
            grid=(Bp // BTILE,),                    # batch tiles -> megacore parallelism
            in_specs=[
                pl.BlockSpec((S, BTILE, G4), lambda b, tf: (0, b, 0)),
                pl.BlockSpec((T, BTILE, G4), lambda b, tf: (0, b, 0)),
                pl.BlockSpec(enc_wh.shape, lambda b, tf: (0, 0)),
                pl.BlockSpec(enc_b.shape, lambda b, tf: (0, 0)),
                pl.BlockSpec(dec_wh.shape, lambda b, tf: (0, 0)),
                pl.BlockSpec(dec_b.shape, lambda b, tf: (0, 0)),
                pl.BlockSpec(dec_emb_wx.shape, lambda b, tf: (0, 0)),
                pl.BlockSpec(wout.shape, lambda b, tf: (0, 0)),
                pl.BlockSpec(bout.shape, lambda b, tf: (0, 0)),
            ],
            out_specs=pl.BlockSpec((T, BTILE, Vp), lambda b, tf: (0, b, 0)),
            scratch_shapes=[
                pltpu.VMEM((BTILE, Hp), jnp.float32),   # h (zero-padded lanes >= H)
                pltpu.VMEM((BTILE, hid), jnp.float32),  # c
                pltpu.VMEM((BTILE, Vp), jnp.float32),   # previous greedy token one-hot
            ],
        ),
        compiler_params=pltpu.CompilerParams(
            dimension_semantics=("parallel",),
            vmem_limit_bytes=32 * 1024 * 1024,
        ),
    )(tf_arr, src_proj_p, trg_proj_p, enc_wh, enc_b, dec_wh, dec_b,
      dec_emb_wx, wout, bout)
    return out_p[:, :batch, :v_real]


def _teacher_mask(max_len, teacher_forcing_ratio, seed):
    # TODO(synk): teacher forcing uses host `random` at trace time (deterministic
    # stand-in for per-forward torch `random.random()` calls in the reference).
    random.seed(seed)
    decisions = [random.random() < teacher_forcing_ratio for _ in range(1, max_len)]
    tf_np = np.ones((max(max_len - 1, 1),), dtype=np.int32)  # step 0 always uses trg[0]
    if max_len > 2:
        tf_np[1:] = np.asarray(decisions[:max_len - 2], dtype=np.int32)
    return jnp.asarray(tf_np, dtype=jnp.int32)


def seq2seq_forward(src, trg, params, teacher_forcing_ratio=0.5, seed=0):
    """Mirrors Seq2Seq.forward: outputs[0] stays zero, loop over t=1..max_len-1."""
    tf_arr = _teacher_mask(trg.shape[0], teacher_forcing_ratio, seed)
    return _forward_jit(tf_arr, src, trg, params["arrays"],
                        v_real=params["trg_vocab"], hid=params["hid_dim"])


@functools.partial(jax.jit, static_argnames=("v_real", "hid"))
def _reference_jit(tf_arr, src, trg, arrs, *, v_real, hid):
    """Plain-JAX reference of the same (padded) math, for correctness checks."""
    src_proj_p, trg_proj_p, Bp, batch = _projections(src, trg, arrs)
    H = hid
    S = src.shape[0]
    T = trg.shape[0]
    enc_wh, enc_b = arrs["enc_wh"], arrs["enc_b"]
    dec_wh, dec_b = arrs["dec_wh"], arrs["dec_b"]
    dec_emb_wx = arrs["dec_emb_wx"]
    wout, bout = arrs["wout"], arrs["bout"]
    Hp = enc_wh.shape[0]
    Vp = wout.shape[1]

    def gate_math(gates, c_prev):
        sig = jax.nn.sigmoid(gates)
        tnh = jnp.tanh(gates)
        i_, f_, o_ = sig[:, :H], sig[:, H:2 * H], sig[:, 2 * H:3 * H]
        g_ = tnh[:, 3 * H:4 * H]
        c_new = f_ * c_prev + i_ * g_
        return o_ * jnp.tanh(c_new), c_new

    h = jnp.zeros((Bp, Hp), jnp.float32)
    c = jnp.zeros((Bp, H), jnp.float32)
    for t in range(S):
        h_new, c = gate_math(h @ enc_wh + src_proj_p[t] + enc_b, c)
        h = h.at[:, :H].set(h_new)

    col = jnp.arange(Vp)[None, :]
    vocab_mask = jnp.where(col < v_real, 0.0, -1e30).astype(jnp.float32)
    outs = [jnp.zeros((Bp, Vp), jnp.float32)]
    tok = jnp.zeros((Bp, Vp), jnp.float32)
    for g in range(T - 1):
        x_proj = jnp.where(tf_arr[g] != 0, trg_proj_p[g], tok @ dec_emb_wx)
        h_new, c = gate_math(h @ dec_wh + x_proj + dec_b, c)
        h = h.at[:, :H].set(h_new)
        logits = h @ wout + bout
        outs.append(logits)
        lm = logits + vocab_mask
        m = jnp.max(lm, axis=1, keepdims=True)
        idx = jnp.min(jnp.where(lm == m, col, Vp), axis=1, keepdims=True)
        tok = (col == idx).astype(jnp.float32)
    return jnp.stack(outs, axis=0)[:, :batch, :v_real]


def seq2seq_reference(src, trg, params, teacher_forcing_ratio=0.5, seed=0):
    tf_arr = _teacher_mask(trg.shape[0], teacher_forcing_ratio, seed)
    return _reference_jit(tf_arr, src, trg, params["arrays"],
                          v_real=params["trg_vocab"], hid=params["hid_dim"])


# ------------------------------ Param setup ----------------------------------


def _fuse_lstm(w_ih, w_hh, b_ih, b_hh, Hp, G4):
    """PyTorch-layout LSTM weights (gate order i,f,g,o; shape (4H, in)) ->
       Wx (in, G4), Wh (Hp, G4), bias (1, G4), gate columns ordered (i, f, o, g)."""
    H = w_hh.shape[1]
    IN = w_ih.shape[1]
    order = (0, 1, 3, 2)                                  # torch (i,f,g,o) -> (i,f,o,g)

    def reorder(w):                                       # (4H, in) -> (in, 4H)
        blocks = [w[k * H:(k + 1) * H] for k in range(4)]
        return jnp.concatenate([blocks[k].T for k in order], axis=1)

    wx = reorder(w_ih)                                    # (IN, 4H)
    wh = reorder(w_hh)                                    # (H, 4H)
    b = b_ih + b_hh
    bb = jnp.concatenate([b[k * H:(k + 1) * H] for k in order])

    wx_p = jnp.zeros((IN, G4), jnp.float32).at[:, :4 * H].set(wx)
    wh_p = jnp.zeros((Hp, G4), jnp.float32).at[:H, :4 * H].set(wh)
    b_p = jnp.zeros((1, G4), jnp.float32).at[0, :4 * H].set(bb)
    return wx_p, wh_p, b_p


def init_params(key, src_vocab, trg_vocab, emb_dim, hid_dim):
    Hp = _round_up(max(hid_dim, LANE), LANE)
    G4 = _round_up(4 * hid_dim, LANE)
    Vp = _round_up(max(trg_vocab, LANE), LANE)
    ks = jax.random.split(key, 12)
    s = 0.1

    def nrm(k, shape):
        return (s * jax.random.normal(k, shape)).astype(jnp.float32)

    enc_emb = nrm(ks[0], (src_vocab, emb_dim))
    enc_wx, enc_wh, enc_b = _fuse_lstm(nrm(ks[1], (4 * hid_dim, emb_dim)),
                                       nrm(ks[2], (4 * hid_dim, hid_dim)),
                                       nrm(ks[3], (4 * hid_dim,)),
                                       nrm(ks[4], (4 * hid_dim,)), Hp, G4)

    dec_emb = nrm(ks[5], (trg_vocab, emb_dim))
    dec_wx, dec_wh, dec_b = _fuse_lstm(nrm(ks[6], (4 * hid_dim, emb_dim)),
                                       nrm(ks[7], (4 * hid_dim, hid_dim)),
                                       nrm(ks[8], (4 * hid_dim,)),
                                       nrm(ks[9], (4 * hid_dim,)), Hp, G4)

    w_out = nrm(ks[10], (trg_vocab, hid_dim))             # torch Linear(hid, vocab).weight
    b_out = nrm(ks[11], (trg_vocab,))

    # Greedy input projection folded into one table: onehot @ (dec_emb @ Wx_dec).
    dec_emb_wx = jnp.zeros((Vp, G4), jnp.float32).at[:trg_vocab].set(dec_emb @ dec_wx)
    wout = jnp.zeros((Hp, Vp), jnp.float32).at[:hid_dim, :trg_vocab].set(w_out.T)
    bout = jnp.zeros((1, Vp), jnp.float32).at[0, :trg_vocab].set(b_out)

    arrays = {
        "enc_emb": enc_emb, "enc_wx": enc_wx, "enc_wh": enc_wh, "enc_b": enc_b,
        "dec_emb": dec_emb, "dec_wx": dec_wx, "dec_wh": dec_wh, "dec_b": dec_b,
        "dec_emb_wx": dec_emb_wx, "wout": wout, "bout": bout,
    }
    return {"arrays": arrays, "trg_vocab": trg_vocab,
            "emb_dim": emb_dim, "hid_dim": hid_dim}


if __name__ == "__main__":
    SRC_VOCAB, TRG_VOCAB = 20, 24
    EMB_DIM, HID_DIM = 16, 32
    SRC_LEN, MAX_LEN, BATCH = 6, 5, 10       # batch 10 -> 2 batch tiles of 8 (grid=(2,))

    key = jax.random.PRNGKey(0)
    kp, ks, kt = jax.random.split(key, 3)
    params = init_params(kp, SRC_VOCAB, TRG_VOCAB, EMB_DIM, HID_DIM)

    src = jax.random.randint(ks, (SRC_LEN, BATCH), 0, SRC_VOCAB, dtype=jnp.int32)
    trg = jax.random.randint(kt, (MAX_LEN, BATCH), 0, TRG_VOCAB, dtype=jnp.int32)

    # Mixed teacher-forcing / greedy path.
    outputs = jax.block_until_ready(
        seq2seq_forward(src, trg, params, teacher_forcing_ratio=0.5, seed=0))
    assert outputs.shape == (MAX_LEN, BATCH, TRG_VOCAB)
    assert bool(jnp.isfinite(outputs).all())
    assert bool(jnp.all(outputs[0] == 0.0))

    # Numerical check vs plain-JAX reference on the fully teacher-forced path
    # (avoids argmax tie-flips from matmul accumulation-order differences).
    out_tf = jax.block_until_ready(
        seq2seq_forward(src, trg, params, teacher_forcing_ratio=1.0, seed=0))
    ref_tf = jax.block_until_ready(
        seq2seq_reference(src, trg, params, teacher_forcing_ratio=1.0, seed=0))
    assert jnp.allclose(out_tf, ref_tf, atol=2e-3, rtol=2e-3), (
        float(jnp.max(jnp.abs(out_tf - ref_tf))))

    print("KERNEL_OK")
</pallas_src>

<mosaic_0001>
module attributes {stable_mosaic.version = 11 : i64} {
  func.func @seq2seq_kernel(%arg0: i32, %arg1: memref<4xi32, #tpu.memory_space<smem>>, %arg2: memref<6x8x128xf32, #tpu.memory_space<vmem>>, %arg3: memref<5x8x128xf32, #tpu.memory_space<vmem>>, %arg4: memref<128x128xf32, #tpu.memory_space<vmem>>, %arg5: memref<1x128xf32, #tpu.memory_space<vmem>>, %arg6: memref<128x128xf32, #tpu.memory_space<vmem>>, %arg7: memref<1x128xf32, #tpu.memory_space<vmem>>, %arg8: memref<128x128xf32, #tpu.memory_space<vmem>>, %arg9: memref<128x128xf32, #tpu.memory_space<vmem>>, %arg10: memref<1x128xf32, #tpu.memory_space<vmem>>, %arg11: memref<5x8x128xf32, #tpu.memory_space<vmem>>, %arg12: memref<8x128xf32, #tpu.memory_space<vmem>>, %arg13: memref<8x32xf32, #tpu.memory_space<vmem>>, %arg14: memref<8x128xf32, #tpu.memory_space<vmem>>) attributes {dimension_semantics = [#tpu.dimension_semantics<parallel>], iteration_bounds = array<i64: 2>, scalar_prefetch = 1 : i64, scratch_operands = 3 : i64, tpu.core_type = #tpu.core_type<tc>, window_params = [{transform_indices = @transform_0, window_bounds = array<i64: 6, 8, 128>}, {transform_indices = @transform_1, window_bounds = array<i64: 5, 8, 128>}, {pipeline_mode = #tpu.pipeline_mode<synchronous>, transform_indices = @transform_2, window_bounds = array<i64: 128, 128>}, {pipeline_mode = #tpu.pipeline_mode<synchronous>, transform_indices = @transform_3, window_bounds = array<i64: 1, 128>}, {pipeline_mode = #tpu.pipeline_mode<synchronous>, transform_indices = @transform_4, window_bounds = array<i64: 128, 128>}, {pipeline_mode = #tpu.pipeline_mode<synchronous>, transform_indices = @transform_5, window_bounds = array<i64: 1, 128>}, {pipeline_mode = #tpu.pipeline_mode<synchronous>, transform_indices = @transform_6, window_bounds = array<i64: 128, 128>}, {pipeline_mode = #tpu.pipeline_mode<synchronous>, transform_indices = @transform_7, window_bounds = array<i64: 128, 128>}, {pipeline_mode = #tpu.pipeline_mode<synchronous>, transform_indices = @transform_8, window_bounds = array<i64: 1, 128>}, {transform_indices = @transform_9, window_bounds = array<i64: 5, 8, 128>}]} {
    %cst = arith.constant 0.000000e+00 : f32
    %0 = vector.broadcast %cst : f32 to vector<8x128xf32>
    %c0 = arith.constant 0 : index
    %c0_0 = arith.constant 0 : index
    %1 = vector.load %arg12[%c0, %c0_0] : memref<8x128xf32, #tpu.memory_space<vmem>>, vector<8x128xf32>
    tpu.vector_store %arg12[%c0, %c0_0], %0 {strides = array<i32>} : memref<8x128xf32, #tpu.memory_space<vmem>>, vector<8x128xf32>,
    %cst_1 = arith.constant 0.000000e+00 : f32
    %2 = vector.broadcast %cst_1 : f32 to vector<8x32xf32>
    %c0_2 = arith.constant 0 : index
    %c0_3 = arith.constant 0 : index
    %3 = vector.load %arg13[%c0_2, %c0_3] : memref<8x32xf32, #tpu.memory_space<vmem>>, vector<8x32xf32>
    tpu.vector_store %arg13[%c0_2, %c0_3], %2 {strides = array<i32>} : memref<8x32xf32, #tpu.memory_space<vmem>>, vector<8x32xf32>,
    %cst_4 = arith.constant 0.000000e+00 : f32
    %4 = vector.broadcast %cst_4 : f32 to vector<8x128xf32>
    %c0_5 = arith.constant 0 : index
    %c0_6 = arith.constant 0 : index
    %5 = vector.load %arg14[%c0_5, %c0_6] : memref<8x128xf32, #tpu.memory_space<vmem>>, vector<8x128xf32>
    tpu.vector_store %arg14[%c0_5, %c0_6], %4 {strides = array<i32>} : memref<8x128xf32, #tpu.memory_space<vmem>>, vector<8x128xf32>,
    %cst_7 = arith.constant 0.000000e+00 : f32
    %6 = vector.broadcast %cst_7 : f32 to vector<8x128xf32>
    %c0_8 = arith.constant 0 : index
    %c0_9 = arith.constant 0 : index
    %c0_10 = arith.constant 0 : index
    %7 = vector.load %arg11[%c0_8, %c0_9, %c0_10] : memref<5x8x128xf32, #tpu.memory_space<vmem>>, vector<1x8x128xf32>
    %8 = vector.shape_cast %7 : vector<1x8x128xf32> to vector<8x128xf32>
    %9 = vector.shape_cast %6 : vector<8x128xf32> to vector<1x8x128xf32>
    tpu.vector_store %arg11[%c0_8, %c0_9, %c0_10], %9 {strides = array<i32>} : memref<5x8x128xf32, #tpu.memory_space<vmem>>, vector<1x8x128xf32>,
    %c0_11 = arith.constant 0 : index
    %c0_12 = arith.constant 0 : index
    %10 = vector.load %arg5[%c0_11, %c0_12] : memref<1x128xf32, #tpu.memory_space<vmem>>, vector<1x128xf32>
    %c0_13 = arith.constant 0 : index
    %c0_14 = arith.constant 0 : index
    %11 = vector.load %arg7[%c0_13, %c0_14] : memref<1x128xf32, #tpu.memory_space<vmem>>, vector<1x128xf32>
    %c0_15 = arith.constant 0 : index
    %c0_16 = arith.constant 0 : index
    %12 = vector.load %arg10[%c0_15, %c0_16] : memref<1x128xf32, #tpu.memory_space<vmem>>, vector<1x128xf32>
    %13 = tpu.iota {dimensions = array<i32: 1>} : vector<8x128xi32>
    %c24_i32 = arith.constant 24 : i32
    %14 = vector.broadcast %c24_i32 : i32 to vector<8x128xi32>
    %15 = arith.cmpi slt, %13, %14 : vector<8x128xi32>
    %cst_17 = arith.constant 0.000000e+00 : f32
    %cst_18 = arith.constant -1.000000e+30 : f32
    %16 = vector.broadcast %cst_17 : f32 to vector<8x128xf32>
    %17 = vector.broadcast %cst_18 : f32 to vector<8x128xf32>
    %18 = arith.select %15, %16, %17 : vector<8x128xi1>, vector<8x128xf32>
    %c0_i32 = arith.constant 0 : i32
    %c0_19 = arith.constant 0 : index
    %c0_20 = arith.constant 0 : index
    %19 = vector.load %arg12[%c0_19, %c0_20] : memref<8x128xf32, #tpu.memory_space<vmem>>, vector<8x128xf32>
    %c0_21 = arith.constant 0 : index
    %c0_22 = arith.constant 0 : index
    %20 = vector.load %arg4[%c0_21, %c0_22] : memref<128x128xf32, #tpu.memory_space<vmem>>, vector<128x128xf32>
    %cst_23 = arith.constant dense<0.000000e+00> : vector<8x128xf32>
    %21 = tpu.matmul %19, %20, %cst_23 {dimension_numbers = #tpu.dot_dimension_numbers<[1], [0], [0], [1], [0, 0, 1, 1], [], []>} : vector<8x128xf32>, vector<128x128xf32>, vector<8x128xf32> -> vector<8x128xf32>
    %22 = arith.index_cast %c0_i32 : i32 to index
    %c0_24 = arith.constant 0 : index
    %c0_25 = arith.constant 0 : index
    %23 = vector.load %arg2[%22, %c0_24, %c0_25] : memref<6x8x128xf32, #tpu.memory_space<vmem>>, vector<1x8x128xf32>
    %24 = vector.shape_cast %23 : vector<1x8x128xf32> to vector<8x128xf32>
    %25 = arith.addf %21, %24 : vector<8x128xf32>
    %26 = vector.broadcast %10 : vector<1x128xf32> to vector<8x128xf32>
    %27 = arith.addf %25, %26 : vector<8x128xf32>
    %c0_26 = arith.constant 0 : index
    %c0_27 = arith.constant 0 : index
    %28 = vector.load %arg13[%c0_26, %c0_27] : memref<8x32xf32, #tpu.memory_space<vmem>>, vector<8x32xf32>
    %29 = arith.negf %27 : vector<8x128xf32>
    %30 = math.exp %29 : vector<8x128xf32>
    %cst_28 = arith.constant 1.000000e+00 : f32
    %31 = vector.broadcast %cst_28 : f32 to vector<8x128xf32>
    %32 = arith.addf %31, %30 : vector<8x128xf32>
    %33 = arith.divf %31, %32 : vector<8x128xf32>
    %34 = math.tanh %27 : vector<8x128xf32>
    %35 = vector.extract_strided_slice %33 {offsets = [0, 0], sizes = [8, 32], strides = [1, 1]} : vector<8x128xf32> to vector<8x32xf32>
    %36 = vector.extract_strided_slice %33 {offsets = [0, 32], sizes = [8, 32], strides = [1, 1]} : vector<8x128xf32> to vector<8x32xf32>
    %37 = vector.extract_strided_slice %33 {offsets = [0, 64], sizes = [8, 32], strides = [1, 1]} : vector<8x128xf32> to vector<8x32xf32>
    %38 = vector.extract_strided_slice %34 {offsets = [0, 96], sizes = [8, 32], strides = [1, 1]} : vector<8x128xf32> to vector<8x32xf32>
    %39 = arith.mulf %36, %28 : vector<8x32xf32>
    %40 = arith.mulf %35, %38 : vector<8x32xf32>
    %41 = arith.addf %39, %40 : vector<8x32xf32>
    %42 = math.tanh %41 : vector<8x32xf32>
    %43 = arith.mulf %37, %42 : vector<8x32xf32>
    %c0_29 = arith.constant 0 : index
    %c0_30 = arith.constant 0 : index
    %44 = vector.load %arg13[%c0_29, %c0_30] : memref<8x32xf32, #tpu.memory_space<vmem>>, vector<8x32xf32>
    tpu.vector_store %arg13[%c0_29, %c0_30], %41 {strides = array<i32>} : memref<8x32xf32, #tpu.memory_space<vmem>>, vector<8x32xf32>,
    %c0_31 = arith.constant 0 : index
    %c0_32 = arith.constant 0 : index
    %45 = vector.load %arg12[%c0_31, %c0_32] : memref<8x128xf32, #tpu.memory_space<vmem>>, vector<8x32xf32>
    tpu.vector_store %arg12[%c0_31, %c0_32], %43 {strides = array<i32>} : memref<8x128xf32, #tpu.memory_space<vmem>>, vector<8x32xf32>,
    %c1_i32 = arith.constant 1 : i32
    %c0_33 = arith.constant 0 : index
    %c0_34 = arith.constant 0 : index
    %46 = vector.load %arg12[%c0_33, %c0_34] : memref<8x128xf32, #tpu.memory_space<vmem>>, vector<8x128xf32>
    %c0_35 = arith.constant 0 : index
    %c0_36 = arith.constant 0 : index
    %47 = vector.load %arg4[%c0_35, %c0_36] : memref<128x128xf32, #tpu.memory_space<vmem>>, vector<128x128xf32>
    %cst_37 = arith.constant dense<0.000000e+00> : vector<8x128xf32>
    %48 = tpu.matmul %46, %47, %cst_37 {dimension_numbers = #tpu.dot_dimension_numbers<[1], [0], [0], [1], [0, 0, 1, 1], [], []>} : vector<8x128xf32>, vector<128x128xf32>, vector<8x128xf32> -> vector<8x128xf32>
    %49 = arith.index_cast %c1_i32 : i32 to index
    %c0_38 = arith.constant 0 : index
    %c0_39 = arith.constant 0 : index
    %50 = vector.load %arg2[%49, %c0_38, %c0_39] : memref<6x8x128xf32, #tpu.memory_space<vmem>>, vector<1x8x128xf32>
    %51 = vector.shape_cast %50 : vector<1x8x128xf32> to vector<8x128xf32>
    %52 = arith.addf %48, %51 : vector<8x128xf32>
    %53 = vector.broadcast %10 : vector<1x128xf32> to vector<8x128xf32>
    %54 = arith.addf %52, %53 : vector<8x128xf32>
    %c0_40 = arith.constant 0 : index
    %c0_41 = arith.constant 0 : index
    %55 = vector.load %arg13[%c0_40, %c0_41] : memref<8x32xf32, #tpu.memory_space<vmem>>, vector<8x32xf32>
    %56 = arith.negf %54 : vector<8x128xf32>
    %57 = math.exp %56 : vector<8x128xf32>
    %cst_42 = arith.constant 1.000000e+00 : f32
    %58 = vector.broadcast %cst_42 : f32 to vector<8x128xf32>
    %59 = arith.addf %58, %57 : vector<8x128xf32>
    %60 = arith.divf %58, %59 : vector<8x128xf32>
    %61 = math.tanh %54 : vector<8x128xf32>
    %62 = vector.extract_strided_slice %60 {offsets = [0, 0], sizes = [8, 32], strides = [1, 1]} : vector<8x128xf32> to vector<8x32xf32>
    %63 = vector.extract_strided_slice %60 {offsets = [0, 32], sizes = [8, 32], strides = [1, 1]} : vector<8x128xf32> to vector<8x32xf32>
    %64 = vector.extract_strided_slice %60 {offsets = [0, 64], sizes = [8, 32], strides = [1, 1]} : vector<8x128xf32> to vector<8x32xf32>
    %65 = vector.extract_strided_slice %61 {offsets = [0, 96], sizes = [8, 32], strides = [1, 1]} : vector<8x128xf32> to vector<8x32xf32>
    %66 = arith.mulf %63, %55 : vector<8x32xf32>
    %67 = arith.mulf %62, %65 : vector<8x32xf32>
    %68 = arith.addf %66, %67 : vector<8x32xf32>
    %69 = math.tanh %68 : vector<8x32xf32>
    %70 = arith.mulf %64, %69 : vector<8x32xf32>
    %c0_43 = arith.constant 0 : index
    %c0_44 = arith.constant 0 : index
    %71 = vector.load %arg13[%c0_43, %c0_44] : memref<8x32xf32, #tpu.memory_space<vmem>>, vector<8x32xf32>
    tpu.vector_store %arg13[%c0_43, %c0_44], %68 {strides = array<i32>} : memref<8x32xf32, #tpu.memory_space<vmem>>, vector<8x32xf32>,
    %c0_45 = arith.constant 0 : index
    %c0_46 = arith.constant 0 : index
    %72 = vector.load %arg12[%c0_45, %c0_46] : memref<8x128xf32, #tpu.memory_space<vmem>>, vector<8x32xf32>
    tpu.vector_store %arg12[%c0_45, %c0_46], %70 {strides = array<i32>} : memref<8x128xf32, #tpu.memory_space<vmem>>, vector<8x32xf32>,
    %c2_i32 = arith.constant 2 : i32
    %c0_47 = arith.constant 0 : index
    %c0_48 = arith.constant 0 : index
    %73 = vector.load %arg12[%c0_47, %c0_48] : memref<8x128xf32, #tpu.memory_space<vmem>>, vector<8x128xf32>
    %c0_49 = arith.constant 0 : index
    %c0_50 = arith.constant 0 : index
    %74 = vector.load %arg4[%c0_49, %c0_50] : memref<128x128xf32, #tpu.memory_space<vmem>>, vector<128x128xf32>
    %cst_51 = arith.constant dense<0.000000e+00> : vector<8x128xf32>
    %75 = tpu.matmul %73, %74, %cst_51 {dimension_numbers = #tpu.dot_dimension_numbers<[1], [0], [0], [1], [0, 0, 1, 1], [], []>} : vector<8x128xf32>, vector<128x128xf32>, vector<8x128xf32> -> vector<8x128xf32>
    %76 = arith.index_cast %c2_i32 : i32 to index
    %c0_52 = arith.constant 0 : index
    %c0_53 = arith.constant 0 : index
    %77 = vector.load %arg2[%76, %c0_52, %c0_53] : memref<6x8x128xf32, #tpu.memory_space<vmem>>, vector<1x8x128xf32>
    %78 = vector.shape_cast %77 : vector<1x8x128xf32> to vector<8x128xf32>
    %79 = arith.addf %75, %78 : vector<8x128xf32>
    %80 = vector.broadcast %10 : vector<1x128xf32> to vector<8x128xf32>
    %81 = arith.addf %79, %80 : vector<8x128xf32>
    %c0_54 = arith.constant 0 : index
    %c0_55 = arith.constant 0 : index
    %82 = vector.load %arg13[%c0_54, %c0_55] : memref<8x32xf32, #tpu.memory_space<vmem>>, vector<8x32xf32>
    %83 = arith.negf %81 : vector<8x128xf32>
    %84 = math.exp %83 : vector<8x128xf32>
    %cst_56 = arith.constant 1.000000e+00 : f32
    %85 = vector.broadcast %cst_56 : f32 to vector<8x128xf32>
    %86 = arith.addf %85, %84 : vector<8x128xf32>
    %87 = arith.divf %85, %86 : vector<8x128xf32>
    %88 = math.tanh %81 : vector<8x128xf32>
    %89 = vector.extract_strided_slice %87 {offsets = [0, 0], sizes = [8, 32], strides = [1, 1]} : vector<8x128xf32> to vector<8x32xf32>
    %90 = vector.extract_strided_slice %87 {offsets = [0, 32], sizes = [8, 32], strides = [1, 1]} : vector<8x128xf32> to vector<8x32xf32>
    %91 = vector.extract_strided_slice %87 {offsets = [0, 64], sizes = [8, 32], strides = [1, 1]} : vector<8x128xf32> to vector<8x32xf32>
    %92 = vector.extract_strided_slice %88 {offsets = [0, 96], sizes = [8, 32], strides = [1, 1]} : vector<8x128xf32> to vector<8x32xf32>
    %93 = arith.mulf %90, %82 : vector<8x32xf32>
    %94 = arith.mulf %89, %92 : vector<8x32xf32>
    %95 = arith.addf %93, %94 : vector<8x32xf32>
    %96 = math.tanh %95 : vector<8x32xf32>
    %97 = arith.mulf %91, %96 : vector<8x32xf32>
    %c0_57 = arith.constant 0 : index
    %c0_58 = arith.constant 0 : index
    %98 = vector.load %arg13[%c0_57, %c0_58] : memref<8x32xf32, #tpu.memory_space<vmem>>, vector<8x32xf32>
    tpu.vector_store %arg13[%c0_57, %c0_58], %95 {strides = array<i32>} : memref<8x32xf32, #tpu.memory_space<vmem>>, vector<8x32xf32>,
    %c0_59 = arith.constant 0 : index
    %c0_60 = arith.constant 0 : index
    %99 = vector.load %arg12[%c0_59, %c0_60] : memref<8x128xf32, #tpu.memory_space<vmem>>, vector<8x32xf32>
    tpu.vector_store %arg12[%c0_59, %c0_60], %97 {strides = array<i32>} : memref<8x128xf32, #tpu.memory_space<vmem>>, vector<8x32xf32>,
    %c3_i32 = arith.constant 3 : i32
    %c0_61 = arith.constant 0 : index
    %c0_62 = arith.constant 0 : index
    %100 = vector.load %arg12[%c0_61, %c0_62] : memref<8x128xf32, #tpu.memory_space<vmem>>, vector<8x128xf32>
    %c0_63 = arith.constant 0 : index
    %c0_64 = arith.constant 0 : index
    %101 = vector.load %arg4[%c0_63, %c0_64] : memref<128x128xf32, #tpu.memory_space<vmem>>, vector<128x128xf32>
    %cst_65 = arith.constant dense<0.000000e+00> : vector<8x128xf32>
    %102 = tpu.matmul %100, %101, %cst_65 {dimension_numbers = #tpu.dot_dimension_numbers<[1], [0], [0], [1], [0, 0, 1, 1], [], []>} : vector<8x128xf32>, vector<128x128xf32>, vector<8x128xf32> -> vector<8x128xf32>
    %103 = arith.index_cast %c3_i32 : i32 to index
    %c0_66 = arith.constant 0 : index
    %c0_67 = arith.constant 0 : index
    %104 = vector.load %arg2[%103, %c0_66, %c0_67] : memref<6x8x128xf32, #tpu.memory_space<vmem>>, vector<1x8x128xf32>
    %105 = vector.shape_cast %104 : vector<1x8x128xf32> to vector<8x128xf32>
    %106 = arith.addf %102, %105 : vector<8x128xf32>
    %107 = vector.broadcast %10 : vector<1x128xf32> to vector<8x128xf32>
    %108 = arith.addf %106, %107 : vector<8x128xf32>
    %c0_68 = arith.constant 0 : index
    %c0_69 = arith.constant 0 : index
    %109 = vector.load %arg13[%c0_68, %c0_69] : memref<8x32xf32, #tpu.memory_space<vmem>>, vector<8x32xf32>
    %110 = arith.negf %108 : vector<8x128xf32>
    %111 = math.exp %110 : vector<8x128xf32>
    %cst_70 = arith.constant 1.000000e+00 : f32
    %112 = vector.broadcast %cst_70 : f32 to vector<8x128xf32>
    %113 = arith.addf %112, %111 : vector<8x128xf32>
    %114 = arith.divf %112, %113 : vector<8x128xf32>
    %115 = math.tanh %108 : vector<8x128xf32>
    %116 = vector.extract_strided_slice %114 {offsets = [0, 0], sizes = [8, 32], strides = [1, 1]} : vector<8x128xf32> to vector<8x32xf32>
    %117 = vector.extract_strided_slice %114 {offsets = [0, 32], sizes = [8, 32], strides = [1, 1]} : vector<8x128xf32> to vector<8x32xf32>
    %118 = vector.extract_strided_slice %114 {offsets = [0, 64], sizes = [8, 32], strides = [1, 1]} : vector<8x128xf32> to vector<8x32xf32>
    %119 = vector.extract_strided_slice %115 {offsets = [0, 96], sizes = [8, 32], strides = [1, 1]} : vector<8x128xf32> to vector<8x32xf32>
    %120 = arith.mulf %117, %109 : vector<8x32xf32>
    %121 = arith.mulf %116, %119 : vector<8x32xf32>
    %122 = arith.addf %120, %121 : vector<8x32xf32>
    %123 = math.tanh %122 : vector<8x32xf32>
    %124 = arith.mulf %118, %123 : vector<8x32xf32>
    %c0_71 = arith.constant 0 : index
    %c0_72 = arith.constant 0 : index
    %125 = vector.load %arg13[%c0_71, %c0_72] : memref<8x32xf32, #tpu.memory_space<vmem>>, vector<8x32xf32>
    tpu.vector_store %arg13[%c0_71, %c0_72], %122 {strides = array<i32>} : memref<8x32xf32, #tpu.memory_space<vmem>>, vector<8x32xf32>,
    %c0_73 = arith.constant 0 : index
    %c0_74 = arith.constant 0 : index
    %126 = vector.load %arg12[%c0_73, %c0_74] : memref<8x128xf32, #tpu.memory_space<vmem>>, vector<8x32xf32>
    tpu.vector_store %arg12[%c0_73, %c0_74], %124 {strides = array<i32>} : memref<8x128xf32, #tpu.memory_space<vmem>>, vector<8x32xf32>,
    %c4_i32 = arith.constant 4 : i32
    %c0_75 = arith.constant 0 : index
    %c0_76 = arith.constant 0 : index
    %127 = vector.load %arg12[%c0_75, %c0_76] : memref<8x128xf32, #tpu.memory_space<vmem>>, vector<8x128xf32>
    %c0_77 = arith.constant 0 : index
    %c0_78 = arith.constant 0 : index
    %128 = vector.load %arg4[%c0_77, %c0_78] : memref<128x128xf32, #tpu.memory_space<vmem>>, vector<128x128xf32>
    %cst_79 = arith.constant dense<0.000000e+00> : vector<8x128xf32>
    %129 = tpu.matmul %127, %128, %cst_79 {dimension_numbers = #tpu.dot_dimension_numbers<[1], [0], [0], [1], [0, 0, 1, 1], [], []>} : vector<8x128xf32>, vector<128x128xf32>, vector<8x128xf32> -> vector<8x128xf32>
    %130 = arith.index_cast %c4_i32 : i32 to index
    %c0_80 = arith.constant 0 : index
    %c0_81 = arith.constant 0 : index
    %131 = vector.load %arg2[%130, %c0_80, %c0_81] : memref<6x8x128xf32, #tpu.memory_space<vmem>>, vector<1x8x128xf32>
    %132 = vector.shape_cast %131 : vector<1x8x128xf32> to vector<8x128xf32>
    %133 = arith.addf %129, %132 : vector<8x128xf32>
    %134 = vector.broadcast %10 : vector<1x128xf32> to vector<8x128xf32>
    %135 = arith.addf %133, %134 : vector<8x128xf32>
    %c0_82 = arith.constant 0 : index
    %c0_83 = arith.constant 0 : index
    %136 = vector.load %arg13[%c0_82, %c0_83] : memref<8x32xf32, #tpu.memory_space<vmem>>, vector<8x32xf32>
    %137 = arith.negf %135 : vector<8x128xf32>
    %138 = math.exp %137 : vector<8x128xf32>
    %cst_84 = arith.constant 1.000000e+00 : f32
    %139 = vector.broadcast %cst_84 : f32 to vector<8x128xf32>
    %140 = arith.addf %139, %138 : vector<8x128xf32>
    %141 = arith.divf %139, %140 : vector<8x128xf32>
    %142 = math.tanh %135 : vector<8x128xf32>
    %143 = vector.extract_strided_slice %141 {offsets = [0, 0], sizes = [8, 32], strides = [1, 1]} : vector<8x128xf32> to vector<8x32xf32>
    %144 = vector.extract_strided_slice %141 {offsets = [0, 32], sizes = [8, 32], strides = [1, 1]} : vector<8x128xf32> to vector<8x32xf32>
    %145 = vector.extract_strided_slice %141 {offsets = [0, 64], sizes = [8, 32], strides = [1, 1]} : vector<8x128xf32> to vector<8x32xf32>
    %146 = vector.extract_strided_slice %142 {offsets = [0, 96], sizes = [8, 32], strides = [1, 1]} : vector<8x128xf32> to vector<8x32xf32>
    %147 = arith.mulf %144, %136 : vector<8x32xf32>
    %148 = arith.mulf %143, %146 : vector<8x32xf32>
    %149 = arith.addf %147, %148 : vector<8x32xf32>
    %150 = math.tanh %149 : vector<8x32xf32>
    %151 = arith.mulf %145, %150 : vector<8x32xf32>
    %c0_85 = arith.constant 0 : index
    %c0_86 = arith.constant 0 : index
    %152 = vector.load %arg13[%c0_85, %c0_86] : memref<8x32xf32, #tpu.memory_space<vmem>>, vector<8x32xf32>
    tpu.vector_store %arg13[%c0_85, %c0_86], %149 {strides = array<i32>} : memref<8x32xf32, #tpu.memory_space<vmem>>, vector<8x32xf32>,
    %c0_87 = arith.constant 0 : index
    %c0_88 = arith.constant 0 : index
    %153 = vector.load %arg12[%c0_87, %c0_88] : memref<8x128xf32, #tpu.memory_space<vmem>>, vector<8x32xf32>
    tpu.vector_store %arg12[%c0_87, %c0_88], %151 {strides = array<i32>} : memref<8x128xf32, #tpu.memory_space<vmem>>, vector<8x32xf32>,
    %c5_i32 = arith.constant 5 : i32
    %c0_89 = arith.constant 0 : index
    %c0_90 = arith.constant 0 : index
    %154 = vector.load %arg12[%c0_89, %c0_90] : memref<8x128xf32, #tpu.memory_space<vmem>>, vector<8x128xf32>
    %c0_91 = arith.constant 0 : index
    %c0_92 = arith.constant 0 : index
    %155 = vector.load %arg4[%c0_91, %c0_92] : memref<128x128xf32, #tpu.memory_space<vmem>>, vector<128x128xf32>
    %cst_93 = arith.constant dense<0.000000e+00> : vector<8x128xf32>
    %156 = tpu.matmul %154, %155, %cst_93 {dimension_numbers = #tpu.dot_dimension_numbers<[1], [0], [0], [1], [0, 0, 1, 1], [], []>} : vector<8x128xf32>, vector<128x128xf32>, vector<8x128xf32> -> vector<8x128xf32>
    %157 = arith.index_cast %c5_i32 : i32 to index
    %c0_94 = arith.constant 0 : index
    %c0_95 = arith.constant 0 : index
    %158 = vector.load %arg2[%157, %c0_94, %c0_95] : memref<6x8x128xf32, #tpu.memory_space<vmem>>, vector<1x8x128xf32>
    %159 = vector.shape_cast %158 : vector<1x8x128xf32> to vector<8x128xf32>
    %160 = arith.addf %156, %159 : vector<8x128xf32>
    %161 = vector.broadcast %10 : vector<1x128xf32> to vector<8x128xf32>
    %162 = arith.addf %160, %161 : vector<8x128xf32>
    %c0_96 = arith.constant 0 : index
    %c0_97 = arith.constant 0 : index
    %163 = vector.load %arg13[%c0_96, %c0_97] : memref<8x32xf32, #tpu.memory_space<vmem>>, vector<8x32xf32>
    %164 = arith.negf %162 : vector<8x128xf32>
    %165 = math.exp %164 : vector<8x128xf32>
    %cst_98 = arith.constant 1.000000e+00 : f32
    %166 = vector.broadcast %cst_98 : f32 to vector<8x128xf32>
    %167 = arith.addf %166, %165 : vector<8x128xf32>
    %168 = arith.divf %166, %167 : vector<8x128xf32>
    %169 = math.tanh %162 : vector<8x128xf32>
    %170 = vector.extract_strided_slice %168 {offsets = [0, 0], sizes = [8, 32], strides = [1, 1]} : vector<8x128xf32> to vector<8x32xf32>
    %171 = vector.extract_strided_slice %168 {offsets = [0, 32], sizes = [8, 32], strides = [1, 1]} : vector<8x128xf32> to vector<8x32xf32>
    %172 = vector.extract_strided_slice %168 {offsets = [0, 64], sizes = [8, 32], strides = [1, 1]} : vector<8x128xf32> to vector<8x32xf32>
    %173 = vector.extract_strided_slice %169 {offsets = [0, 96], sizes = [8, 32], strides = [1, 1]} : vector<8x128xf32> to vector<8x32xf32>
    %174 = arith.mulf %171, %163 : vector<8x32xf32>
    %175 = arith.mulf %170, %173 : vector<8x32xf32>
    %176 = arith.addf %174, %175 : vector<8x32xf32>
    %177 = math.tanh %176 : vector<8x32xf32>
    %178 = arith.mulf %172, %177 : vector<8x32xf32>
    %c0_99 = arith.constant 0 : index
    %c0_100 = arith.constant 0 : index
    %179 = vector.load %arg13[%c0_99, %c0_100] : memref<8x32xf32, #tpu.memory_space<vmem>>, vector<8x32xf32>
    tpu.vector_store %arg13[%c0_99, %c0_100], %176 {strides = array<i32>} : memref<8x32xf32, #tpu.memory_space<vmem>>, vector<8x32xf32>,
    %c0_101 = arith.constant 0 : index
    %c0_102 = arith.constant 0 : index
    %180 = vector.load %arg12[%c0_101, %c0_102] : memref<8x128xf32, #tpu.memory_space<vmem>>, vector<8x32xf32>
    tpu.vector_store %arg12[%c0_101, %c0_102], %178 {strides = array<i32>} : memref<8x128xf32, #tpu.memory_space<vmem>>, vector<8x32xf32>,
    %c6_i32 = arith.constant 6 : i32
    %c0_i32_103 = arith.constant 0 : i32
    %181 = arith.index_cast %c0_i32_103 : i32 to index
    %182 = memref.load %arg1[%181] : memref<4xi32, #tpu.memory_space<smem>>
    %c0_i32_104 = arith.constant 0 : i32
    %183 = arith.cmpi ne, %182, %c0_i32_104 : i32
    %c0_105 = arith.constant 0 : index
    %c0_106 = arith.constant 0 : index
    %184 = vector.load %arg14[%c0_105, %c0_106] : memref<8x128xf32, #tpu.memory_space<vmem>>, vector<8x128xf32>
    %c0_107 = arith.constant 0 : index
    %c0_108 = arith.constant 0 : index
    %185 = vector.load %arg8[%c0_107, %c0_108] : memref<128x128xf32, #tpu.memory_space<vmem>>, vector<128x128xf32>
    %cst_109 = arith.constant dense<0.000000e+00> : vector<8x128xf32>
    %186 = tpu.matmul %184, %185, %cst_109 {dimension_numbers = #tpu.dot_dimension_numbers<[1], [0], [0], [1], [0, 0, 1, 1], [], []>} : vector<8x128xf32>, vector<128x128xf32>, vector<8x128xf32> -> vector<8x128xf32>
    %187 = arith.index_cast %c0_i32_103 : i32 to index
    %c0_110 = arith.constant 0 : index
    %c0_111 = arith.constant 0 : index
    %188 = vector.load %arg3[%187, %c0_110, %c0_111] : memref<5x8x128xf32, #tpu.memory_space<vmem>>, vector<1x8x128xf32>
    %189 = vector.shape_cast %188 : vector<1x8x128xf32> to vector<8x128xf32>
    %190 = arith.select %183, %189, %186 : vector<8x128xf32>
    %c0_112 = arith.constant 0 : index
    %c0_113 = arith.constant 0 : index
    %191 = vector.load %arg12[%c0_112, %c0_113] : memref<8x128xf32, #tpu.memory_space<vmem>>, vector<8x128xf32>
    %c0_114 = arith.constant 0 : index
    %c0_115 = arith.constant 0 : index
    %192 = vector.load %arg6[%c0_114, %c0_115] : memref<128x128xf32, #tpu.memory_space<vmem>>, vector<128x128xf32>
    %cst_116 = arith.constant dense<0.000000e+00> : vector<8x128xf32>
    %193 = tpu.matmul %191, %192, %cst_116 {dimension_numbers = #tpu.dot_dimension_numbers<[1], [0], [0], [1], [0, 0, 1, 1], [], []>} : vector<8x128xf32>, vector<128x128xf32>, vector<8x128xf32> -> vector<8x128xf32>
    %194 = arith.addf %193, %190 : vector<8x128xf32>
    %195 = vector.broadcast %11 : vector<1x128xf32> to vector<8x128xf32>
    %196 = arith.addf %194, %195 : vector<8x128xf32>
    %c0_117 = arith.constant 0 : index
    %c0_118 = arith.constant 0 : index
    %197 = vector.load %arg13[%c0_117, %c0_118] : memref<8x32xf32, #tpu.memory_space<vmem>>, vector<8x32xf32>
    %198 = arith.negf %196 : vector<8x128xf32>
    %199 = math.exp %198 : vector<8x128xf32>
    %cst_119 = arith.constant 1.000000e+00 : f32
    %200 = vector.broadcast %cst_119 : f32 to vector<8x128xf32>
    %201 = arith.addf %200, %199 : vector<8x128xf32>
    %202 = arith.divf %200, %201 : vector<8x128xf32>
    %203 = math.tanh %196 : vector<8x128xf32>
    %204 = vector.extract_strided_slice %202 {offsets = [0, 0], sizes = [8, 32], strides = [1, 1]} : vector<8x128xf32> to vector<8x32xf32>
    %205 = vector.extract_strided_slice %202 {offsets = [0, 32], sizes = [8, 32], strides = [1, 1]} : vector<8x128xf32> to vector<8x32xf32>
    %206 = vector.extract_strided_slice %202 {offsets = [0, 64], sizes = [8, 32], strides = [1, 1]} : vector<8x128xf32> to vector<8x32xf32>
    %207 = vector.extract_strided_slice %203 {offsets = [0, 96], sizes = [8, 32], strides = [1, 1]} : vector<8x128xf32> to vector<8x32xf32>
    %208 = arith.mulf %205, %197 : vector<8x32xf32>
    %209 = arith.mulf %204, %207 : vector<8x32xf32>
    %210 = arith.addf %208, %209 : vector<8x32xf32>
    %211 = math.tanh %210 : vector<8x32xf32>
    %212 = arith.mulf %206, %211 : vector<8x32xf32>
    %c0_120 = arith.constant 0 : index
    %c0_121 = arith.constant 0 : index
    %213 = vector.load %arg13[%c0_120, %c0_121] : memref<8x32xf32, #tpu.memory_space<vmem>>, vector<8x32xf32>
    tpu.vector_store %arg13[%c0_120, %c0_121], %210 {strides = array<i32>} : memref<8x32xf32, #tpu.memory_space<vmem>>, vector<8x32xf32>,
    %c0_122 = arith.constant 0 : index
    %c0_123 = arith.constant 0 : index
    %214 = vector.load %arg12[%c0_122, %c0_123] : memref<8x128xf32, #tpu.memory_space<vmem>>, vector<8x32xf32>
    tpu.vector_store %arg12[%c0_122, %c0_123], %212 {strides = array<i32>} : memref<8x128xf32, #tpu.memory_space<vmem>>, vector<8x32xf32>,
    %c0_124 = arith.constant 0 : index
    %c0_125 = arith.constant 0 : index
    %215 = vector.load %arg12[%c0_124, %c0_125] : memref<8x128xf32, #tpu.memory_space<vmem>>, vector<8x128xf32>
    %c0_126 = arith.constant 0 : index
    %c0_127 = arith.constant 0 : index
    %216 = vector.load %arg9[%c0_126, %c0_127] : memref<128x128xf32, #tpu.memory_space<vmem>>, vector<128x128xf32>
    %cst_128 = arith.constant dense<0.000000e+00> : vector<8x128xf32>
    %217 = tpu.matmul %215, %216, %cst_128 {dimension_numbers = #tpu.dot_dimension_numbers<[1], [0], [0], [1], [0, 0, 1, 1], [], []>} : vector<8x128xf32>, vector<128x128xf32>, vector<8x128xf32> -> vector<8x128xf32>
    %218 = vector.broadcast %12 : vector<1x128xf32> to vector<8x128xf32>
    %219 = arith.addf %217, %218 : vector<8x128xf32>
    %c1_i32_129 = arith.constant 1 : i32
    %220 = arith.addi %c0_i32_103, %c1_i32_129 : i32
    %221 = arith.index_cast %220 : i32 to index
    %c0_130 = arith.constant 0 : index
    %c0_131 = arith.constant 0 : index
    %222 = vector.load %arg11[%221, %c0_130, %c0_131] : memref<5x8x128xf32, #tpu.memory_space<vmem>>, vector<1x8x128xf32>
    %223 = vector.shape_cast %222 : vector<1x8x128xf32> to vector<8x128xf32>
    %224 = vector.shape_cast %219 : vector<8x128xf32> to vector<1x8x128xf32>
    tpu.vector_store %arg11[%221, %c0_130, %c0_131], %224 {strides = array<i32>} : memref<5x8x128xf32, #tpu.memory_space<vmem>>, vector<1x8x128xf32>,
    %225 = arith.addf %219, %18 : vector<8x128xf32>
    %cst_132 = arith.constant dense<0xFF800000> : vector<8xf32>
    %226 = vector.multi_reduction <maximumf>, %225, %cst_132 [1] : vector<8x128xf32> to vector<8xf32>
    %227 = vector.shape_cast %226 : vector<8xf32> to vector<8x1xf32>
    %228 = vector.broadcast %227 : vector<8x1xf32> to vector<8x128xf32>
    %229 = arith.cmpf oeq, %225, %228 : vector<8x128xf32>
    %c128_i32 = arith.constant 128 : i32
    %230 = vector.broadcast %c128_i32 : i32 to vector<8x128xi32>
    %231 = arith.select %229, %13, %230 : vector<8x128xi1>, vector<8x128xi32>
    %cst_133 = arith.constant dense<2147483647> : vector<8xi32>
    %232 = vector.multi_reduction <minsi>, %231, %cst_133 [1] : vector<8x128xi32> to vector<8xi32>
    %233 = vector.shape_cast %232 : vector<8xi32> to vector<8x1xi32>
    %234 = vector.broadcast %233 : vector<8x1xi32> to vector<8x128xi32>
    %235 = arith.cmpi eq, %13, %234 : vector<8x128xi32>
    %236 = arith.extui %235 : vector<8x128xi1> to vector<8x128xi32>
    %237 = arith.sitofp %236 : vector<8x128xi32> to vector<8x128xf32>
    %c0_134 = arith.constant 0 : index
    %c0_135 = arith.constant 0 : index
    %238 = vector.load %arg14[%c0_134, %c0_135] : memref<8x128xf32, #tpu.memory_space<vmem>>, vector<8x128xf32>
    tpu.vector_store %arg14[%c0_134, %c0_135], %237 {strides = array<i32>} : memref<8x128xf32, #tpu.memory_space<vmem>>, vector<8x128xf32>,
    %c1_i32_136 = arith.constant 1 : i32
    %239 = arith.index_cast %c1_i32_136 : i32 to index
    %240 = memref.load %arg1[%239] : memref<4xi32, #tpu.memory_space<smem>>
    %c0_i32_137 = arith.constant 0 : i32
    %241 = arith.cmpi ne, %240, %c0_i32_137 : i32
    %c0_138 = arith.constant 0 : index
    %c0_139 = arith.constant 0 : index
    %242 = vector.load %arg14[%c0_138, %c0_139] : memref<8x128xf32, #tpu.memory_space<vmem>>, vector<8x128xf32>
    %c0_140 = arith.constant 0 : index
    %c0_141 = arith.constant 0 : index
    %243 = vector.load %arg8[%c0_140, %c0_141] : memref<128x128xf32, #tpu.memory_space<vmem>>, vector<128x128xf32>
    %cst_142 = arith.constant dense<0.000000e+00> : vector<8x128xf32>
    %244 = tpu.matmul %242, %243, %cst_142 {dimension_numbers = #tpu.dot_dimension_numbers<[1], [0], [0], [1], [0, 0, 1, 1], [], []>} : vector<8x128xf32>, vector<128x128xf32>, vector<8x128xf32> -> vector<8x128xf32>
    %245 = arith.index_cast %c1_i32_136 : i32 to index
    %c0_143 = arith.constant 0 : index
    %c0_144 = arith.constant 0 : index
    %246 = vector.load %arg3[%245, %c0_143, %c0_144] : memref<5x8x128xf32, #tpu.memory_space<vmem>>, vector<1x8x128xf32>
    %247 = vector.shape_cast %246 : vector<1x8x128xf32> to vector<8x128xf32>
    %248 = arith.select %241, %247, %244 : vector<8x128xf32>
    %c0_145 = arith.constant 0 : index
    %c0_146 = arith.constant 0 : index
    %249 = vector.load %arg12[%c0_145, %c0_146] : memref<8x128xf32, #tpu.memory_space<vmem>>, vector<8x128xf32>
    %c0_147 = arith.constant 0 : index
    %c0_148 = arith.constant 0 : index
    %250 = vector.load %arg6[%c0_147, %c0_148] : memref<128x128xf32, #tpu.memory_space<vmem>>, vector<128x128xf32>
    %cst_149 = arith.constant dense<0.000000e+00> : vector<8x128xf32>
    %251 = tpu.matmul %249, %250, %cst_149 {dimension_numbers = #tpu.dot_dimension_numbers<[1], [0], [0], [1], [0, 0, 1, 1], [], []>} : vector<8x128xf32>, vector<128x128xf32>, vector<8x128xf32> -> vector<8x128xf32>
    %252 = arith.addf %251, %248 : vector<8x128xf32>
    %253 = vector.broadcast %11 : vector<1x128xf32> to vector<8x128xf32>
    %254 = arith.addf %252, %253 : vector<8x128xf32>
    %c0_150 = arith.constant 0 : index
    %c0_151 = arith.constant 0 : index
    %255 = vector.load %arg13[%c0_150, %c0_151] : memref<8x32xf32, #tpu.memory_space<vmem>>, vector<8x32xf32>
    %256 = arith.negf %254 : vector<8x128xf32>
    %257 = math.exp %256 : vector<8x128xf32>
    %cst_152 = arith.constant 1.000000e+00 : f32
    %258 = vector.broadcast %cst_152 : f32 to vector<8x128xf32>
    %259 = arith.addf %258, %257 : vector<8x128xf32>
    %260 = arith.divf %258, %259 : vector<8x128xf32>
    %261 = math.tanh %254 : vector<8x128xf32>
    %262 = vector.extract_strided_slice %260 {offsets = [0, 0], sizes = [8, 32], strides = [1, 1]} : vector<8x128xf32> to vector<8x32xf32>
    %263 = vector.extract_strided_slice %260 {offsets = [0, 32], sizes = [8, 32], strides = [1, 1]} : vector<8x128xf32> to vector<8x32xf32>
    %264 = vector.extract_strided_slice %260 {offsets = [0, 64], sizes = [8, 32], strides = [1, 1]} : vector<8x128xf32> to vector<8x32xf32>
    %265 = vector.extract_strided_slice %261 {offsets = [0, 96], sizes = [8, 32], strides = [1, 1]} : vector<8x128xf32> to vector<8x32xf32>
    %266 = arith.mulf %263, %255 : vector<8x32xf32>
    %267 = arith.mulf %262, %265 : vector<8x32xf32>
    %268 = arith.addf %266, %267 : vector<8x32xf32>
    %269 = math.tanh %268 : vector<8x32xf32>
    %270 = arith.mulf %264, %269 : vector<8x32xf32>
    %c0_153 = arith.constant 0 : index
    %c0_154 = arith.constant 0 : index
    %271 = vector.load %arg13[%c0_153, %c0_154] : memref<8x32xf32, #tpu.memory_space<vmem>>, vector<8x32xf32>
    tpu.vector_store %arg13[%c0_153, %c0_154], %268 {strides = array<i32>} : memref<8x32xf32, #tpu.memory_space<vmem>>, vector<8x32xf32>,
    %c0_155 = arith.constant 0 : index
    %c0_156 = arith.constant 0 : index
    %272 = vector.load %arg12[%c0_155, %c0_156] : memref<8x128xf32, #tpu.memory_space<vmem>>, vector<8x32xf32>
    tpu.vector_store %arg12[%c0_155, %c0_156], %270 {strides = array<i32>} : memref<8x128xf32, #tpu.memory_space<vmem>>, vector<8x32xf32>,
    %c0_157 = arith.constant 0 : index
    %c0_158 = arith.constant 0 : index
    %273 = vector.load %arg12[%c0_157, %c0_158] : memref<8x128xf32, #tpu.memory_space<vmem>>, vector<8x128xf32>
    %c0_159 = arith.constant 0 : index
    %c0_160 = arith.constant 0 : index
    %274 = vector.load %arg9[%c0_159, %c0_160] : memref<128x128xf32, #tpu.memory_space<vmem>>, vector<128x128xf32>
    %cst_161 = arith.constant dense<0.000000e+00> : vector<8x128xf32>
    %275 = tpu.matmul %273, %274, %cst_161 {dimension_numbers = #tpu.dot_dimension_numbers<[1], [0], [0], [1], [0, 0, 1, 1], [], []>} : vector<8x128xf32>, vector<128x128xf32>, vector<8x128xf32> -> vector<8x128xf32>
    %276 = vector.broadcast %12 : vector<1x128xf32> to vector<8x128xf32>
    %277 = arith.addf %275, %276 : vector<8x128xf32>
    %c1_i32_162 = arith.constant 1 : i32
    %278 = arith.addi %c1_i32_136, %c1_i32_162 : i32
    %279 = arith.index_cast %278 : i32 to index
    %c0_163 = arith.constant 0 : index
    %c0_164 = arith.constant 0 : index
    %280 = vector.load %arg11[%279, %c0_163, %c0_164] : memref<5x8x128xf32, #tpu.memory_space<vmem>>, vector<1x8x128xf32>
    %281 = vector.shape_cast %280 : vector<1x8x128xf32> to vector<8x128xf32>
    %282 = vector.shape_cast %277 : vector<8x128xf32> to vector<1x8x128xf32>
    tpu.vector_store %arg11[%279, %c0_163, %c0_164], %282 {strides = array<i32>} : memref<5x8x128xf32, #tpu.memory_space<vmem>>, vector<1x8x128xf32>,
    %283 = arith.addf %277, %18 : vector<8x128xf32>
    %cst_165 = arith.constant dense<0xFF800000> : vector<8xf32>
    %284 = vector.multi_reduction <maximumf>, %283, %cst_165 [1] : vector<8x128xf32> to vector<8xf32>
    %285 = vector.shape_cast %284 : vector<8xf32> to vector<8x1xf32>
    %286 = vector.broadcast %285 : vector<8x1xf32> to vector<8x128xf32>
    %287 = arith.cmpf oeq, %283, %286 : vector<8x128xf32>
    %c128_i32_166 = arith.constant 128 : i32
    %288 = vector.broadcast %c128_i32_166 : i32 to vector<8x128xi32>
    %289 = arith.select %287, %13, %288 : vector<8x128xi1>, vector<8x128xi32>
    %cst_167 = arith.constant dense<2147483647> : vector<8xi32>
    %290 = vector.multi_reduction <minsi>, %289, %cst_167 [1] : vector<8x128xi32> to vector<8xi32>
    %291 = vector.shape_cast %290 : vector<8xi32> to vector<8x1xi32>
    %292 = vector.broadcast %291 : vector<8x1xi32> to vector<8x128xi32>
    %293 = arith.cmpi eq, %13, %292 : vector<8x128xi32>
    %294 = arith.extui %293 : vector<8x128xi1> to vector<8x128xi32>
    %295 = arith.sitofp %294 : vector<8x128xi32> to vector<8x128xf32>
    %c0_168 = arith.constant 0 : index
    %c0_169 = arith.constant 0 : index
    %296 = vector.load %arg14[%c0_168, %c0_169] : memref<8x128xf32, #tpu.memory_space<vmem>>, vector<8x128xf32>
    tpu.vector_store %arg14[%c0_168, %c0_169], %295 {strides = array<i32>} : memref<8x128xf32, #tpu.memory_space<vmem>>, vector<8x128xf32>,
    %c2_i32_170 = arith.constant 2 : i32
    %297 = arith.index_cast %c2_i32_170 : i32 to index
    %298 = memref.load %arg1[%297] : memref<4xi32, #tpu.memory_space<smem>>
    %c0_i32_171 = arith.constant 0 : i32
    %299 = arith.cmpi ne, %298, %c0_i32_171 : i32
    %c0_172 = arith.constant 0 : index
    %c0_173 = arith.constant 0 : index
    %300 = vector.load %arg14[%c0_172, %c0_173] : memref<8x128xf32, #tpu.memory_space<vmem>>, vector<8x128xf32>
    %c0_174 = arith.constant 0 : index
    %c0_175 = arith.constant 0 : index
    %301 = vector.load %arg8[%c0_174, %c0_175] : memref<128x128xf32, #tpu.memory_space<vmem>>, vector<128x128xf32>
    %cst_176 = arith.constant dense<0.000000e+00> : vector<8x128xf32>
    %302 = tpu.matmul %300, %301, %cst_176 {dimension_numbers = #tpu.dot_dimension_numbers<[1], [0], [0], [1], [0, 0, 1, 1], [], []>} : vector<8x128xf32>, vector<128x128xf32>, vector<8x128xf32> -> vector<8x128xf32>
    %303 = arith.index_cast %c2_i32_170 : i32 to index
    %c0_177 = arith.constant 0 : index
    %c0_178 = arith.constant 0 : index
    %304 = vector.load %arg3[%303, %c0_177, %c0_178] : memref<5x8x128xf32, #tpu.memory_space<vmem>>, vector<1x8x128xf32>
    %305 = vector.shape_cast %304 : vector<1x8x128xf32> to vector<8x128xf32>
    %306 = arith.select %299, %305, %302 : vector<8x128xf32>
    %c0_179 = arith.constant 0 : index
    %c0_180 = arith.constant 0 : index
    %307 = vector.load %arg12[%c0_179, %c0_180] : memref<8x128xf32, #tpu.memory_space<vmem>>, vector<8x128xf32>
    %c0_181 = arith.constant 0 : index
    %c0_182 = arith.constant 0 : index
    %308 = vector.load %arg6[%c0_181, %c0_182] : memref<128x128xf32, #tpu.memory_space<vmem>>, vector<128x128xf32>
    %cst_183 = arith.constant dense<0.000000e+00> : vector<8x128xf32>
    %309 = tpu.matmul %307, %308, %cst_183 {dimension_numbers = #tpu.dot_dimension_numbers<[1], [0], [0], [1], [0, 0, 1, 1], [], []>} : vector<8x128xf32>, vector<128x128xf32>, vector<8x128xf32> -> vector<8x128xf32>
    %310 = arith.addf %309, %306 : vector<8x128xf32>
    %311 = vector.broadcast %11 : vector<1x128xf32> to vector<8x128xf32>
    %312 = arith.addf %310, %311 : vector<8x128xf32>
    %c0_184 = arith.constant 0 : index
    %c0_185 = arith.constant 0 : index
    %313 = vector.load %arg13[%c0_184, %c0_185] : memref<8x32xf32, #tpu.memory_space<vmem>>, vector<8x32xf32>
    %314 = arith.negf %312 : vector<8x128xf32>
    %315 = math.exp %314 : vector<8x128xf32>
    %cst_186 = arith.constant 1.000000e+00 : f32
    %316 = vector.broadcast %cst_186 : f32 to vector<8x128xf32>
    %317 = arith.addf %316, %315 : vector<8x128xf32>
    %318 = arith.divf %316, %317 : vector<8x128xf32>
    %319 = math.tanh %312 : vector<8x128xf32>
    %320 = vector.extract_strided_slice %318 {offsets = [0, 0], sizes = [8, 32], strides = [1, 1]} : vector<8x128xf32> to vector<8x32xf32>
    %321 = vector.extract_strided_slice %318 {offsets = [0, 32], sizes = [8, 32], strides = [1, 1]} : vector<8x128xf32> to vector<8x32xf32>
    %322 = vector.extract_strided_slice %318 {offsets = [0, 64], sizes = [8, 32], strides = [1, 1]} : vector<8x128xf32> to vector<8x32xf32>
    %323 = vector.extract_strided_slice %319 {offsets = [0, 96], sizes = [8, 32], strides = [1, 1]} : vector<8x128xf32> to vector<8x32xf32>
    %324 = arith.mulf %321, %313 : vector<8x32xf32>
    %325 = arith.mulf %320, %323 : vector<8x32xf32>
    %326 = arith.addf %324, %325 : vector<8x32xf32>
    %327 = math.tanh %326 : vector<8x32xf32>
    %328 = arith.mulf %322, %327 : vector<8x32xf32>
    %c0_187 = arith.constant 0 : index
    %c0_188 = arith.constant 0 : index
    %329 = vector.load %arg13[%c0_187, %c0_188] : memref<8x32xf32, #tpu.memory_space<vmem>>, vector<8x32xf32>
    tpu.vector_store %arg13[%c0_187, %c0_188], %326 {strides = array<i32>} : memref<8x32xf32, #tpu.memory_space<vmem>>, vector<8x32xf32>,
    %c0_189 = arith.constant 0 : index
    %c0_190 = arith.constant 0 : index
    %330 = vector.load %arg12[%c0_189, %c0_190] : memref<8x128xf32, #tpu.memory_space<vmem>>, vector<8x32xf32>
    tpu.vector_store %arg12[%c0_189, %c0_190], %328 {strides = array<i32>} : memref<8x128xf32, #tpu.memory_space<vmem>>, vector<8x32xf32>,
    %c0_191 = arith.constant 0 : index
    %c0_192 = arith.constant 0 : index
    %331 = vector.load %arg12[%c0_191, %c0_192] : memref<8x128xf32, #tpu.memory_space<vmem>>, vector<8x128xf32>
    %c0_193 = arith.constant 0 : index
    %c0_194 = arith.constant 0 : index
    %332 = vector.load %arg9[%c0_193, %c0_194] : memref<128x128xf32, #tpu.memory_space<vmem>>, vector<128x128xf32>
    %cst_195 = arith.constant dense<0.000000e+00> : vector<8x128xf32>
    %333 = tpu.matmul %331, %332, %cst_195 {dimension_numbers = #tpu.dot_dimension_numbers<[1], [0], [0], [1], [0, 0, 1, 1], [], []>} : vector<8x128xf32>, vector<128x128xf32>, vector<8x128xf32> -> vector<8x128xf32>
    %334 = vector.broadcast %12 : vector<1x128xf32> to vector<8x128xf32>
    %335 = arith.addf %333, %334 : vector<8x128xf32>
    %c1_i32_196 = arith.constant 1 : i32
    %336 = arith.addi %c2_i32_170, %c1_i32_196 : i32
    %337 = arith.index_cast %336 : i32 to index
    %c0_197 = arith.constant 0 : index
    %c0_198 = arith.constant 0 : index
    %338 = vector.load %arg11[%337, %c0_197, %c0_198] : memref<5x8x128xf32, #tpu.memory_space<vmem>>, vector<1x8x128xf32>
    %339 = vector.shape_cast %338 : vector<1x8x128xf32> to vector<8x128xf32>
    %340 = vector.shape_cast %335 : vector<8x128xf32> to vector<1x8x128xf32>
    tpu.vector_store %arg11[%337, %c0_197, %c0_198], %340 {strides = array<i32>} : memref<5x8x128xf32, #tpu.memory_space<vmem>>, vector<1x8x128xf32>,
    %341 = arith.addf %335, %18 : vector<8x128xf32>
    %cst_199 = arith.constant dense<0xFF800000> : vector<8xf32>
    %342 = vector.multi_reduction <maximumf>, %341, %cst_199 [1] : vector<8x128xf32> to vector<8xf32>
    %343 = vector.shape_cast %342 : vector<8xf32> to vector<8x1xf32>
    %344 = vector.broadcast %343 : vector<8x1xf32> to vector<8x128xf32>
    %345 = arith.cmpf oeq, %341, %344 : vector<8x128xf32>
    %c128_i32_200 = arith.constant 128 : i32
    %346 = vector.broadcast %c128_i32_200 : i32 to vector<8x128xi32>
    %347 = arith.select %345, %13, %346 : vector<8x128xi1>, vector<8x128xi32>
    %cst_201 = arith.constant dense<2147483647> : vector<8xi32>
    %348 = vector.multi_reduction <minsi>, %347, %cst_201 [1] : vector<8x128xi32> to vector<8xi32>
    %349 = vector.shape_cast %348 : vector<8xi32> to vector<8x1xi32>
    %350 = vector.broadcast %349 : vector<8x1xi32> to vector<8x128xi32>
    %351 = arith.cmpi eq, %13, %350 : vector<8x128xi32>
    %352 = arith.extui %351 : vector<8x128xi1> to vector<8x128xi32>
    %353 = arith.sitofp %352 : vector<8x128xi32> to vector<8x128xf32>
    %c0_202 = arith.constant 0 : index
    %c0_203 = arith.constant 0 : index
    %354 = vector.load %arg14[%c0_202, %c0_203] : memref<8x128xf32, #tpu.memory_space<vmem>>, vector<8x128xf32>
    tpu.vector_store %arg14[%c0_202, %c0_203], %353 {strides = array<i32>} : memref<8x128xf32, #tpu.memory_space<vmem>>, vector<8x128xf32>,
    %c3_i32_204 = arith.constant 3 : i32
    %355 = arith.index_cast %c3_i32_204 : i32 to index
    %356 = memref.load %arg1[%355] : memref<4xi32, #tpu.memory_space<smem>>
    %c0_i32_205 = arith.constant 0 : i32
    %357 = arith.cmpi ne, %356, %c0_i32_205 : i32
    %c0_206 = arith.constant 0 : index
    %c0_207 = arith.constant 0 : index
    %358 = vector.load %arg14[%c0_206, %c0_207] : memref<8x128xf32, #tpu.memory_space<vmem>>, vector<8x128xf32>
    %c0_208 = arith.constant 0 : index
    %c0_209 = arith.constant 0 : index
    %359 = vector.load %arg8[%c0_208, %c0_209] : memref<128x128xf32, #tpu.memory_space<vmem>>, vector<128x128xf32>
    %cst_210 = arith.constant dense<0.000000e+00> : vector<8x128xf32>
    %360 = tpu.matmul %358, %359, %cst_210 {dimension_numbers = #tpu.dot_dimension_numbers<[1], [0], [0], [1], [0, 0, 1, 1], [], []>} : vector<8x128xf32>, vector<128x128xf32>, vector<8x128xf32> -> vector<8x128xf32>
    %361 = arith.index_cast %c3_i32_204 : i32 to index
    %c0_211 = arith.constant 0 : index
    %c0_212 = arith.constant 0 : index
    %362 = vector.load %arg3[%361, %c0_211, %c0_212] : memref<5x8x128xf32, #tpu.memory_space<vmem>>, vector<1x8x128xf32>
    %363 = vector.shape_cast %362 : vector<1x8x128xf32> to vector<8x128xf32>
    %364 = arith.select %357, %363, %360 : vector<8x128xf32>
    %c0_213 = arith.constant 0 : index
    %c0_214 = arith.constant 0 : index
    %365 = vector.load %arg12[%c0_213, %c0_214] : memref<8x128xf32, #tpu.memory_space<vmem>>, vector<8x128xf32>
    %c0_215 = arith.constant 0 : index
    %c0_216 = arith.constant 0 : index
    %366 = vector.load %arg6[%c0_215, %c0_216] : memref<128x128xf32, #tpu.memory_space<vmem>>, vector<128x128xf32>
    %cst_217 = arith.constant dense<0.000000e+00> : vector<8x128xf32>
    %367 = tpu.matmul %365, %366, %cst_217 {dimension_numbers = #tpu.dot_dimension_numbers<[1], [0], [0], [1], [0, 0, 1, 1], [], []>} : vector<8x128xf32>, vector<128x128xf32>, vector<8x128xf32> -> vector<8x128xf32>
    %368 = arith.addf %367, %364 : vector<8x128xf32>
    %369 = vector.broadcast %11 : vector<1x128xf32> to vector<8x128xf32>
    %370 = arith.addf %368, %369 : vector<8x128xf32>
    %c0_218 = arith.constant 0 : index
    %c0_219 = arith.constant 0 : index
    %371 = vector.load %arg13[%c0_218, %c0_219] : memref<8x32xf32, #tpu.memory_space<vmem>>, vector<8x32xf32>
    %372 = arith.negf %370 : vector<8x128xf32>
    %373 = math.exp %372 : vector<8x128xf32>
    %cst_220 = arith.constant 1.000000e+00 : f32
    %374 = vector.broadcast %cst_220 : f32 to vector<8x128xf32>
    %375 = arith.addf %374, %373 : vector<8x128xf32>
    %376 = arith.divf %374, %375 : vector<8x128xf32>
    %377 = math.tanh %370 : vector<8x128xf32>
    %378 = vector.extract_strided_slice %376 {offsets = [0, 0], sizes = [8, 32], strides = [1, 1]} : vector<8x128xf32> to vector<8x32xf32>
    %379 = vector.extract_strided_slice %376 {offsets = [0, 32], sizes = [8, 32], strides = [1, 1]} : vector<8x128xf32> to vector<8x32xf32>
    %380 = vector.extract_strided_slice %376 {offsets = [0, 64], sizes = [8, 32], strides = [1, 1]} : vector<8x128xf32> to vector<8x32xf32>
    %381 = vector.extract_strided_slice %377 {offsets = [0, 96], sizes = [8, 32], strides = [1, 1]} : vector<8x128xf32> to vector<8x32xf32>
    %382 = arith.mulf %379, %371 : vector<8x32xf32>
    %383 = arith.mulf %378, %381 : vector<8x32xf32>
    %384 = arith.addf %382, %383 : vector<8x32xf32>
    %385 = math.tanh %384 : vector<8x32xf32>
    %386 = arith.mulf %380, %385 : vector<8x32xf32>
    %c0_221 = arith.constant 0 : index
    %c0_222 = arith.constant 0 : index
    %387 = vector.load %arg13[%c0_221, %c0_222] : memref<8x32xf32, #tpu.memory_space<vmem>>, vector<8x32xf32>
    tpu.vector_store %arg13[%c0_221, %c0_222], %384 {strides = array<i32>} : memref<8x32xf32, #tpu.memory_space<vmem>>, vector<8x32xf32>,
    %c0_223 = arith.constant 0 : index
    %c0_224 = arith.constant 0 : index
    %388 = vector.load %arg12[%c0_223, %c0_224] : memref<8x128xf32, #tpu.memory_space<vmem>>, vector<8x32xf32>
    tpu.vector_store %arg12[%c0_223, %c0_224], %386 {strides = array<i32>} : memref<8x128xf32, #tpu.memory_space<vmem>>, vector<8x32xf32>,
    %c0_225 = arith.constant 0 : index
    %c0_226 = arith.constant 0 : index
    %389 = vector.load %arg12[%c0_225, %c0_226] : memref<8x128xf32, #tpu.memory_space<vmem>>, vector<8x128xf32>
    %c0_227 = arith.constant 0 : index
    %c0_228 = arith.constant 0 : index
    %390 = vector.load %arg9[%c0_227, %c0_228] : memref<128x128xf32, #tpu.memory_space<vmem>>, vector<128x128xf32>
    %cst_229 = arith.constant dense<0.000000e+00> : vector<8x128xf32>
    %391 = tpu.matmul %389, %390, %cst_229 {dimension_numbers = #tpu.dot_dimension_numbers<[1], [0], [0], [1], [0, 0, 1, 1], [], []>} : vector<8x128xf32>, vector<128x128xf32>, vector<8x128xf32> -> vector<8x128xf32>
    %392 = vector.broadcast %12 : vector<1x128xf32> to vector<8x128xf32>
    %393 = arith.addf %391, %392 : vector<8x128xf32>
    %c1_i32_230 = arith.constant 1 : i32
    %394 = arith.addi %c3_i32_204, %c1_i32_230 : i32
    %395 = arith.index_cast %394 : i32 to index
    %c0_231 = arith.constant 0 : index
    %c0_232 = arith.constant 0 : index
    %396 = vector.load %arg11[%395, %c0_231, %c0_232] : memref<5x8x128xf32, #tpu.memory_space<vmem>>, vector<1x8x128xf32>
    %397 = vector.shape_cast %396 : vector<1x8x128xf32> to vector<8x128xf32>
    %398 = vector.shape_cast %393 : vector<8x128xf32> to vector<1x8x128xf32>
    tpu.vector_store %arg11[%395, %c0_231, %c0_232], %398 {strides = array<i32>} : memref<5x8x128xf32, #tpu.memory_space<vmem>>, vector<1x8x128xf32>,
    %399 = arith.addf %393, %18 : vector<8x128xf32>
    %cst_233 = arith.constant dense<0xFF800000> : vector<8xf32>
    %400 = vector.multi_reduction <maximumf>, %399, %cst_233 [1] : vector<8x128xf32> to vector<8xf32>
    %401 = vector.shape_cast %400 : vector<8xf32> to vector<8x1xf32>
    %402 = vector.broadcast %401 : vector<8x1xf32> to vector<8x128xf32>
    %403 = arith.cmpf oeq, %399, %402 : vector<8x128xf32>
    %c128_i32_234 = arith.constant 128 : i32
    %404 = vector.broadcast %c128_i32_234 : i32 to vector<8x128xi32>
    %405 = arith.select %403, %13, %404 : vector<8x128xi1>, vector<8x128xi32>
    %cst_235 = arith.constant dense<2147483647> : vector<8xi32>
    %406 = vector.multi_reduction <minsi>, %405, %cst_235 [1] : vector<8x128xi32> to vector<8xi32>
    %407 = vector.shape_cast %406 : vector<8xi32> to vector<8x1xi32>
    %408 = vector.broadcast %407 : vector<8x1xi32> to vector<8x128xi32>
    %409 = arith.cmpi eq, %13, %408 : vector<8x128xi32>
    %410 = arith.extui %409 : vector<8x128xi1> to vector<8x128xi32>
    %411 = arith.sitofp %410 : vector<8x128xi32> to vector<8x128xf32>
    %c0_236 = arith.constant 0 : index
    %c0_237 = arith.constant 0 : index
    %412 = vector.load %arg14[%c0_236, %c0_237] : memref<8x128xf32, #tpu.memory_space<vmem>>, vector<8x128xf32>
    tpu.vector_store %arg14[%c0_236, %c0_237], %411 {strides = array<i32>} : memref<8x128xf32, #tpu.memory_space<vmem>>, vector<8x128xf32>,
    %c4_i32_238 = arith.constant 4 : i32
    return
  }
  func.func @transform_0(%arg0: i32, %arg1: memref<4xi32, #tpu.memory_space<smem>>) -> (i32, i32, i32) {
    %c0_i32 = arith.constant 0 : i32
    %c0_i32_0 = arith.constant 0 : i32
    %c0_i32_1 = arith.constant 0 : i32
    return %c0_i32, %arg0, %c0_i32_0 : i32, i32, i32
  }
  func.func @transform_1(%arg0: i32, %arg1: memref<4xi32, #tpu.memory_space<smem>>) -> (i32, i32, i32) {
    %c0_i32 = arith.constant 0 : i32
    %c0_i32_0 = arith.constant 0 : i32
    %c0_i32_1 = arith.constant 0 : i32
    return %c0_i32, %arg0, %c0_i32_0 : i32, i32, i32
  }
  func.func @transform_2(%arg0: i32, %arg1: memref<4xi32, #tpu.memory_space<smem>>) -> (i32, i32) {
    %c0_i32 = arith.constant 0 : i32
    %c0_i32_0 = arith.constant 0 : i32
    %c0_i32_1 = arith.constant 0 : i32
    return %c0_i32, %c0_i32_0 : i32, i32
  }
  func.func @transform_3(%arg0: i32, %arg1: memref<4xi32, #tpu.memory_space<smem>>) -> (i32, i32) {
    %c0_i32 = arith.constant 0 : i32
    %c0_i32_0 = arith.constant 0 : i32
    %c0_i32_1 = arith.constant 0 : i32
    return %c0_i32, %c0_i32_0 : i32, i32
  }
  func.func @transform_4(%arg0: i32, %arg1: memref<4xi32, #tpu.memory_space<smem>>) -> (i32, i32) {
    %c0_i32 = arith.constant 0 : i32
    %c0_i32_0 = arith.constant 0 : i32
    %c0_i32_1 = arith.constant 0 : i32
    return %c0_i32, %c0_i32_0 : i32, i32
  }
  func.func @transform_5(%arg0: i32, %arg1: memref<4xi32, #tpu.memory_space<smem>>) -> (i32, i32) {
    %c0_i32 = arith.constant 0 : i32
    %c0_i32_0 = arith.constant 0 : i32
    %c0_i32_1 = arith.constant 0 : i32
    return %c0_i32, %c0_i32_0 : i32, i32
  }
  func.func @transform_6(%arg0: i32, %arg1: memref<4xi32, #tpu.memory_space<smem>>) -> (i32, i32) {
    %c0_i32 = arith.constant 0 : i32
    %c0_i32_0 = arith.constant 0 : i32
    %c0_i32_1 = arith.constant 0 : i32
    return %c0_i32, %c0_i32_0 : i32, i32
  }
  func.func @transform_7(%arg0: i32, %arg1: memref<4xi32, #tpu.memory_space<smem>>) -> (i32, i32) {
    %c0_i32 = arith.constant 0 : i32
    %c0_i32_0 = arith.constant 0 : i32
    %c0_i32_1 = arith.constant 0 : i32
    return %c0_i32, %c0_i32_0 : i32, i32
  }
  func.func @transform_8(%arg0: i32, %arg1: memref<4xi32, #tpu.memory_space<smem>>) -> (i32, i32) {
    %c0_i32 = arith.constant 0 : i32
    %c0_i32_0 = arith.constant 0 : i32
    %c0_i32_1 = arith.constant 0 : i32
    return %c0_i32, %c0_i32_0 : i32, i32
  }
  func.func @transform_9(%arg0: i32, %arg1: memref<4xi32, #tpu.memory_space<smem>>) -> (i32, i32, i32) {
    %c0_i32 = arith.constant 0 : i32
    %c0_i32_0 = arith.constant 0 : i32
    %c0_i32_1 = arith.constant 0 : i32
    return %c0_i32, %arg0, %c0_i32_0 : i32, i32, i32
  }
}

</mosaic_0001>

<bundles_post_ra>
// kernel: _forward_jit.1
= control target key start
LH: loop header
LB: loop body
LE: loop exit
PB: predicated region body
PF: predicated region fallthrough
CT: control target
= control target key end

     0   :  { %s5297_s0 = inlined_call_operand.vmem [shape: s32[4], index: 0, kind: input, shape index: {}]   ;;  %s5298_s1 = inlined_call_operand.vmem [shape: f32[6,16,128], index: 1, kind: input, shape index: {}]   ;;  %s5299_s2 = inlined_call_operand.vmem [shape: f32[5,16,128], index: 2, kind: input, shape index: {}]   ;;  %s5300_s3 = inlined_call_operand.vmem [shape: f32[128,128], index: 3, kind: input, shape index: {}]   ;;  %s5301_s4 = inlined_call_operand.vmem [shape: f32[1,128], index: 4, kind: input, shape index: {}]   ;;  %s5302_s5 = inlined_call_operand.vmem [shape: f32[128,128], index: 5, kind: input, shape index: {}]   ;;  %s5303_s6 = inlined_call_operand.vmem [shape: f32[1,128], index: 6, kind: input, shape index: {}]   ;;  %s5304_s7 = inlined_call_operand.vmem [shape: f32[128,128], index: 7, kind: input, shape index: {}]   ;;  %s5305_s8 = inlined_call_operand.vmem [shape: f32[128,128], index: 8, kind: input, shape index: {}]   ;;  %s5306_s9 = inlined_call_operand.vmem [shape: f32[1,128], index: 9, kind: input, shape index: {}]   ;;  %s5307_s10 = inlined_call_operand.hbm [shape: f32[5,16,128], index: 10, kind: output, shape index: {}]  }
   0x1   :  { %s15_s15 = sshll.u32 %s5297_s0, 4  ;;  %s16_s15 = int_to_ptr.vmem [resolvable:$true] %s15_s15 }
   0x2   :  { %s3817_s16 = scalar_lea.vmem %s16_s15, 16  ;;  %p3822_p1 = scmp.lt.s32.totalorder %s16_s15, %s16_s15 }
   0x3   :  { %p3818_p0 = scmp.ne.s32.totalorder %s16_s15, %s3817_s16  ;;  %p3823_p2 = scmp.lt.s32.totalorder %s3817_s16, %s3817_s16 }
   0x5   :  { %p3824_p3 = por %p3823_p2, %p3822_p1 }
   0x7   :  { %p3825_p4 = pnand %p3824_p3, %p3818_p0 }
   0x9   :  { %3828 = shalt.err (!%p3825_p4)  }
   0xa   :  { %s3893_s17 = smov [#allocation6]  }
   0xb   :  { %18 = dma.vmem_to_smem %s16_s15, 16, %s3893_s17, [#allocation5] }
   0xc   :  { %3871 = dma.done.wait [#allocation5], 16 }
   0xd   :  { %3872 = vsyncadd [#allocation5], 4294967280 }
   0xe   :  { %20 = sfence }
   0xf   :  { %21 = vsyncpa [#allocation10], 0 }
  0x10   :  { %23 = vsyncpa [#allocation10 + $0x1], 0  ;;  %s3963_s18 = smov 0   ;;  %s3965_s19 = smov 0  }
  0x11   :  { %s3967_s0 = smov 0   ;;  %s3969_s20 = smov 0  }
  0x12 LB: > { %s5308_s21 = sadd.s32 4294967295, %s3891_s20   ;;  %s2701_s22 = sadd.s32 4294967294, %s3891_s20   ;;  %s3891_s20 = sphi %s3969_s20, %s5318_s20   ;;  %s3887_s0 = sphi %s3967_s0, %s5317_s0   ;;  %s3883_s19 = sphi %s3965_s19, %s5316_s19   ;;  %s3879_s18 = sphi %s3963_s18, %s5315_s18  }
  0x13   : > { %s3986_s23 = sadd.s32 1, %s3891_s20   ;;  %s36_s24 = sadd.s32 1, %s3887_s0 }
  0x14   : > { %s33_s25 = ssub.s32 %s3891_s20, %s3986_s23  ;;  %p43_p5 = scmp.ne.s32.totalorder %s3887_s0, %s3883_s19 }
  0x15   : > { %p34_p6 = scmp.eq.s32.totalorder %s33_s25, 0  ;;  %p44_p7 = scmp.eq.s32.totalorder %s3891_s20, 0 }
  0x16   : > { %p246_p8 = scmp.eq.s32.totalorder %s5308_s21, 1  ;;  %p251_p9 = scmp.ne.s32.totalorder %s3883_s19, %s3879_s18 }
  0x17   : > { %s3999_s26 = scalar_select %p34_p6, %s3887_s0, %s36_s24  }
  0x18   : > { %p4001_p10 = por %p44_p7, %p43_p5  ;;  %p4005_p11 = por %p246_p8, %p43_p5 }
  0x19   : > { %p252_p12 = scmp.eq.s32.totalorder %s2701_s22, 1  ;;  %p2703_p0 = scmp.ge.s32.totalorder %s3891_s20, 2 }
  0x1b   : > { %p4009_p13 = por %p252_p12, %p251_p9  ;;  %289 = sbr.rel (%p2703_p0) target bundleno = 46 (0x2e), region = 44 }
  0x20   : > { %292 = sbr.rel (!%p4001_p10) target bundleno = 39 (0x27), region = 48  ;;  %s294_s30 = sand.u32 (%p4001_p10), 1, %s3887_s0  }
  0x21   : > { %s2704_s11 = sshll.u32 (%p4001_p10), %s3891_s20, 3  ;;  %s3681_s12 = smul.u32 (%p4001_p10), 48, %s294_s30 }
  0x22   : > { %s298_s15 = scalar_lea.vmem (%p4001_p10), %s5298_s1, %s2704_s11 }
  0x23   : > { %v337_v0 = vld [vmem:[%s298_s15] sm:$0xff] (%p4001_p10)  ;;  %v339_v1 = vld [vmem:[%s298_s15 + $0x10] sm:$0xff] (%p4001_p10)  ;;  %s296_s16 = scalar_lea.vmem (%p4001_p10), [#allocation7], %s3681_s12 }
  0x24   : > { %v341_v2 = vld [vmem:[%s298_s15 + $0x20] sm:$0xff] (%p4001_p10)  ;;  %v343_v3 = vld [vmem:[%s298_s15 + $0x30] sm:$0xff] (%p4001_p10)  ;;  %338 = vst [vmem:[%s296_s16] sm:$0xff] (%p4001_p10), %v337_v0  ;;  %340 = vst [vmem:[%s296_s16 + $0x8] sm:$0xff] (%p4001_p10), %v339_v1 }
  0x25   : > { %v345_v4 = vld [vmem:[%s298_s15 + $0x40] sm:$0xff]  ;;  %v347_v5 = vld [vmem:[%s298_s15 + $0x50] sm:$0xff]  ;;  %342 = vst [vmem:[%s296_s16 + $0x10] sm:$0xff] %v341_v2  ;;  %344 = vst [vmem:[%s296_s16 + $0x18] sm:$0xff] %v343_v3 }
  0x26   : > { %346 = vst [vmem:[%s296_s16 + $0x20] sm:$0xff] %v345_v4  ;;  %348 = vst [vmem:[%s296_s16 + $0x28] sm:$0xff] %v347_v5 }
  0x27 PF: > { %354 = sbr.rel (!%p4001_p10) target bundleno = 46 (0x2e), region = 86  ;;  %s356_s17 = sand.u32 (%p4001_p10), 1, %s3887_s0  }
  0x28   : > { %s2705_s22 = sshll.u32 (%p4001_p10), %s3891_s20, 3  ;;  %s3682_s24 = smul.u32 (%p4001_p10), 40, %s356_s17 }
  0x29   : > { %s360_s11 = scalar_lea.vmem (%p4001_p10), %s5299_s2, %s2705_s22 }
  0x2a   : > { %v397_v6 = vld [vmem:[%s360_s11] sm:$0xff] (%p4001_p10)  ;;  %v399_v7 = vld [vmem:[%s360_s11 + $0x10] sm:$0xff] (%p4001_p10)  ;;  %s358_s12 = scalar_lea.vmem (%p4001_p10), [#allocation8], %s3682_s24 }
  0x2b   : > { %v401_v8 = vld [vmem:[%s360_s11 + $0x20] sm:$0xff] (%p4001_p10)  ;;  %v403_v9 = vld [vmem:[%s360_s11 + $0x30] sm:$0xff] (%p4001_p10)  ;;  %398 = vst [vmem:[%s358_s12] sm:$0xff] (%p4001_p10), %v397_v6  ;;  %400 = vst [vmem:[%s358_s12 + $0x8] sm:$0xff] (%p4001_p10), %v399_v7 }
  0x2c   : > { %v405_v10 = vld [vmem:[%s360_s11 + $0x40] sm:$0xff]  ;;  %402 = vst [vmem:[%s358_s12 + $0x10] sm:$0xff] %v401_v8  ;;  %404 = vst [vmem:[%s358_s12 + $0x18] sm:$0xff] %v403_v9 }
  0x2d   : > { %406 = vst [vmem:[%s358_s12 + $0x20] sm:$0xff] %v405_v10 }
  0x2e PF: > { %p2706_p1 = scmp.ge.s32.totalorder %s3891_s20, 1  ;;  %p411_p2 = scmp.lt.s32.totalorder %s3891_s20, 3 }
  0x30   : > { %p412_p3 = pnand %p2706_p1, %p411_p2 }
  0x31   : > { %s4221_s25 = sand.u32 (!%p412_p3), 1, %s3883_s19   ;;  %s3896_s13 = smov (!%p412_p3), 32  }
  0x32   : > { %415 = sbr.rel (%p412_p3) target bundleno = 9163 (0x23cb), region = 124  ;;  %s3897_s14 = smov (!%p412_p3), 96  }
  0x33   : > { %s3683_s30 = smul.u32 (!%p412_p3), 48, %s4221_s25  ;;  %s5309_s15 = smov (!%p412_p3), 64  }
  0x34   : > { %s1255_s16 = sld [smem:[#allocation6]] (!%p412_p3)  ;;  %s3684_s17 = smul.u32 (!%p412_p3), 40, %s4221_s25 }
  0x35   : > { %s4224_s11 = scalar_lea.vmem (!%p412_p3), [#allocation7], %s3683_s30  ;;  %s2724_s30 = sld [smem:[#allocation6 + $0x1]] (!%p412_p3) }
  0x36   : > { %s4667_s24 = scalar_lea.vmem (!%p412_p3), [#allocation8], %s3684_s17  ;;  %s2729_s12 = sld [smem:[#allocation6 + $0x2]] (!%p412_p3) }
  0x37   : > { %v4035_v11 = vld [vmem:[%s5300_s3 + $0x78] sm:$0xff]  ;;  %v3894_v12 = vmov 0.0   ;;  %v4042_v13 = vld [vmem:[%s5300_s3 + $0x70] sm:$0xff]  ;;  %vm3895_vm0 = vmmov 0   ;;  %v4052_v14 = vld [vmem:[%s5300_s3 + $0x68] sm:$0xff]  ;;  %vm465_vm1 = vcmask 261120  }
  0x38   : > { %3051 = vmatprep.subr.mxu0 %v3894_v12  ;;  %464 = vst [vmem:[#allocation2] sm:$0xff] %v3894_v12  ;;  %3083 = vmatprep.mubr.msk.f32.mxu0 %vm3895_vm0, %v3894_v12  ;;  %v4061_v15 = vld [vmem:[%s5300_s3 + $0x60] sm:$0xff]  ;;  %v4070_v16 = vld [vmem:[%s5300_s3 + $0x58] sm:$0xff]  ;;  %v4079_v17 = vld [vmem:[%s5300_s3 + $0x50] sm:$0xff] }
  0x39   : > { %3052 = vmatpush3.msra.mxu0 %v4035_v11  ;;  %3086 = vmatprep.subr.mxu1 %v3894_v12  ;;  %v4088_v18 = vld [vmem:[%s5300_s3 + $0x48] sm:$0xff]  ;;  %v4097_v19 = vld [vmem:[%s5300_s3 + $0x40] sm:$0xff]  ;;  %v4106_v20 = vld [vmem:[%s5300_s3 + $0x38] sm:$0xff]  ;;  %466 = vst.msk [vmem:[#allocation3] sm:$0xff] %vm465_vm1, %v3894_v12 }
  0x3a   : > { %3053 = vmatprep.subr.mxu0 %v3894_v12  ;;  %3087 = vmatpush3.msra.mxu1 %v4035_v11  ;;  %v4115_v21 = vld [vmem:[%s5300_s3 + $0x30] sm:$0xff]  ;;  %v4124_v22 = vld [vmem:[%s5300_s3 + $0x28] sm:$0xff]  ;;  %v4133_v23 = vld [vmem:[%s5300_s3 + $0x20] sm:$0xff]  ;;  %p1256_p4 = scmp.ne.s32.totalorder %s1255_s16, 0  ;;  %s4797_s16 = scalar_lea.vmem [#allocation9], %s3684_s17 }
  0x3b   : > { %3054 = vmatpush3.msra.mxu0 %v4042_v13  ;;  %3088 = vmatprep.subr.mxu1 %v3894_v12  ;;  %v4142_v24 = vld [vmem:[%s5300_s3 + $0x18] sm:$0xff]  ;;  %v4151_v25 = vld [vmem:[%s5300_s3 + $0x10] sm:$0xff]  ;;  %v4160_v26 = vld [vmem:[%s5300_s3 + $0x8] sm:$0xff]  ;;  %468 = vst [vmem:[%s4797_s16] sm:$0xff] %v3894_v12  ;;  %p1601_p5 = scmp.ne.s32.totalorder %s2724_s30, 0  ;;  %s2603_s17 = scalar_lea.sflag [#allocation10], %s4221_s25 }
  0x3c   : > { %3055 = vmatprep.subr.mxu0 %v3894_v12  ;;  %3089 = vmatpush3.msra.mxu1 %v4042_v13  ;;  %v4169_v27 = vld [vmem:[%s5300_s3] sm:$0xff]  ;;  %v2709_v53 = vld [vmem:[%s4224_s11 + $0x8] sm:$0xff]  ;;  %s1345_s22 = scalar_select %p1256_p4, 1, 0 }
  0x3d   : > { %3056 = vmatpush3.msra.mxu0 %v4052_v14  ;;  %3090 = vmatprep.subr.mxu1 %v3894_v12  ;;  %v493_v28 = vld [vmem:[%s4224_s11] sm:$0xff]  ;;  %p1935_p6 = scmp.ne.s32.totalorder %s2729_s12, 0  ;;  %s2734_s12 = sld [smem:[#allocation6 + $0x3]] }
  0x3e   : > { %3057 = vmatprep.subr.mxu0 %v3894_v12  ;;  %3091 = vmatpush3.msra.mxu1 %v4052_v14  ;;  %v4230_v29 = vld [vmem:[%s5301_s4] ss:$0 sm:$0xff] }
  0x3f   : > { %3058 = vmatpush3.msra.mxu0 %v4061_v15  ;;  %3092 = vmatprep.subr.mxu1 %v3894_v12  ;;  %s2025_s27 = scalar_select %p1935_p6, 1, 0 }
  0x40   : > { %3059 = vmatprep.subr.mxu0 %v3894_v12  ;;  %3093 = vmatpush3.msra.mxu1 %v4061_v15  ;;  %v571_v35 = vld [vmem:[#allocation3] sm:$0xff] }
  0x41   : > { %3060 = vmatpush3.msra.mxu0 %v4070_v16  ;;  %3094 = vmatprep.subr.mxu1 %v3894_v12 }
  0x42   : > { %3061 = vmatprep.subr.mxu0 %v3894_v12  ;;  %3095 = vmatpush3.msra.mxu1 %v4070_v16 }
  0x43   : > { %3062 = vmatpush3.msra.mxu0 %v4079_v17  ;;  %3096 = vmatprep.subr.mxu1 %v3894_v12  ;;  %p2269_p7 = scmp.ne.s32.totalorder %s2734_s12, 0 }
  0x44   : > { %3063 = vmatprep.subr.mxu0 %v3894_v12  ;;  %3097 = vmatpush3.msra.mxu1 %v4079_v17 }
  0x45   : > { %3064 = vmatpush3.msra.mxu0 %v4088_v18  ;;  %3098 = vmatprep.subr.mxu1 %v3894_v12 }
  0x46   : > { %3065 = vmatprep.subr.mxu0 %v3894_v12  ;;  %3099 = vmatpush3.msra.mxu1 %v4088_v18 }
  0x47   : > { %3066 = vmatpush3.msra.mxu0 %v4097_v19  ;;  %3100 = vmatprep.subr.mxu1 %v3894_v12 }
  0x48   : > { %3067 = vmatprep.subr.mxu0 %v3894_v12  ;;  %3101 = vmatpush3.msra.mxu1 %v4097_v19 }
  0x49   : > { %3068 = vmatpush3.msra.mxu0 %v4106_v20  ;;  %3102 = vmatprep.subr.mxu1 %v3894_v12 }
  0x4a   : > { %3069 = vmatprep.subr.mxu0 %v3894_v12  ;;  %3103 = vmatpush3.msra.mxu1 %v4106_v20 }
  0x4b   : > { %3070 = vmatpush3.msra.mxu0 %v4115_v21  ;;  %3104 = vmatprep.subr.mxu1 %v3894_v12 }
  0x4c   : > { %3071 = vmatprep.subr.mxu0 %v3894_v12  ;;  %3105 = vmatpush3.msra.mxu1 %v4115_v21 }
  0x4d   : > { %3072 = vmatpush3.msra.mxu0 %v4124_v22  ;;  %3106 = vmatprep.subr.mxu1 %v3894_v12 }
  0x4e   : > { %3073 = vmatprep.subr.mxu0 %v3894_v12  ;;  %3107 = vmatpush3.msra.mxu1 %v4124_v22 }
  0x4f   : > { %3074 = vmatpush3.msra.mxu0 %v4133_v23  ;;  %3108 = vmatprep.subr.mxu1 %v3894_v12 }
  0x50   : > { %3075 = vmatprep.subr.mxu0 %v3894_v12  ;;  %3109 = vmatpush3.msra.mxu1 %v4133_v23 }
  0x51   : > { %3076 = vmatpush3.msra.mxu0 %v4142_v24  ;;  %3110 = vmatprep.subr.mxu1 %v3894_v12 }
  0x52   : > { %3077 = vmatprep.subr.mxu0 %v3894_v12  ;;  %3111 = vmatpush3.msra.mxu1 %v4142_v24 }
  0x53   : > { %3078 = vmatpush3.msra.mxu0 %v4151_v25  ;;  %3112 = vmatprep.subr.mxu1 %v3894_v12 }
  0x54   : > { %3079 = vmatprep.subr.mxu0 %v3894_v12  ;;  %3113 = vmatpush3.msra.mxu1 %v4151_v25 }
  0x55   : > { %3080 = vmatpush3.msra.mxu0 %v4160_v26  ;;  %3114 = vmatprep.subr.mxu1 %v3894_v12 }
  0x56   : > { %3081 = vmatprep.subr.mxu0 %v3894_v12  ;;  %3115 = vmatpush3.msra.mxu1 %v4160_v26 }
  0x57   : > { %3082 = vmatpush3.msra.mxu0 %v4169_v27  ;;  %3116 = vmatprep.subr.mxu1 %v3894_v12 }
  0x58   : > { %3084 = vmatmul.mubr.f32.vlgmr.msra.gmra.mxu0 %v3894_v12  ;;  %3117 = vmatpush3.msra.mxu1 %v4169_v27 }
  0x59   : > { %3118 = vmatprep.mubr.msk.f32.mxu1 %vm3895_vm0, %v3894_v12  ;;  %3121 = vmatprep.subr.mxu0 %v3894_v12 }
  0x5a   : > { %3122 = vmatpush3.msra.mxu0 %v4035_v11  ;;  %3153 = vmatprep.mubr.msk.f32.mxu0 %vm3895_vm0, %v3894_v12 }
  0x5b   : > { %3123 = vmatprep.subr.mxu0 %v3894_v12  ;;  %3156 = vmatprep.subr.mxu1 %v3894_v12 }
  0x5c   : > { %3124 = vmatpush3.msra.mxu0 %v4042_v13 }
  0x5d   : > { %3125 = vmatprep.subr.mxu0 %v3894_v12 }
  0x5e   : > { %3126 = vmatpush3.msra.mxu0 %v4052_v14 }
  0x5f   : > { %3127 = vmatprep.subr.mxu0 %v3894_v12 }
  0x60   : > { %3128 = vmatpush3.msra.mxu0 %v4061_v15 }
  0x61   : > { %3129 = vmatprep.subr.mxu0 %v3894_v12 }
  0x62   : > { %3130 = vmatpush3.msra.mxu0 %v4070_v16 }
  0x63   : > { %3131 = vmatprep.subr.mxu0 %v3894_v12 }
  0x64   : > { %3132 = vmatpush3.msra.mxu0 %v4079_v17 }
  0x65   : > { %3133 = vmatprep.subr.mxu0 %v3894_v12 }
  0x66   : > { %3134 = vmatpush3.msra.mxu0 %v4088_v18 }
  0x67   : > { %3135 = vmatprep.subr.mxu0 %v3894_v12 }
  0x68   : > { %3136 = vmatpush3.msra.mxu0 %v4097_v19 }
  0x69   : > { %3137 = vmatprep.subr.mxu0 %v3894_v12 }
  0x6a   : > { %3138 = vmatpush3.msra.mxu0 %v4106_v20 }
  0x6b   : > { %3139 = vmatprep.subr.mxu0 %v3894_v12 }
  0x6c   : > { %3140 = vmatpush3.msra.mxu0 %v4115_v21 }
  0x6d   : > { %3141 = vmatprep.subr.mxu0 %v3894_v12 }
  0x6e   : > { %3142 = vmatpush3.msra.mxu0 %v4124_v22 }
  0x6f   : > { %3143 = vmatprep.subr.mxu0 %v3894_v12 }
  0x70   : > { %3144 = vmatpush3.msra.mxu0 %v4133_v23 }
  0x71   : > { %3145 = vmatprep.subr.mxu0 %v3894_v12 }
  0x72   : > { %3146 = vmatpush3.msra.mxu0 %v4142_v24 }
  0x73   : > { %3147 = vmatprep.subr.mxu0 %v3894_v12 }
  0x74   : > { %3148 = vmatpush3.msra.mxu0 %v4151_v25 }
  0x75   : > { %3149 = vmatprep.subr.mxu0 %v3894_v12 }
  0x76   : > { %3150 = vmatpush3.msra.mxu0 %v4160_v26 }
  0x77   : > { %3151 = vmatprep.subr.mxu0 %v3894_v12 }
  0x78   : > { %3152 = vmatpush3.msra.mxu0 %v4169_v27 }
  0x79   : > { %3191 = vmatprep.subr.mxu0 %v3894_v12 }
 0x118   : > { %v560_v30 = vpop.f32.mrf.mxu0 }
 0x119   : > { %v561_v31 = vadd.f32 %v560_v30, %v493_v28  ;;  %v2711_v30 = vld [vmem:[%s4224_s11 + $0x10] sm:$0xff] }
 0x11a   : > { %v3085_v32 = vpop.f32.mrf.mxu0 }
 0x11b   : > { %v570_v33 = vadd.f32 %v4230_v29, %v561_v31 }
 0x11d   : > { %3735 = vtanh.f32 %v570_v33  ;;  %v2708_v36 = vmul.f32 -1.442695, %v570_v33 }
 0x11f   : > { %3737 = vpow2.f32 %v2708_v36 }
 0x12a   : > { %v3736_v34 = vpop.eup %3735 }
 0x12b   : > { %585 = vrot.lane.b32.xlu0 %v3736_v34, %s3896_s13 }
 0x12c   : > { %v3738_v37 = vpop.eup %3737 }
 0x12d   : > { %v575_v38 = vadd.f32 1.0, %v3738_v37 }
 0x12f   : > { %580 = vrot.lane.b32.xlu0 %v571_v35, %s3896_s13  ;;  %3739 = vrcp.f32 %v575_v38 }
 0x13c   : > { %v3740_v39 = vpop.eup %3739 }
 0x19d   : > { %v586_v40 = vpop.permute.xlu0 %585 }
 0x19e   : > { %v588_v41 = vmul.f32 %v3740_v39, %v586_v40 }
 0x1a0   : > { %590 = vrot.lane.b32.xlu1 %v588_v41, %s3896_s13 }
 0x1a1   : > { %v581_v42 = vpop.permute.xlu0 %580 }
 0x1a2   : > { %v583_v43 = vmul.f32 %v3740_v39, %v581_v42 }
 0x212   : > { %v591_v44 = vpop.permute.xlu1 %590 }
 0x213   : > { %v593_v45 = vadd.f32 %v591_v44, %v583_v43 }
 0x215   : > { %3741 = vtanh.f32 %v593_v45 }
 0x222   : > { %v3742_v46 = vpop.eup %3741 }
 0x223   : > { %596 = vrot.lane.b32.xlu1 %v3742_v46, %s3896_s13 }
 0x227   : > { %601 = vrot.lane.b32.xlu1 %v593_v45, %s3897_s14 }
 0x295   : > { %v597_v47 = vpop.permute.xlu1 %596 }
 0x296   : > { %v599_v48 = vmul.f32 %v3740_v39, %v597_v47 }
 0x298   : > { %606 = vrot.lane.b32.xlu0 %v599_v48, %s5309_s15 }
 0x299   : > { %v602_v49 = vpop.permute.xlu1 %601 }
 0x29a   : > { %604 = vst.msk [vmem:[#allocation3] sm:$0xff] %vm465_vm1, %v602_v49 }
 0x2a1   : > { %v700_v50 = vld [vmem:[#allocation3] sm:$0xff] }
 0x2a2   : > { %709 = vrot.lane.b32.xlu1 %v700_v50, %s3896_s13 }
 0x30a   : > { %v607_v51 = vpop.permute.xlu0 %606 }
 0x30b   : > { %609 = vst.msk [vmem:[#allocation2] sm:$0xff] %vm465_vm1, %v607_v51 }
 0x312   : > { %v610_v52 = vld [vmem:[#allocation2] sm:$0xff] }
 0x313   : > { %3119 = vmatmul.mubr.f32.vlgmr.msra.gmra.mxu1 %v610_v52 }
 0x314   : > { %3157 = vmatpush3.msra.mxu1 %v4035_v11  ;;  %3188 = vmatprep.mubr.msk.f32.mxu1 %vm3895_vm0, %v3894_v12  ;;  %v710_v1 = vpop.permute.xlu1 %709 }
 0x315   : > { %3158 = vmatprep.subr.mxu1 %v3894_v12 }
 0x316   : > { %3159 = vmatpush3.msra.mxu1 %v4042_v13 }
 0x317   : > { %3160 = vmatprep.subr.mxu1 %v3894_v12 }
 0x318   : > { %3161 = vmatpush3.msra.mxu1 %v4052_v14 }
 0x319   : > { %3162 = vmatprep.subr.mxu1 %v3894_v12 }
 0x31a   : > { %3163 = vmatpush3.msra.mxu1 %v4061_v15 }
 0x31b   : > { %3164 = vmatprep.subr.mxu1 %v3894_v12 }
 0x31c   : > { %3165 = vmatpush3.msra.mxu1 %v4070_v16 }
 0x31d   : > { %3166 = vmatprep.subr.mxu1 %v3894_v12 }
 0x31e   : > { %3167 = vmatpush3.msra.mxu1 %v4079_v17 }
 0x31f   : > { %3168 = vmatprep.subr.mxu1 %v3894_v12 }
 0x320   : > { %3169 = vmatpush3.msra.mxu1 %v4088_v18 }
 0x321   : > { %3170 = vmatprep.subr.mxu1 %v3894_v12 }
 0x322   : > { %3171 = vmatpush3.msra.mxu1 %v4097_v19 }
 0x323   : > { %3172 = vmatprep.subr.mxu1 %v3894_v12 }
 0x324   : > { %3173 = vmatpush3.msra.mxu1 %v4106_v20 }
 0x325   : > { %3174 = vmatprep.subr.mxu1 %v3894_v12 }
 0x326   : > { %3175 = vmatpush3.msra.mxu1 %v4115_v21 }
 0x327   : > { %3176 = vmatprep.subr.mxu1 %v3894_v12 }
 0x328   : > { %3177 = vmatpush3.msra.mxu1 %v4124_v22 }
 0x329   : > { %3178 = vmatprep.subr.mxu1 %v3894_v12 }
 0x32a   : > { %3179 = vmatpush3.msra.mxu1 %v4133_v23 }
 0x32b   : > { %3180 = vmatprep.subr.mxu1 %v3894_v12 }
 0x32c   : > { %3181 = vmatpush3.msra.mxu1 %v4142_v24 }
 0x32d   : > { %3182 = vmatprep.subr.mxu1 %v3894_v12 }
 0x32e   : > { %3183 = vmatpush3.msra.mxu1 %v4151_v25 }
 0x32f   : > { %3184 = vmatprep.subr.mxu1 %v3894_v12 }
 0x330   : > { %3185 = vmatpush3.msra.mxu1 %v4160_v26 }
 0x331   : > { %3186 = vmatprep.subr.mxu1 %v3894_v12 }
 0x332   : > { %3187 = vmatpush3.msra.mxu1 %v4169_v27 }
 0x333   : > { %3226 = vmatprep.subr.mxu1 %v3894_v12 }
 0x3d3   : > { %v695_v54 = vpop.f32.mrf.mxu1 }
 0x3d4   : > { %v696_v55 = vadd.f32 %v2709_v53, %v695_v54 }
 0x3d5   : > { %v3120_v56 = vpop.f32.mrf.mxu1 }
 0x3d6   : > { %v699_v57 = vadd.f32 %v4230_v29, %v696_v55 }
 0x3d8   : > { %3743 = vtanh.f32 %v699_v57  ;;  %v2710_v59 = vmul.f32 -1.442695, %v699_v57 }
 0x3da   : > { %3745 = vpow2.f32 %v2710_v59 }
 0x3e5   : > { %v3744_v58 = vpop.eup %3743 }
 0x3e6   : > { %714 = vrot.lane.b32.xlu0 %v3744_v58, %s3896_s13 }
 0x3e7   : > { %v3746_v60 = vpop.eup %3745 }
 0x3e8   : > { %v704_v61 = vadd.f32 1.0, %v3746_v60  ;;  %v2715_v60 = vld [vmem:[%s4224_s11 + $0x20] sm:$0xff] }
 0x3ea   : > { %3747 = vrcp.f32 %v704_v61 }
 0x3f7   : > { %v3748_v62 = vpop.eup %3747 }
 0x3f8   : > { %v712_v2 = vmul.f32 %v3748_v62, %v710_v1 }
 0x458   : > { %v715_v63 = vpop.permute.xlu0 %714 }
 0x459   : > { %v717_v0 = vmul.f32 %v3748_v62, %v715_v63 }
 0x45b   : > { %719 = vrot.lane.b32.xlu0 %v717_v0, %s3896_s13 }
 0x4cd   : > { %v720_v3 = vpop.permute.xlu0 %719 }
 0x4ce   : > { %v722_v4 = vadd.f32 %v720_v3, %v712_v2 }
 0x4d0   : > { %3749 = vtanh.f32 %v722_v4 }
 0x4dd   : > { %v3750_v5 = vpop.eup %3749 }
 0x4de   : > { %725 = vrot.lane.b32.xlu1 %v3750_v5, %s3896_s13 }
 0x4e2   : > { %730 = vrot.lane.b32.xlu1 %v722_v4, %s3897_s14 }
 0x550   : > { %v726_v6 = vpop.permute.xlu1 %725 }
 0x551   : > { %v728_v7 = vmul.f32 %v3748_v62, %v726_v6 }
 0x553   : > { %735 = vrot.lane.b32.xlu0 %v728_v7, %s5309_s15 }
 0x554   : > { %v731_v8 = vpop.permute.xlu1 %730 }
 0x555   : > { %733 = vst.msk [vmem:[#allocation3] sm:$0xff] %vm465_vm1, %v731_v8 }
 0x55c   : > { %v829_v9 = vld [vmem:[#allocation3] sm:$0xff] }
 0x55d   : > { %838 = vrot.lane.b32.xlu1 %v829_v9, %s3896_s13 }
 0x5c5   : > { %v736_v10 = vpop.permute.xlu0 %735 }
 0x5c6   : > { %738 = vst.msk [vmem:[#allocation2] sm:$0xff] %vm465_vm1, %v736_v10 }
 0x5cd   : > { %v739_v28 = vld [vmem:[#allocation2] sm:$0xff] }
 0x5ce   : > { %3154 = vmatmul.mubr.f32.vlgmr.msra.gmra.mxu0 %v739_v28 }
 0x5cf   : > { %3192 = vmatpush3.msra.mxu0 %v4035_v11  ;;  %3223 = vmatprep.mubr.msk.f32.mxu0 %vm3895_vm0, %v3894_v12  ;;  %v839_v42 = vpop.permute.xlu1 %838 }
 0x5d0   : > { %3193 = vmatprep.subr.mxu0 %v3894_v12 }
 0x5d1   : > { %3194 = vmatpush3.msra.mxu0 %v4042_v13 }
 0x5d2   : > { %3195 = vmatprep.subr.mxu0 %v3894_v12 }
 0x5d3   : > { %3196 = vmatpush3.msra.mxu0 %v4052_v14 }
 0x5d4   : > { %3197 = vmatprep.subr.mxu0 %v3894_v12 }
 0x5d5   : > { %3198 = vmatpush3.msra.mxu0 %v4061_v15 }
 0x5d6   : > { %3199 = vmatprep.subr.mxu0 %v3894_v12 }
 0x5d7   : > { %3200 = vmatpush3.msra.mxu0 %v4070_v16 }
 0x5d8   : > { %3201 = vmatprep.subr.mxu0 %v3894_v12 }
 0x5d9   : > { %3202 = vmatpush3.msra.mxu0 %v4079_v17 }
 0x5da   : > { %3203 = vmatprep.subr.mxu0 %v3894_v12 }
 0x5db   : > { %3204 = vmatpush3.msra.mxu0 %v4088_v18 }
 0x5dc   : > { %3205 = vmatprep.subr.mxu0 %v3894_v12 }
 0x5dd   : > { %3206 = vmatpush3.msra.mxu0 %v4097_v19 }
 0x5de   : > { %3207 = vmatprep.subr.mxu0 %v3894_v12 }
 0x5df   : > { %3208 = vmatpush3.msra.mxu0 %v4106_v20 }
 0x5e0   : > { %3209 = vmatprep.subr.mxu0 %v3894_v12 }
 0x5e1   : > { %3210 = vmatpush3.msra.mxu0 %v4115_v21 }
 0x5e2   : > { %3211 = vmatprep.subr.mxu0 %v3894_v12 }
 0x5e3   : > { %3212 = vmatpush3.msra.mxu0 %v4124_v22 }
 0x5e4   : > { %3213 = vmatprep.subr.mxu0 %v3894_v12 }
 0x5e5   : > { %3214 = vmatpush3.msra.mxu0 %v4133_v23 }
 0x5e6   : > { %3215 = vmatprep.subr.mxu0 %v3894_v12 }
 0x5e7   : > { %3216 = vmatpush3.msra.mxu0 %v4142_v24 }
 0x5e8   : > { %3217 = vmatprep.subr.mxu0 %v3894_v12 }
 0x5e9   : > { %3218 = vmatpush3.msra.mxu0 %v4151_v25 }
 0x5ea   : > { %3219 = vmatprep.subr.mxu0 %v3894_v12 }
 0x5eb   : > { %3220 = vmatpush3.msra.mxu0 %v4160_v26 }
 0x5ec   : > { %3221 = vmatprep.subr.mxu0 %v3894_v12 }
 0x5ed   : > { %3222 = vmatpush3.msra.mxu0 %v4169_v27 }
 0x5ee   : > { %3261 = vmatprep.subr.mxu0 %v3894_v12 }
 0x68e   : > { %v824_v31 = vpop.f32.mrf.mxu0 }
 0x68f   : > { %v825_v32 = vadd.f32 %v2711_v30, %v824_v31 }
 0x690   : > { %v3155_v33 = vpop.f32.mrf.mxu0 }
 0x691   : > { %v828_v34 = vadd.f32 %v4230_v29, %v825_v32 }
 0x693   : > { %3751 = vtanh.f32 %v828_v34  ;;  %v2712_v36 = vmul.f32 -1.442695, %v828_v34 }
 0x695   : > { %3753 = vpow2.f32 %v2712_v36 }
 0x6a0   : > { %v3752_v35 = vpop.eup %3751 }
 0x6a1   : > { %843 = vrot.lane.b32.xlu0 %v3752_v35, %s3896_s13 }
 0x6a2   : > { %v3754_v37 = vpop.eup %3753 }
 0x6a3   : > { %v833_v38 = vadd.f32 1.0, %v3754_v37  ;;  %v2717_v37 = vld [vmem:[%s4224_s11 + $0x28] sm:$0xff] }
 0x6a5   : > { %3755 = vrcp.f32 %v833_v38 }
 0x6b2   : > { %v3756_v39 = vpop.eup %3755 }
 0x6b3   : > { %v841_v43 = vmul.f32 %v3756_v39, %v839_v42 }
 0x713   : > { %v844_v40 = vpop.permute.xlu0 %843 }
 0x714   : > { %v846_v41 = vmul.f32 %v3756_v39, %v844_v40 }
 0x716   : > { %848 = vrot.lane.b32.xlu0 %v846_v41, %s3896_s13 }
 0x788   : > { %v849_v44 = vpop.permute.xlu0 %848 }
 0x789   : > { %v851_v45 = vadd.f32 %v849_v44, %v841_v43 }
 0x78b   : > { %3757 = vtanh.f32 %v851_v45 }
 0x798   : > { %v3758_v46 = vpop.eup %3757 }
 0x799   : > { %854 = vrot.lane.b32.xlu1 %v3758_v46, %s3896_s13 }
 0x79d   : > { %859 = vrot.lane.b32.xlu1 %v851_v45, %s3897_s14 }
 0x80b   : > { %v855_v47 = vpop.permute.xlu1 %854 }
 0x80c   : > { %v857_v48 = vmul.f32 %v3756_v39, %v855_v47 }
 0x80e   : > { %864 = vrot.lane.b32.xlu0 %v857_v48, %s5309_s15 }
 0x80f   : > { %v860_v49 = vpop.permute.xlu1 %859 }
 0x810   : > { %862 = vst.msk [vmem:[#allocation3] sm:$0xff] %vm465_vm1, %v860_v49 }
 0x817   : > { %v958_v50 = vld [vmem:[#allocation3] sm:$0xff] }
 0x818   : > { %967 = vrot.lane.b32.xlu1 %v958_v50, %s3896_s13 }
 0x880   : > { %v865_v51 = vpop.permute.xlu0 %864 }
 0x881   : > { %867 = vst.msk [vmem:[#allocation2] sm:$0xff] %vm465_vm1, %v865_v51 }
 0x888   : > { %v868_v52 = vld [vmem:[#allocation2] sm:$0xff] }
 0x889   : > { %3189 = vmatmul.mubr.f32.vlgmr.msra.gmra.mxu1 %v868_v52 }
 0x88a   : > { %3227 = vmatpush3.msra.mxu1 %v4035_v11  ;;  %3258 = vmatprep.mubr.msk.f32.mxu1 %vm3895_vm0, %v3894_v12  ;;  %v2713_v11 = vld [vmem:[%s4224_s11 + $0x18] sm:$0xff]  ;;  %s1691_s11 = scalar_select %p1601_p5, 1, 0 }
 0x88b   : > { %3228 = vmatprep.subr.mxu1 %v3894_v12 }
 0x88c   : > { %3229 = vmatpush3.msra.mxu1 %v4042_v13 }
 0x88d   : > { %3230 = vmatprep.subr.mxu1 %v3894_v12 }
 0x88e   : > { %3231 = vmatpush3.msra.mxu1 %v4052_v14 }
 0x88f   : > { %3232 = vmatprep.subr.mxu1 %v3894_v12 }
 0x890   : > { %3233 = vmatpush3.msra.mxu1 %v4061_v15 }
 0x891   : > { %3234 = vmatprep.subr.mxu1 %v3894_v12 }
 0x892   : > { %3235 = vmatpush3.msra.mxu1 %v4070_v16 }
 0x893   : > { %3236 = vmatprep.subr.mxu1 %v3894_v12 }
 0x894   : > { %3237 = vmatpush3.msra.mxu1 %v4079_v17 }
 0x895   : > { %3238 = vmatprep.subr.mxu1 %v3894_v12 }
 0x896   : > { %3239 = vmatpush3.msra.mxu1 %v4088_v18 }
 0x897   : > { %3240 = vmatprep.subr.mxu1 %v3894_v12 }
 0x898   : > { %3241 = vmatpush3.msra.mxu1 %v4097_v19 }
 0x899   : > { %3242 = vmatprep.subr.mxu1 %v3894_v12 }
 0x89a   : > { %3243 = vmatpush3.msra.mxu1 %v4106_v20 }
 0x89b   : > { %3244 = vmatprep.subr.mxu1 %v3894_v12 }
 0x89c   : > { %3245 = vmatpush3.msra.mxu1 %v4115_v21 }
 0x89d   : > { %3246 = vmatprep.subr.mxu1 %v3894_v12 }
 0x89e   : > { %3247 = vmatpush3.msra.mxu1 %v4124_v22 }
 0x89f   : > { %3248 = vmatprep.subr.mxu1 %v3894_v12 }
 0x8a0   : > { %3249 = vmatpush3.msra.mxu1 %v4133_v23 }
 0x8a1   : > { %3250 = vmatprep.subr.mxu1 %v3894_v12 }
 0x8a2   : > { %3251 = vmatpush3.msra.mxu1 %v4142_v24  ;;  %v968_v24 = vpop.permute.xlu1 %967 }
 0x8a3   : > { %3252 = vmatprep.subr.mxu1 %v3894_v12 }
 0x8a4   : > { %3253 = vmatpush3.msra.mxu1 %v4151_v25 }
 0x8a5   : > { %3254 = vmatprep.subr.mxu1 %v3894_v12 }
 0x8a6   : > { %3255 = vmatpush3.msra.mxu1 %v4160_v26 }
 0x8a7   : > { %3256 = vmatprep.subr.mxu1 %v3894_v12 }
 0x8a8   : > { %3257 = vmatpush3.msra.mxu1 %v4169_v27 }
 0x8a9   : > { %3296 = vmatprep.subr.mxu1 %v3894_v12 }
 0x949   : > { %v953_v13 = vpop.f32.mrf.mxu1 }
 0x94a   : > { %v954_v14 = vadd.f32 %v2713_v11, %v953_v13  ;;  %v4399_v11 = vld [vmem:[%s5304_s7 + $0x78] sm:$0xff]  ;;  %v4404_v13 = vld [vmem:[%s5304_s7 + $0x70] sm:$0xff] }
 0x94b   : > { %v3190_v15 = vpop.f32.mrf.mxu1 }
 0x94c   : > { %v957_v16 = vadd.f32 %v4230_v29, %v954_v14  ;;  %v4409_v14 = vld [vmem:[%s5302_s5 + $0x78] sm:$0xff]  ;;  %v4416_v15 = vld [vmem:[%s5302_s5 + $0x70] sm:$0xff] }
 0x94e   : > { %3759 = vtanh.f32 %v957_v16  ;;  %v2714_v18 = vmul.f32 -1.442695, %v957_v16  ;;  %v4423_v16 = vld [vmem:[%s5304_s7 + $0x68] sm:$0xff] }
 0x950   : > { %3761 = vpow2.f32 %v2714_v18  ;;  %v4437_v18 = vld [vmem:[%s5302_s5 + $0x68] sm:$0xff] }
 0x95b   : > { %v3760_v17 = vpop.eup %3759 }
 0x95c   : > { %972 = vrot.lane.b32.xlu0 %v3760_v17, %s3896_s13  ;;  %v4432_v17 = vld [vmem:[%s5304_s7 + $0x60] sm:$0xff] }
 0x95d   : > { %v3762_v19 = vpop.eup %3761 }
 0x95e   : > { %v962_v20 = vadd.f32 1.0, %v3762_v19  ;;  %v4446_v19 = vld [vmem:[%s5304_s7 + $0x58] sm:$0xff] }
 0x960   : > { %3763 = vrcp.f32 %v962_v20  ;;  %v4451_v20 = vld [vmem:[%s5302_s5 + $0x60] sm:$0xff] }
 0x96d   : > { %v3764_v21 = vpop.eup %3763 }
 0x96e   : > { %v970_v25 = vmul.f32 %v3764_v21, %v968_v24  ;;  %v4479_v24 = vld [vmem:[%s5302_s5 + $0x50] sm:$0xff] }
 0x9ce   : > { %v973_v22 = vpop.permute.xlu0 %972 }
 0x9cf   : > { %v975_v23 = vmul.f32 %v3764_v21, %v973_v22  ;;  %v4465_v22 = vld [vmem:[%s5302_s5 + $0x58] sm:$0xff] }
 0x9d1   : > { %977 = vrot.lane.b32.xlu0 %v975_v23, %s3896_s13  ;;  %v4474_v23 = vld [vmem:[%s5304_s7 + $0x48] sm:$0xff] }
 0xa43   : > { %v978_v26 = vpop.permute.xlu0 %977 }
 0xa44   : > { %v980_v27 = vadd.f32 %v978_v26, %v970_v25  ;;  %v4488_v25 = vld [vmem:[%s5304_s7 + $0x40] sm:$0xff]  ;;  %v4493_v26 = vld [vmem:[%s5302_s5 + $0x48] sm:$0xff] }
 0xa46   : > { %3765 = vtanh.f32 %v980_v27 }
 0xa53   : > { %v3766_v53 = vpop.eup %3765 }
 0xa54   : > { %983 = vrot.lane.b32.xlu1 %v3766_v53, %s3896_s13  ;;  %v4507_v53 = vld [vmem:[%s5302_s5 + $0x40] sm:$0xff] }
 0xa58   : > { %988 = vrot.lane.b32.xlu1 %v980_v27, %s3897_s14  ;;  %v4502_v27 = vld [vmem:[%s5304_s7 + $0x38] sm:$0xff] }
 0xac6   : > { %v984_v54 = vpop.permute.xlu1 %983 }
 0xac7   : > { %v986_v55 = vmul.f32 %v3764_v21, %v984_v54  ;;  %v4460_v21 = vld [vmem:[%s5304_s7 + $0x50] sm:$0xff] }
 0xac8   : > { %v4516_v54 = vld [vmem:[%s5304_s7 + $0x30] sm:$0xff] }
 0xac9   : > { %993 = vrot.lane.b32.xlu0 %v986_v55, %s5309_s15  ;;  %v4521_v55 = vld [vmem:[%s5302_s5 + $0x38] sm:$0xff] }
 0xaca   : > { %v989_v56 = vpop.permute.xlu1 %988 }
 0xacb   : > { %991 = vst.msk [vmem:[#allocation3] sm:$0xff] %vm465_vm1, %v989_v56  ;;  %v4530_v56 = vld [vmem:[%s5304_s7 + $0x28] sm:$0xff] }
 0xad2   : > { %v1087_v57 = vld [vmem:[#allocation3] sm:$0xff] }
 0xad3   : > { %1096 = vrot.lane.b32.xlu1 %v1087_v57, %s3896_s13  ;;  %v4535_v57 = vld [vmem:[%s5302_s5 + $0x30] sm:$0xff] }
 0xb3b   : > { %v994_v58 = vpop.permute.xlu0 %993 }
 0xb3c   : > { %996 = vst.msk [vmem:[#allocation2] sm:$0xff] %vm465_vm1, %v994_v58  ;;  %v4544_v58 = vld [vmem:[%s5304_s7 + $0x20] sm:$0xff] }
 0xb43   : > { %v997_v59 = vld [vmem:[#allocation2] sm:$0xff] }
 0xb44   : > { %3224 = vmatmul.mubr.f32.vlgmr.msra.gmra.mxu0 %v997_v59  ;;  %v4549_v59 = vld [vmem:[%s5302_s5 + $0x28] sm:$0xff] }
 0xb45   : > { %3293 = vmatprep.mubr.msk.f32.mxu0 %vm3895_vm0, %v3894_v12  ;;  %v1097_v8 = vpop.permute.xlu1 %1096  ;;  %3262 = vmatpush3.msra.mxu0 %v4399_v11 }
 0xb46   : > { %3263 = vmatprep.subr.mxu0 %v3894_v12 }
 0xb47   : > { %3264 = vmatpush3.msra.mxu0 %v4404_v13 }
 0xb48   : > { %3265 = vmatprep.subr.mxu0 %v3894_v12 }
 0xb49   : > { %3266 = vmatpush3.msra.mxu0 %v4423_v16 }
 0xb4a   : > { %3267 = vmatprep.subr.mxu0 %v3894_v12 }
 0xb4b   : > { %3268 = vmatpush3.msra.mxu0 %v4432_v17 }
 0xb4c   : > { %3269 = vmatprep.subr.mxu0 %v3894_v12 }
 0xb4d   : > { %3270 = vmatpush3.msra.mxu0 %v4446_v19 }
 0xb4e   : > { %3271 = vmatprep.subr.mxu0 %v3894_v12 }
 0xb4f   : > { %3272 = vmatpush3.msra.mxu0 %v4460_v21 }
 0xb50   : > { %3273 = vmatprep.subr.mxu0 %v3894_v12 }
 0xb51   : > { %3274 = vmatpush3.msra.mxu0 %v4474_v23 }
 0xb52   : > { %3275 = vmatprep.subr.mxu0 %v3894_v12 }
 0xb53   : > { %3276 = vmatpush3.msra.mxu0 %v4488_v25 }
 0xb54   : > { %3277 = vmatprep.subr.mxu0 %v3894_v12 }
 0xb55   : > { %3278 = vmatpush3.msra.mxu0 %v4502_v27 }
 0xb56   : > { %3279 = vmatprep.subr.mxu0 %v3894_v12 }
 0xb57   : > { %3280 = vmatpush3.msra.mxu0 %v4516_v54 }
 0xb58   : > { %3281 = vmatprep.subr.mxu0 %v3894_v12 }
 0xb59   : > { %3282 = vmatpush3.msra.mxu0 %v4530_v56 }
 0xb5a   : > { %3283 = vmatprep.subr.mxu0 %v3894_v12 }
 0xb5b   : > { %3284 = vmatpush3.msra.mxu0 %v4544_v58 }
 0xb5c   : > { %3285 = vmatprep.subr.mxu0 %v3894_v12 }
 0xc04   : > { %v1082_v61 = vpop.f32.mrf.mxu0 }
 0xc05   : > { %v1083_v62 = vadd.f32 %v2715_v60, %v1082_v61  ;;  %v4558_v60 = vld [vmem:[%s5304_s7 + $0x18] sm:$0xff]  ;;  %v4563_v61 = vld [vmem:[%s5302_s5 + $0x20] sm:$0xff] }
 0xc06   : > { %v3225_v63 = vpop.f32.mrf.mxu0  ;;  %3286 = vmatpush3.msra.mxu0 %v4558_v60 }
 0xc07   : > { %v1086_v0 = vadd.f32 %v4230_v29, %v1083_v62  ;;  %3287 = vmatprep.subr.mxu0 %v3894_v12  ;;  %v4576_v62 = vld [vmem:[%s5304_s7 + $0x10] sm:$0xff]  ;;  %v4582_v63 = vld [vmem:[%s5302_s5 + $0x18] sm:$0xff] }
 0xc08   : > { %3288 = vmatpush3.msra.mxu0 %v4576_v62 }
 0xc09   : > { %3767 = vtanh.f32 %v1086_v0  ;;  %v2716_v2 = vmul.f32 -1.442695, %v1086_v0  ;;  %v4587_v0 = vld [vmem:[%s5304_s7 + $0x8] sm:$0xff]  ;;  %3289 = vmatprep.subr.mxu0 %v3894_v12 }
 0xc0a   : > { %3290 = vmatpush3.msra.mxu0 %v4587_v0 }
 0xc0b   : > { %3769 = vpow2.f32 %v2716_v2  ;;  %v4599_v2 = vld [vmem:[%s5304_s7] sm:$0xff]  ;;  %3291 = vmatprep.subr.mxu0 %v3894_v12 }
 0xc0c   : > { %3292 = vmatpush3.msra.mxu0 %v4599_v2 }
 0xc0d   : > { %3294 = vmatmul.mubr.f32.vlgmr.msra.gmra.mxu0 %v3894_v12  ;;  %3331 = vmatprep.subr.mxu0 %v3894_v12 }
 0xc0e   : > { %3363 = vmatprep.mubr.msk.f32.mxu0 %vm3895_vm0, %v3894_v12 }
 0xc16   : > { %v3768_v1 = vpop.eup %3767 }
 0xc17   : > { %1101 = vrot.lane.b32.xlu0 %v3768_v1, %s3896_s13  ;;  %v4592_v1 = vld [vmem:[%s5302_s5 + $0x10] sm:$0xff] }
 0xc18   : > { %v3770_v3 = vpop.eup %3769 }
 0xc19   : > { %v1091_v4 = vadd.f32 1.0, %v3770_v3  ;;  %v4606_v3 = vld [vmem:[%s5302_s5 + $0x8] sm:$0xff] }
 0xc1b   : > { %3771 = vrcp.f32 %v1091_v4  ;;  %v4615_v4 = vld [vmem:[%s5302_s5] sm:$0xff] }
 0xc28   : > { %v3772_v5 = vpop.eup %3771 }
 0xc29   : > { %v1099_v9 = vmul.f32 %v3772_v5, %v1097_v8 }
 0xc89   : > { %v1102_v6 = vpop.permute.xlu0 %1101 }
 0xc8a   : > { %v1104_v7 = vmul.f32 %v3772_v5, %v1102_v6 }
 0xc8c   : > { %1106 = vrot.lane.b32.xlu0 %v1104_v7, %s3896_s13 }
 0xcfe   : > { %v1107_v10 = vpop.permute.xlu0 %1106 }
 0xcff   : > { %v1109_v28 = vadd.f32 %v1107_v10, %v1099_v9 }
 0xd01   : > { %3773 = vtanh.f32 %v1109_v28 }
 0xd0e   : > { %v3774_v30 = vpop.eup %3773 }
 0xd0f   : > { %1112 = vrot.lane.b32.xlu1 %v3774_v30, %s3896_s13 }
 0xd13   : > { %1117 = vrot.lane.b32.xlu1 %v1109_v28, %s3897_s14  ;;  %v1340_v28 = vpop.f32.mrf.mxu0 }
 0xd15   : > { %v3295_v30 = vpop.f32.mrf.mxu0 }
 0xd16   : > { %v4753_v30 = vld [vmem:[%s5305_s8 + $0x28] sm:$0xff] }
 0xd81   : > { %v1113_v31 = vpop.permute.xlu1 %1112 }
 0xd82   : > { %v1115_v32 = vmul.f32 %v3772_v5, %v1113_v31  ;;  %v1346_v31 = vstv %s1345_s22 }
 0xd83   : > { %vm1347_vm2 = vcmp.eq.s32.totalorder %v1346_v31, 1  ;;  %v4760_v31 = vld [vmem:[%s5305_s8 + $0x20] sm:$0xff] }
 0xd84   : > { %1122 = vrot.lane.b32.xlu0 %v1115_v32, %s5309_s15  ;;  %v1344_v32 = vld [vmem:[%s4667_s24] sm:$0xff] }
 0xd85   : > { %v1118_v33 = vpop.permute.xlu1 %1117 }
 0xd86   : > { %1120 = vst.msk [vmem:[#allocation3] sm:$0xff] %vm465_vm1, %v1118_v33  ;;  %v1348_v33 = vsel %vm1347_vm2, %v1344_v32, %v1340_v28  ;;  %v4746_v28 = vld [vmem:[%s5305_s8 + $0x30] sm:$0xff]  ;;  %v4769_v32 = vld [vmem:[%s5305_s8 + $0x18] sm:$0xff] }
 0xd8d   : > { %v1216_v34 = vld [vmem:[#allocation3] sm:$0xff] }
 0xd8e   : > { %1225 = vrot.lane.b32.xlu1 %v1216_v34, %s3896_s13  ;;  %v4673_v34 = vld [vmem:[%s5303_s6] ss:$0 sm:$0xff] }
 0xdf6   : > { %v1123_v35 = vpop.permute.xlu0 %1122 }
 0xdf7   : > { %1125 = vst.msk [vmem:[#allocation2] sm:$0xff] %vm465_vm1, %v1123_v35 }
 0xdfe   : > { %v1126_v36 = vld [vmem:[#allocation2] sm:$0xff] }
 0xdff   : > { %3259 = vmatmul.mubr.f32.vlgmr.msra.gmra.mxu1 %v1126_v36 }
 0xe00   : > { %3328 = vmatprep.mubr.msk.f32.mxu1 %vm3895_vm0, %v3894_v12  ;;  %v1226_v49 = vpop.permute.xlu1 %1225  ;;  %3297 = vmatpush3.msra.mxu1 %v4409_v14 }
 0xe01   : > { %3298 = vmatprep.subr.mxu1 %v3894_v12 }
 0xe02   : > { %3299 = vmatpush3.msra.mxu1 %v4416_v15 }
 0xe03   : > { %3300 = vmatprep.subr.mxu1 %v3894_v12 }
 0xe04   : > { %3301 = vmatpush3.msra.mxu1 %v4437_v18 }
 0xe05   : > { %3302 = vmatprep.subr.mxu1 %v3894_v12 }
 0xe06   : > { %3303 = vmatpush3.msra.mxu1 %v4451_v20 }
 0xe07   : > { %3304 = vmatprep.subr.mxu1 %v3894_v12 }
 0xe08   : > { %3305 = vmatpush3.msra.mxu1 %v4465_v22 }
 0xe09   : > { %3306 = vmatprep.subr.mxu1 %v3894_v12 }
 0xe0a   : > { %3307 = vmatpush3.msra.mxu1 %v4479_v24 }
 0xe0b   : > { %3308 = vmatprep.subr.mxu1 %v3894_v12 }
 0xe0c   : > { %3309 = vmatpush3.msra.mxu1 %v4493_v26 }
 0xe0d   : > { %3310 = vmatprep.subr.mxu1 %v3894_v12 }
 0xe0e   : > { %3311 = vmatpush3.msra.mxu1 %v4507_v53 }
 0xe0f   : > { %3312 = vmatprep.subr.mxu1 %v3894_v12 }
 0xe10   : > { %3313 = vmatpush3.msra.mxu1 %v4521_v55 }
 0xe11   : > { %3314 = vmatprep.subr.mxu1 %v3894_v12 }
 0xe12   : > { %3315 = vmatpush3.msra.mxu1 %v4535_v57 }
 0xe13   : > { %3316 = vmatprep.subr.mxu1 %v3894_v12 }
 0xe14   : > { %3317 = vmatpush3.msra.mxu1 %v4549_v59 }
 0xe15   : > { %3318 = vmatprep.subr.mxu1 %v3894_v12 }
 0xe16   : > { %3319 = vmatpush3.msra.mxu1 %v4563_v61 }
 0xe17   : > { %3320 = vmatprep.subr.mxu1 %v3894_v12 }
 0xe18   : > { %3321 = vmatpush3.msra.mxu1 %v4582_v63 }
 0xe19   : > { %3322 = vmatprep.subr.mxu1 %v3894_v12 }
 0xe1a   : > { %3323 = vmatpush3.msra.mxu1 %v4592_v1 }
 0xe1b   : > { %3324 = vmatprep.subr.mxu1 %v3894_v12 }
 0xe1c   : > { %3325 = vmatpush3.msra.mxu1 %v4606_v3 }
 0xe1d   : > { %3326 = vmatprep.subr.mxu1 %v3894_v12 }
 0xe1e   : > { %3327 = vmatpush3.msra.mxu1 %v4615_v4 }
 0xe1f   : > { %3366 = vmatprep.subr.mxu1 %v3894_v12 }
 0xebf   : > { %v1211_v38 = vpop.f32.mrf.mxu1 }
 0xec0   : > { %v1212_v39 = vadd.f32 %v2717_v37, %v1211_v38 }
 0xec1   : > { %v3260_v40 = vpop.f32.mrf.mxu1 }
 0xec2   : > { %v1215_v41 = vadd.f32 %v4230_v29, %v1212_v39 }
 0xec4   : > { %3775 = vtanh.f32 %v1215_v41  ;;  %v2718_v43 = vmul.f32 -1.442695, %v1215_v41 }
 0xec6   : > { %3777 = vpow2.f32 %v2718_v43 }
 0xed1   : > { %v3776_v42 = vpop.eup %3775 }
 0xed2   : > { %1230 = vrot.lane.b32.xlu0 %v3776_v42, %s3896_s13 }
 0xed3   : > { %v3778_v44 = vpop.eup %3777 }
 0xed4   : > { %v1220_v45 = vadd.f32 1.0, %v3778_v44 }
 0xed6   : > { %3779 = vrcp.f32 %v1220_v45 }
 0xee3   : > { %v4391_v46 = vpop.eup %3779 }
 0xee4   : > { %v1228_v50 = vmul.f32 %v4391_v46, %v1226_v49 }
 0xf44   : > { %v1231_v47 = vpop.permute.xlu0 %1230 }
 0xf45   : > { %v1233_v48 = vmul.f32 %v4391_v46, %v1231_v47 }
 0xf47   : > { %1235 = vrot.lane.b32.xlu0 %v1233_v48, %s3896_s13 }
 0xfb9   : > { %v1236_v29 = vpop.permute.xlu0 %1235 }
 0xfba   : > { %v1238_v51 = vadd.f32 %v1236_v29, %v1228_v50  ;;  %v4684_v50 = vld [vmem:[%s5305_s8 + $0x78] sm:$0xff]  ;;  %v4689_v29 = vld [vmem:[%s5305_s8 + $0x70] sm:$0xff] }
 0xfbb   : > { %3332 = vmatpush3.msra.mxu0 %v4684_v50 }
 0xfbc   : > { %3781 = vtanh.f32 %v1238_v51  ;;  %3333 = vmatprep.subr.mxu0 %v3894_v12 }
 0xfbd   : > { %3334 = vmatpush3.msra.mxu0 %v4689_v29 }
 0xfbe   : > { %3335 = vmatprep.subr.mxu0 %v3894_v12 }
 0xfc9   : > { %v3782_v52 = vpop.eup %3781 }
 0xfca   : > { %1241 = vrot.lane.b32.xlu1 %v3782_v52, %s3896_s13  ;;  %v4703_v52 = vld [vmem:[%s5305_s8 + $0x60] sm:$0xff] }
 0xfce   : > { %1246 = vrot.lane.b32.xlu1 %v1238_v51, %s3897_s14  ;;  %v4696_v51 = vld [vmem:[%s5305_s8 + $0x68] sm:$0xff] }
 0xfcf   : > { %3336 = vmatpush3.msra.mxu0 %v4696_v51 }
 0xfd0   : > { %3337 = vmatprep.subr.mxu0 %v3894_v12 }
 0xfd1   : > { %3338 = vmatpush3.msra.mxu0 %v4703_v52 }
 0xfd2   : > { %3339 = vmatprep.subr.mxu0 %v3894_v12 }
0x103c   : > { %v1242_v5 = vpop.permute.xlu1 %1241 }
0x103d   : > { %v1244_v6 = vmul.f32 %v4391_v46, %v1242_v5  ;;  %v4710_v5 = vld [vmem:[%s5305_s8 + $0x58] sm:$0xff] }
0x103e   : > { %3340 = vmatpush3.msra.mxu0 %v4710_v5 }
0x103f   : > { %1251 = vrot.lane.b32.xlu0 %v1244_v6, %s5309_s15  ;;  %v4717_v6 = vld [vmem:[%s5305_s8 + $0x50] sm:$0xff]  ;;  %3341 = vmatprep.subr.mxu0 %v3894_v12 }
0x1040   : > { %v1247_v7 = vpop.permute.xlu1 %1246  ;;  %3342 = vmatpush3.msra.mxu0 %v4717_v6 }
0x1041   : > { %1249 = vst.msk [vmem:[#allocation3] sm:$0xff] %vm465_vm1, %v1247_v7  ;;  %3343 = vmatprep.subr.mxu0 %v3894_v12 }
0x1048   : > { %v1443_v8 = vld [vmem:[#allocation3] sm:$0xff] }
0x1049   : > { %1452 = vrot.lane.b32.xlu1 %v1443_v8, %s3896_s13  ;;  %v4724_v8 = vld [vmem:[%s5305_s8 + $0x48] sm:$0xff] }
0x104a   : > { %3344 = vmatpush3.msra.mxu0 %v4724_v8 }
0x104b   : > { %3345 = vmatprep.subr.mxu0 %v3894_v12 }
0x10b1   : > { %v1252_v9 = vpop.permute.xlu0 %1251 }
0x10b2   : > { %1254 = vst.msk [vmem:[#allocation2] sm:$0xff] %vm465_vm1, %v1252_v9  ;;  %v4732_v9 = vld [vmem:[%s5305_s8 + $0x40] sm:$0xff] }
0x10b3   : > { %3346 = vmatpush3.msra.mxu0 %v4732_v9 }
0x10b4   : > { %3347 = vmatprep.subr.mxu0 %v3894_v12 }
0x10b9   : > { %v1349_v10 = vld [vmem:[#allocation2] sm:$0xff] }
0x10ba   : > { %3329 = vmatmul.mubr.f32.vlgmr.msra.gmra.mxu1 %v1349_v10  ;;  %v4739_v10 = vld [vmem:[%s5305_s8 + $0x38] sm:$0xff] }
0x10bb   : > { %3367 = vmatpush3.msra.mxu1 %v4399_v11  ;;  %3398 = vmatprep.mubr.msk.f32.mxu1 %vm3895_vm0, %v3894_v12  ;;  %v1453_v46 = vpop.permute.xlu1 %1452 }
0x10bc   : > { %3368 = vmatprep.subr.mxu1 %v3894_v12  ;;  %3348 = vmatpush3.msra.mxu0 %v4739_v10 }
0x10bd   : > { %3369 = vmatpush3.msra.mxu1 %v4404_v13  ;;  %3349 = vmatprep.subr.mxu0 %v3894_v12 }
0x10be   : > { %3370 = vmatprep.subr.mxu1 %v3894_v12  ;;  %3350 = vmatpush3.msra.mxu0 %v4746_v28 }
0x10bf   : > { %3371 = vmatpush3.msra.mxu1 %v4423_v16  ;;  %3351 = vmatprep.subr.mxu0 %v3894_v12 }
0x10c0   : > { %3372 = vmatprep.subr.mxu1 %v3894_v12  ;;  %3352 = vmatpush3.msra.mxu0 %v4753_v30 }
0x10c1   : > { %3373 = vmatpush3.msra.mxu1 %v4432_v17  ;;  %3353 = vmatprep.subr.mxu0 %v3894_v12 }
0x10c2   : > { %3374 = vmatprep.subr.mxu1 %v3894_v12  ;;  %3354 = vmatpush3.msra.mxu0 %v4760_v31 }
0x10c3   : > { %3375 = vmatpush3.msra.mxu1 %v4446_v19  ;;  %3355 = vmatprep.subr.mxu0 %v3894_v12 }
0x10c4   : > { %3376 = vmatprep.subr.mxu1 %v3894_v12  ;;  %3356 = vmatpush3.msra.mxu0 %v4769_v32 }
0x10c5   : > { %3377 = vmatpush3.msra.mxu1 %v4460_v21  ;;  %3357 = vmatprep.subr.mxu0 %v3894_v12 }
0x10c6   : > { %3378 = vmatprep.subr.mxu1 %v3894_v12 }
0x10c7   : > { %3379 = vmatpush3.msra.mxu1 %v4474_v23 }
0x10c8   : > { %3380 = vmatprep.subr.mxu1 %v3894_v12 }
0x10c9   : > { %3381 = vmatpush3.msra.mxu1 %v4488_v25 }
0x10ca   : > { %3382 = vmatprep.subr.mxu1 %v3894_v12 }
0x10cb   : > { %3383 = vmatpush3.msra.mxu1 %v4502_v27 }
0x10cc   : > { %3384 = vmatprep.subr.mxu1 %v3894_v12 }
0x10cd   : > { %3385 = vmatpush3.msra.mxu1 %v4516_v54 }
0x10ce   : > { %3386 = vmatprep.subr.mxu1 %v3894_v12 }
0x10cf   : > { %3387 = vmatpush3.msra.mxu1 %v4530_v56 }
0x10d0   : > { %3388 = vmatprep.subr.mxu1 %v3894_v12 }
0x10d1   : > { %3389 = vmatpush3.msra.mxu1 %v4544_v58 }
0x10d2   : > { %3390 = vmatprep.subr.mxu1 %v3894_v12 }
0x10d3   : > { %3391 = vmatpush3.msra.mxu1 %v4558_v60 }
0x10d4   : > { %3392 = vmatprep.subr.mxu1 %v3894_v12 }
0x10d5   : > { %3393 = vmatpush3.msra.mxu1 %v4576_v62 }
0x10d6   : > { %3394 = vmatprep.subr.mxu1 %v3894_v12 }
0x10d7   : > { %3395 = vmatpush3.msra.mxu1 %v4587_v0 }
0x10d8   : > { %3396 = vmatprep.subr.mxu1 %v3894_v12 }
0x10d9   : > { %3397 = vmatpush3.msra.mxu1 %v4599_v2 }
0x10da   : > { %3436 = vmatprep.subr.mxu1 %v3894_v12 }
0x117a   : > { %v1432_v35 = vpop.f32.mrf.mxu1 }
0x117b   : > { %v1433_v36 = vadd.f32 %v1432_v35, %v1348_v33  ;;  %v4775_v33 = vld [vmem:[%s5305_s8 + $0x10] sm:$0xff]  ;;  %v4781_v35 = vld [vmem:[%s5305_s8 + $0x8] sm:$0xff] }
0x117c   : > { %v3330_v37 = vpop.f32.mrf.mxu1  ;;  %3358 = vmatpush3.msra.mxu0 %v4775_v33 }
0x117d   : > { %v1442_v38 = vadd.f32 %v4673_v34, %v1433_v36  ;;  %3359 = vmatprep.subr.mxu0 %v3894_v12  ;;  %v4788_v36 = vld [vmem:[%s5305_s8] sm:$0xff] }
0x117e   : > { %3360 = vmatpush3.msra.mxu0 %v4781_v35 }
0x117f   : > { %3783 = vtanh.f32 %v1442_v38  ;;  %v2720_v40 = vmul.f32 -1.442695, %v1442_v38  ;;  %3361 = vmatprep.subr.mxu0 %v3894_v12 }
0x1180   : > { %3362 = vmatpush3.msra.mxu0 %v4788_v36 }
0x1181   : > { %3785 = vpow2.f32 %v2720_v40  ;;  %3401 = vmatprep.subr.mxu0 %v3894_v12 }
0x118c   : > { %v3784_v39 = vpop.eup %3783 }
0x118d   : > { %1457 = vrot.lane.b32.xlu0 %v3784_v39, %s3896_s13 }
0x118e   : > { %v3786_v41 = vpop.eup %3785 }
0x118f   : > { %v1447_v42 = vadd.f32 1.0, %v3786_v41 }
0x1191   : > { %3787 = vrcp.f32 %v1447_v42 }
0x119e   : > { %v3788_v43 = vpop.eup %3787 }
0x119f   : > { %v1455_v47 = vmul.f32 %v3788_v43, %v1453_v46 }
0x11ff   : > { %v1458_v44 = vpop.permute.xlu0 %1457 }
0x1200   : > { %v1460_v45 = vmul.f32 %v3788_v43, %v1458_v44 }
0x1202   : > { %1462 = vrot.lane.b32.xlu0 %v1460_v45, %s3896_s13 }
0x1274   : > { %v1463_v48 = vpop.permute.xlu0 %1462 }
0x1275   : > { %v4678_v49 = vadd.f32 %v1463_v48, %v1455_v47 }
0x1277   : > { %3789 = vtanh.f32 %v4678_v49 }
0x1284   : > { %v3790_v7 = vpop.eup %3789 }
0x1285   : > { %1468 = vrot.lane.b32.xlu1 %v3790_v7, %s3896_s13 }
0x12f7   : > { %v1469_v37 = vpop.permute.xlu1 %1468 }
0x12f8   : > { %v1471_v38 = vmul.f32 %v3788_v43, %v1469_v37  ;;  %v3900_v37 = vmov 1.0  }
0x12fa   : > { %1478 = vrot.lane.b32.xlu0 %v1471_v38, %s5309_s15  ;;  %v1692_v38 = vstv %s1691_s11  ;;  %s5314_s11 = sadd.s32 4294967295, %s3891_s20  }
0x12fb   : > { %vm1693_vm7 = vcmp.eq.s32.totalorder %v1692_v38, 1  ;;  %s2739_s21 = sshll.u32 %s5314_s11, 7 }
0x136c   : > { %v1479_v39 = vpop.permute.xlu0 %1478 }
0x136d   : > { %1481 = vst.msk [vmem:[#allocation2] sm:$0xff] %vm465_vm1, %v1479_v39  ;;  %v2725_v39 = vld [vmem:[%s4667_s24 + $0x8] sm:$0xff] }
0x1374   : > { %v1482_v40 = vld [vmem:[#allocation2] sm:$0xff] }
0x1375   : > { %3364 = vmatmul.mubr.f32.vlgmr.msra.gmra.mxu0 %v1482_v40 }
0x1376   : > { %3402 = vmatpush3.msra.mxu0 %v4409_v14  ;;  %3433 = vmatprep.mubr.msk.f32.mxu0 %vm3895_vm0, %v3894_v12 }
0x1377   : > { %3403 = vmatprep.subr.mxu0 %v3894_v12 }
0x1378   : > { %3404 = vmatpush3.msra.mxu0 %v4416_v15 }
0x1379   : > { %3405 = vmatprep.subr.mxu0 %v3894_v12 }
0x137a   : > { %3406 = vmatpush3.msra.mxu0 %v4437_v18 }
0x137b   : > { %3407 = vmatprep.subr.mxu0 %v3894_v12 }
0x137c   : > { %3408 = vmatpush3.msra.mxu0 %v4451_v20 }
0x137d   : > { %3409 = vmatprep.subr.mxu0 %v3894_v12 }
0x137e   : > { %3410 = vmatpush3.msra.mxu0 %v4465_v22 }
0x137f   : > { %3411 = vmatprep.subr.mxu0 %v3894_v12 }
0x1380   : > { %3412 = vmatpush3.msra.mxu0 %v4479_v24 }
0x1381   : > { %3413 = vmatprep.subr.mxu0 %v3894_v12 }
0x1382   : > { %3414 = vmatpush3.msra.mxu0 %v4493_v26 }
0x1383   : > { %3415 = vmatprep.subr.mxu0 %v3894_v12 }
0x1384   : > { %3416 = vmatpush3.msra.mxu0 %v4507_v53 }
0x1385   : > { %3417 = vmatprep.subr.mxu0 %v3894_v12 }
0x1386   : > { %3418 = vmatpush3.msra.mxu0 %v4521_v55 }
0x1387   : > { %3419 = vmatprep.subr.mxu0 %v3894_v12 }
0x1388   : > { %3420 = vmatpush3.msra.mxu0 %v4535_v57 }
0x1389   : > { %3421 = vmatprep.subr.mxu0 %v3894_v12 }
0x138a   : > { %3422 = vmatpush3.msra.mxu0 %v4549_v59 }
0x138b   : > { %3423 = vmatprep.subr.mxu0 %v3894_v12 }
0x138c   : > { %3424 = vmatpush3.msra.mxu0 %v4563_v61 }
0x138d   : > { %3425 = vmatprep.subr.mxu0 %v3894_v12 }
0x138e   : > { %3426 = vmatpush3.msra.mxu0 %v4582_v63 }
0x138f   : > { %3427 = vmatprep.subr.mxu0 %v3894_v12 }
0x1390   : > { %3428 = vmatpush3.msra.mxu0 %v4592_v1 }
0x1391   : > { %3429 = vmatprep.subr.mxu0 %v3894_v12 }
0x1392   : > { %3430 = vmatpush3.msra.mxu0 %v4606_v3 }
0x1393   : > { %3431 = vmatprep.subr.mxu0 %v3894_v12 }
0x1394   : > { %3432 = vmatpush3.msra.mxu0 %v4615_v4 }
0x1395   : > { %3434 = vmatmul.mubr.f32.vlgmr.msra.gmra.mxu0 %v1482_v40  ;;  %3471 = vmatprep.subr.mxu0 %v3894_v12 }
0x1396   : > { %3472 = vmatpush3.msra.mxu0 %v4399_v11  ;;  %3503 = vmatprep.mubr.msk.f32.mxu0 %vm3895_vm0, %v3894_v12  ;;  %v472_v11 = vlaneseq }
0x1397   : > { %3473 = vmatprep.subr.mxu0 %v3894_v12 }
0x1398   : > { %3474 = vmatpush3.msra.mxu0 %v4404_v13  ;;  %v4870_v13 = vand.u32 127, %v472_v11 }
0x1399   : > { %3475 = vmatprep.subr.mxu0 %v3894_v12 }
0x139a   : > { %3476 = vmatpush3.msra.mxu0 %v4423_v16  ;;  %vm474_vm3 = vcmp.lt.s32.totalorder %v4870_v13, 24  ;;  %v4876_v16 = vld [vmem:[%s5306_s9] ss:$0 sm:$0xff] }
0x139b   : > { %3477 = vmatprep.subr.mxu0 %v3894_v12 }
0x139c   : > { %3478 = vmatpush3.msra.mxu0 %v4432_v17 }
0x139d   : > { %3479 = vmatprep.subr.mxu0 %v3894_v12 }
0x139e   : > { %3480 = vmatpush3.msra.mxu0 %v4446_v19  ;;  %v3899_v19 = vmov -1e+30  }
0x139f   : > { %3481 = vmatprep.subr.mxu0 %v3894_v12 }
0x13a0   : > { %3482 = vmatpush3.msra.mxu0 %v4460_v21  ;;  %v4878_v21 = vsel %vm474_vm3, 0.0, %v3899_v19 }
0x13a1   : > { %3483 = vmatprep.subr.mxu0 %v3894_v12 }
0x13a2   : > { %3484 = vmatpush3.msra.mxu0 %v4474_v23 }
0x13a3   : > { %3485 = vmatprep.subr.mxu0 %v3894_v12 }
0x13a4   : > { %3486 = vmatpush3.msra.mxu0 %v4488_v25 }
0x13a5   : > { %3487 = vmatprep.subr.mxu0 %v3894_v12 }
0x13a6   : > { %3488 = vmatpush3.msra.mxu0 %v4502_v27 }
0x13a7   : > { %3489 = vmatprep.subr.mxu0 %v3894_v12 }
0x13a8   : > { %3490 = vmatpush3.msra.mxu0 %v4516_v54 }
0x13a9   : > { %3491 = vmatprep.subr.mxu0 %v3894_v12 }
0x13aa   : > { %3492 = vmatpush3.msra.mxu0 %v4530_v56 }
0x13ab   : > { %3493 = vmatprep.subr.mxu0 %v3894_v12 }
0x13ac   : > { %3494 = vmatpush3.msra.mxu0 %v4544_v58 }
0x13ad   : > { %3495 = vmatprep.subr.mxu0 %v3894_v12 }
0x13ae   : > { %3496 = vmatpush3.msra.mxu0 %v4558_v60 }
0x13af   : > { %3497 = vmatprep.subr.mxu0 %v3894_v12 }
0x13b0   : > { %3498 = vmatpush3.msra.mxu0 %v4576_v62 }
0x13b1   : > { %3499 = vmatprep.subr.mxu0 %v3894_v12 }
0x13b2   : > { %3500 = vmatpush3.msra.mxu0 %v4587_v0 }
0x13b3   : > { %3501 = vmatprep.subr.mxu0 %v3894_v12 }
0x13b4   : > { %3502 = vmatpush3.msra.mxu0 %v4599_v2 }
0x13b5   : > { %3541 = vmatprep.subr.mxu0 %v3894_v12 }
0x1435   : > { %v1571_v17 = vpop.f32.mrf.mxu0 }
0x1436   : > { %v1572_v23 = vadd.f32 %v4876_v16, %v1571_v17 }
0x1437   : > { %v3365_v25 = vpop.f32.mrf.mxu0 }
0x1438   : > { %2722 = vst [vmem:[%s4797_s16 + $0x8] sm:$0xff] %v1572_v23  ;;  %v1577_v27 = vadd.f32 %v1572_v23, %v4878_v21 }
0x143a   : > { %1578 = vmax.xlane.f32.xlu1 %v1577_v27 }
0x144b   : > { %1473 = vrot.lane.b32.xlu1 %v4678_v49, %s3897_s14 }
0x1455   : > { %v4885_v54 = vpop.f32.mrf.mxu0 }
0x1457   : > { %v3435_v56 = vpop.f32.mrf.mxu0 }
0x14c3   : > { %v1579_v58 = vpop.xlane.xlu1 %1578 }
0x14c4   : > { %vm1580_vm4 = vcmp.eq.f32.partialorder %v1577_v27, %v1579_v58 }
0x14c5   : > { %v1581_v60 = vsel %vm1580_vm4, %v4870_v13, 128 }
0x14c6   : > { %v1583_v62 = vshra.s32 %v1581_v60, 16  ;;  %v1582_v42 = vand.u32 65535, %v1581_v60 }
0x14c7   : > { %v1474_v0 = vpop.permute.xlu1 %1473 }
0x14c8   : > { %1476 = vst.msk [vmem:[#allocation3] sm:$0xff] %vm465_vm1, %v1474_v0  ;;  %v1585_v2 = vcvt.s32.f32 %v1583_v62  ;;  %v1584_v44 = vcvt.s32.f32 %v1582_v42 }
0x14ca   : > { %1586 = vmin.xlane.f32.xlu0 %v1585_v2 }
0x14cf   : > { %v1783_v41 = vld [vmem:[#allocation3] sm:$0xff] }
0x14d0   : > { %1792 = vrot.lane.b32.xlu1 %v1783_v41, %s3896_s13 }
0x1553   : > { %v1587_v43 = vpop.xlane.xlu0 %1586 }
0x1554   : > { %vm1588_vm5 = vcmp.eq.f32.partialorder %v1585_v2, %v1587_v43  ;;  %v1593_v46 = vcvt.f32.s32 %v1587_v43  ;;  %v1793_v2 = vpop.permute.xlu1 %1792 }
0x1555   : > { %v1589_v45 = vsel %vm1588_vm5, %v1584_v44, inf }
0x1556   : > { %1590 = vmin.xlane.f32.xlu0 %v1589_v45  ;;  %v1594_v48 = vshll.u32 %v1593_v46, 16 }
0x15df   : > { %v1591_v47 = vpop.xlane.xlu0 %1590 }
0x15e0   : > { %v1592_v49 = vcvt.f32.s32 %v1591_v47 }
0x15e2   : > { %v1595_v7 = vadd.s32 %v1594_v48, %v1592_v49 }
0x15e4   : > { %vm1596_vm6 = vcmp.eq.s32.totalorder %v4870_v13, %v1595_v7 }
0x15e5   : > { %3399 = vmatmul.mubr.msk.f32.vlgmr.msra.gmra.mxu1 %vm1596_vm6, %v3900_v37 }
0x15e6   : > { %3437 = vmatpush3.msra.mxu1 %v4684_v50  ;;  %3468 = vmatprep.mubr.msk.f32.mxu1 %vm3895_vm0, %v3894_v12 }
0x15e7   : > { %3438 = vmatprep.subr.mxu1 %v3894_v12 }
0x15e8   : > { %3439 = vmatpush3.msra.mxu1 %v4689_v29 }
0x15e9   : > { %3440 = vmatprep.subr.mxu1 %v3894_v12 }
0x15ea   : > { %3441 = vmatpush3.msra.mxu1 %v4696_v51 }
0x15eb   : > { %3442 = vmatprep.subr.mxu1 %v3894_v12 }
0x15ec   : > { %3443 = vmatpush3.msra.mxu1 %v4703_v52 }
0x15ed   : > { %3444 = vmatprep.subr.mxu1 %v3894_v12 }
0x15ee   : > { %3445 = vmatpush3.msra.mxu1 %v4710_v5 }
0x15ef   : > { %3446 = vmatprep.subr.mxu1 %v3894_v12 }
0x15f0   : > { %3447 = vmatpush3.msra.mxu1 %v4717_v6 }
0x15f1   : > { %3448 = vmatprep.subr.mxu1 %v3894_v12 }
0x15f2   : > { %3449 = vmatpush3.msra.mxu1 %v4724_v8 }
0x15f3   : > { %3450 = vmatprep.subr.mxu1 %v3894_v12 }
0x15f4   : > { %3451 = vmatpush3.msra.mxu1 %v4732_v9 }
0x15f5   : > { %3452 = vmatprep.subr.mxu1 %v3894_v12 }
0x15f6   : > { %3453 = vmatpush3.msra.mxu1 %v4739_v10 }
0x15f7   : > { %3454 = vmatprep.subr.mxu1 %v3894_v12 }
0x15f8   : > { %3455 = vmatpush3.msra.mxu1 %v4746_v28 }
0x15f9   : > { %3456 = vmatprep.subr.mxu1 %v3894_v12 }
0x15fa   : > { %3457 = vmatpush3.msra.mxu1 %v4753_v30 }
0x15fb   : > { %3458 = vmatprep.subr.mxu1 %v3894_v12 }
0x15fc   : > { %3459 = vmatpush3.msra.mxu1 %v4760_v31 }
0x15fd   : > { %3460 = vmatprep.subr.mxu1 %v3894_v12 }
0x15fe   : > { %3461 = vmatpush3.msra.mxu1 %v4769_v32 }
0x15ff   : > { %3462 = vmatprep.subr.mxu1 %v3894_v12 }
0x1600   : > { %3463 = vmatpush3.msra.mxu1 %v4775_v33 }
0x1601   : > { %3464 = vmatprep.subr.mxu1 %v3894_v12 }
0x1602   : > { %3465 = vmatpush3.msra.mxu1 %v4781_v35 }
0x1603   : > { %3466 = vmatprep.subr.mxu1 %v3894_v12 }
0x1604   : > { %3467 = vmatpush3.msra.mxu1 %v4788_v36 }
0x1605   : > { %3506 = vmatprep.subr.mxu1 %v3894_v12 }
0x16a5   : > { %v1685_v40 = vpop.f32.mrf.mxu1 }
0x16a6   : > { %v1694_v11 = vsel %vm1693_vm7, %v2725_v39, %v1685_v40 }
0x16a7   : > { %v1779_v17 = vadd.f32 %v4885_v54, %v1694_v11  ;;  %v3400_v19 = vpop.f32.mrf.mxu1 }
0x16a9   : > { %v1782_v23 = vadd.f32 %v4673_v34, %v1779_v17 }
0x16ab   : > { %3791 = vtanh.f32 %v1782_v23  ;;  %v2726_v27 = vmul.f32 -1.442695, %v1782_v23 }
0x16ad   : > { %3793 = vpow2.f32 %v2726_v27 }
0x16b8   : > { %v3792_v25 = vpop.eup %3791 }
0x16b9   : > { %1797 = vrot.lane.b32.xlu0 %v3792_v25, %s3896_s13  ;;  %v2379_v25 = vld [vmem:[%s5302_s5 + $0x78] sm:$0xff] }
0x16ba   : > { %v3794_v56 = vpop.eup %3793 }
0x16bb   : > { %v1787_v58 = vadd.f32 1.0, %v3794_v56  ;;  %v2378_v56 = vld [vmem:[%s5302_s5 + $0x70] sm:$0xff] }
0x16bd   : > { %3795 = vrcp.f32 %v1787_v58  ;;  %v2377_v58 = vld [vmem:[%s5302_s5 + $0x68] sm:$0xff] }
0x16ca   : > { %v3796_v60 = vpop.eup %3795 }
0x16cb   : > { %v1795_v41 = vmul.f32 %v3796_v60, %v1793_v2  ;;  %v2373_v2 = vld [vmem:[%s5302_s5 + $0x48] sm:$0xff] }
0x172b   : > { %v1798_v62 = vpop.permute.xlu0 %1797 }
0x172c   : > { %v1800_v0 = vmul.f32 %v3796_v60, %v1798_v62  ;;  %v2375_v62 = vld [vmem:[%s5302_s5 + $0x58] sm:$0xff] }
0x172e   : > { %1802 = vrot.lane.b32.xlu1 %v1800_v0, %s3896_s13  ;;  %v2374_v0 = vld [vmem:[%s5302_s5 + $0x50] sm:$0xff] }
0x17a0   : > { %v1803_v54 = vpop.permute.xlu1 %1802 }
0x17a1   : > { %v4931_v42 = vadd.f32 %v1803_v54, %v1795_v41  ;;  %v2372_v41 = vld [vmem:[%s5302_s5 + $0x40] sm:$0xff]  ;;  %v2371_v54 = vld [vmem:[%s5302_s5 + $0x38] sm:$0xff] }
0x17a3   : > { %3797 = vtanh.f32 %v4931_v42 }
0x17b0   : > { %v3798_v43 = vpop.eup %3797 }
0x17b1   : > { %1808 = vrot.lane.b32.xlu0 %v3798_v43, %s3896_s13  ;;  %v2369_v43 = vld [vmem:[%s5302_s5 + $0x28] sm:$0xff] }
0x1823   : > { %v1809_v44 = vpop.permute.xlu0 %1808 }
0x1824   : > { %v1811_v45 = vmul.f32 %v3796_v60, %v1809_v44  ;;  %v2376_v60 = vld [vmem:[%s5302_s5 + $0x60] sm:$0xff] }
0x1825   : > { %v2368_v44 = vld [vmem:[%s5302_s5 + $0x20] sm:$0xff] }
0x1826   : > { %1818 = vrot.lane.b32.xlu1 %v1811_v45, %s5309_s15  ;;  %v2367_v45 = vld [vmem:[%s5302_s5 + $0x18] sm:$0xff] }
0x1898   : > { %v1819_v46 = vpop.permute.xlu1 %1818 }
0x1899   : > { %1821 = vst.msk [vmem:[#allocation2] sm:$0xff] %vm465_vm1, %v1819_v46  ;;  %v2366_v46 = vld [vmem:[%s5302_s5 + $0x10] sm:$0xff] }
0x18a0   : > { %v1822_v47 = vld [vmem:[#allocation2] sm:$0xff] }
0x18a1   : > { %3469 = vmatmul.mubr.f32.vlgmr.msra.gmra.mxu1 %v1822_v47 }
0x18a2   : > { %3507 = vmatpush3.msra.mxu1 %v4409_v14  ;;  %3538 = vmatprep.mubr.msk.f32.mxu1 %vm3895_vm0, %v3894_v12 }
0x18a3   : > { %3508 = vmatprep.subr.mxu1 %v3894_v12 }
0x18a4   : > { %3509 = vmatpush3.msra.mxu1 %v4416_v15 }
0x18a5   : > { %3510 = vmatprep.subr.mxu1 %v3894_v12 }
0x18a6   : > { %3511 = vmatpush3.msra.mxu1 %v4437_v18 }
0x18a7   : > { %3512 = vmatprep.subr.mxu1 %v3894_v12 }
0x18a8   : > { %3513 = vmatpush3.msra.mxu1 %v4451_v20 }
0x18a9   : > { %3514 = vmatprep.subr.mxu1 %v3894_v12 }
0x18aa   : > { %3515 = vmatpush3.msra.mxu1 %v4465_v22 }
0x18ab   : > { %3516 = vmatprep.subr.mxu1 %v3894_v12 }
0x18ac   : > { %3517 = vmatpush3.msra.mxu1 %v4479_v24 }
0x18ad   : > { %3518 = vmatprep.subr.mxu1 %v3894_v12 }
0x18ae   : > { %3519 = vmatpush3.msra.mxu1 %v4493_v26 }
0x18af   : > { %3520 = vmatprep.subr.mxu1 %v3894_v12 }
0x18b0   : > { %3521 = vmatpush3.msra.mxu1 %v4507_v53 }
0x18b1   : > { %3522 = vmatprep.subr.mxu1 %v3894_v12 }
0x18b2   : > { %3523 = vmatpush3.msra.mxu1 %v4521_v55 }
0x18b3   : > { %3524 = vmatprep.subr.mxu1 %v3894_v12 }
0x18b4   : > { %3525 = vmatpush3.msra.mxu1 %v4535_v57 }
0x18b5   : > { %3526 = vmatprep.subr.mxu1 %v3894_v12 }
0x18b6   : > { %3527 = vmatpush3.msra.mxu1 %v4549_v59 }
0x18b7   : > { %3528 = vmatprep.subr.mxu1 %v3894_v12 }
0x18b8   : > { %3529 = vmatpush3.msra.mxu1 %v4563_v61 }
0x18b9   : > { %3530 = vmatprep.subr.mxu1 %v3894_v12 }
0x18ba   : > { %3531 = vmatpush3.msra.mxu1 %v4582_v63 }
0x18bb   : > { %3532 = vmatprep.subr.mxu1 %v3894_v12 }
0x18bc   : > { %3533 = vmatpush3.msra.mxu1 %v4592_v1 }
0x18bd   : > { %3534 = vmatprep.subr.mxu1 %v3894_v12 }
0x18be   : > { %3535 = vmatpush3.msra.mxu1 %v4606_v3 }
0x18bf   : > { %3536 = vmatprep.subr.mxu1 %v3894_v12 }
0x18c0   : > { %3537 = vmatpush3.msra.mxu1 %v4615_v4 }
0x18c1   : > { %3539 = vmatmul.mubr.f32.vlgmr.msra.gmra.mxu1 %v1822_v47  ;;  %3576 = vmatprep.subr.mxu1 %v3894_v12  ;;  %v2365_v47 = vld [vmem:[%s5302_s5 + $0x8] sm:$0xff] }
0x18c2   : > { %3608 = vmatprep.mubr.msk.f32.mxu1 %vm3895_vm0, %v3894_v12 }
0x1961   : > { %v1905_v14 = vpop.f32.mrf.mxu1 }
0x1962   : > { %v1906_v15 = vadd.f32 %v4876_v16, %v1905_v14  ;;  %v2364_v14 = vld [vmem:[%s5302_s5] sm:$0xff] }
0x1963   : > { %v3470_v18 = vpop.f32.mrf.mxu1 }
0x1964   : > { %2727 = vst [vmem:[%s4797_s16 + $0x10] sm:$0xff] %v1906_v15  ;;  %v1911_v20 = vadd.f32 %v1906_v15, %v4878_v21 }
0x1966   : > { %1912 = vmax.xlane.f32.xlu0 %v1911_v20 }
0x1981   : > { %v4976_v22 = vpop.f32.mrf.mxu1 }
0x1983   : > { %v3540_v24 = vpop.f32.mrf.mxu1 }
0x19ef   : > { %v1913_v26 = vpop.xlane.xlu0 %1912 }
0x19f0   : > { %vm1914_vm8 = vcmp.eq.f32.partialorder %v1911_v20, %v1913_v26 }
0x19f1   : > { %v1915_v53 = vsel %vm1914_vm8, %v4870_v13, 128 }
0x19f2   : > { %v1917_v55 = vshra.s32 %v1915_v53, 16  ;;  %v1916_v59 = vand.u32 65535, %v1915_v53 }
0x19f4   : > { %v1919_v57 = vcvt.s32.f32 %v1917_v55  ;;  %v1918_v63 = vcvt.s32.f32 %v1916_v59 }
0x19f6   : > { %1920 = vmin.xlane.f32.xlu1 %v1919_v57 }
0x1a7f   : > { %v1921_v61 = vpop.xlane.xlu1 %1920 }
0x1a80   : > { %vm1922_vm9 = vcmp.eq.f32.partialorder %v1919_v57, %v1921_v61  ;;  %v1927_v3 = vcvt.f32.s32 %v1921_v61 }
0x1a81   : > { %v1923_v1 = vsel %vm1922_vm9, %v1918_v63, inf }
0x1a82   : > { %1924 = vmin.xlane.f32.xlu0 %v1923_v1  ;;  %v1928_v48 = vshll.u32 %v1927_v3, 16  ;;  %v2285_v1 = vld [vmem:[%s5304_s7 + $0x70] sm:$0xff]  ;;  %v2284_v3 = vld [vmem:[%s5304_s7 + $0x68] sm:$0xff] }
0x1a98   : > { %1813 = vrot.lane.b32.xlu0 %v4931_v42, %s3897_s14  ;;  %v2370_v42 = vld [vmem:[%s5302_s5 + $0x30] sm:$0xff] }
0x1b0b   : > { %v1925_v4 = vpop.xlane.xlu0 %1924 }
0x1b0c   : > { %v1926_v49 = vcvt.f32.s32 %v1925_v4  ;;  %v2283_v4 = vld [vmem:[%s5304_s7 + $0x60] sm:$0xff] }
0x1b0e   : > { %v1929_v7 = vadd.s32 %v1928_v48, %v1926_v49  ;;  %v2282_v48 = vld [vmem:[%s5304_s7 + $0x58] sm:$0xff]  ;;  %v2281_v49 = vld [vmem:[%s5304_s7 + $0x50] sm:$0xff] }
0x1b0f   : > { %v1814_v38 = vpop.permute.xlu0 %1813 }
0x1b10   : > { %vm1930_vm10 = vcmp.eq.s32.totalorder %v4870_v13, %v1929_v7  ;;  %1816 = vst.msk [vmem:[#allocation3] sm:$0xff] %vm465_vm1, %v1814_v38  ;;  %v2280_v7 = vld [vmem:[%s5304_s7 + $0x48] sm:$0xff]  ;;  %v2279_v38 = vld [vmem:[%s5304_s7 + $0x40] sm:$0xff] }
0x1b11   : > { %3504 = vmatmul.mubr.msk.f32.vlgmr.msra.gmra.mxu0 %vm1930_vm10, %v3900_v37 }
0x1b12   : > { %3542 = vmatpush3.msra.mxu0 %v4684_v50  ;;  %3573 = vmatprep.mubr.msk.f32.mxu0 %vm3895_vm0, %v3894_v12  ;;  %v2026_v50 = vstv %s2025_s27  ;;  %s2359_s27 = scalar_select %p2269_p7, 1, 0 }
0x1b13   : > { %3543 = vmatprep.subr.mxu0 %v3894_v12  ;;  %vm2027_vm11 = vcmp.eq.s32.totalorder %v2026_v50, 1  ;;  %v2278_v50 = vld [vmem:[%s5304_s7 + $0x38] sm:$0xff] }
0x1b14   : > { %3544 = vmatpush3.msra.mxu0 %v4689_v29  ;;  %v2730_v29 = vld [vmem:[%s4667_s24 + $0x10] sm:$0xff] }
0x1b15   : > { %3545 = vmatprep.subr.mxu0 %v3894_v12 }
0x1b16   : > { %3546 = vmatpush3.msra.mxu0 %v4696_v51 }
0x1b17   : > { %3547 = vmatprep.subr.mxu0 %v3894_v12 }
0x1b18   : > { %3548 = vmatpush3.msra.mxu0 %v4703_v52 }
0x1b19   : > { %3549 = vmatprep.subr.mxu0 %v3894_v12 }
0x1b1a   : > { %3550 = vmatpush3.msra.mxu0 %v4710_v5 }
0x1b1b   : > { %3551 = vmatprep.subr.mxu0 %v3894_v12 }
0x1b1c   : > { %3552 = vmatpush3.msra.mxu0 %v4717_v6 }
0x1b1d   : > { %3553 = vmatprep.subr.mxu0 %v3894_v12 }
0x1b1e   : > { %3554 = vmatpush3.msra.mxu0 %v4724_v8 }
0x1b1f   : > { %3555 = vmatprep.subr.mxu0 %v3894_v12 }
0x1b20   : > { %3556 = vmatpush3.msra.mxu0 %v4732_v9 }
0x1b21   : > { %3557 = vmatprep.subr.mxu0 %v3894_v12 }
0x1b22   : > { %3558 = vmatpush3.msra.mxu0 %v4739_v10  ;;  %v2117_v10 = vld [vmem:[#allocation3] sm:$0xff] }
0x1b23   : > { %3559 = vmatprep.subr.mxu0 %v3894_v12 }
0x1b24   : > { %3560 = vmatpush3.msra.mxu0 %v4746_v28 }
0x1b25   : > { %3561 = vmatprep.subr.mxu0 %v3894_v12 }
0x1b26   : > { %3562 = vmatpush3.msra.mxu0 %v4753_v30 }
0x1b27   : > { %3563 = vmatprep.subr.mxu0 %v3894_v12 }
0x1b28   : > { %3564 = vmatpush3.msra.mxu0 %v4760_v31 }
0x1b29   : > { %3565 = vmatprep.subr.mxu0 %v3894_v12 }
0x1b2a   : > { %3566 = vmatpush3.msra.mxu0 %v4769_v32 }
0x1b2b   : > { %3567 = vmatprep.subr.mxu0 %v3894_v12 }
0x1b2c   : > { %3568 = vmatpush3.msra.mxu0 %v4775_v33 }
0x1b2d   : > { %3569 = vmatprep.subr.mxu0 %v3894_v12 }
0x1b2e   : > { %3570 = vmatpush3.msra.mxu0 %v4781_v35 }
0x1b2f   : > { %3571 = vmatprep.subr.mxu0 %v3894_v12 }
0x1b30   : > { %3572 = vmatpush3.msra.mxu0 %v4788_v36 }
0x1b31   : > { %3611 = vmatprep.subr.mxu0 %v3894_v12 }
0x1bd1   : > { %v2019_v51 = vpop.f32.mrf.mxu0 }
0x1bd2   : > { %v2028_v52 = vsel %vm2027_vm11, %v2730_v29, %v2019_v51  ;;  %v2277_v29 = vld [vmem:[%s5304_s7 + $0x30] sm:$0xff]  ;;  %v2276_v51 = vld [vmem:[%s5304_s7 + $0x28] sm:$0xff] }
0x1bd3   : > { %v2113_v5 = vadd.f32 %v4976_v22, %v2028_v52  ;;  %v3505_v6 = vpop.f32.mrf.mxu0  ;;  %v2275_v52 = vld [vmem:[%s5304_s7 + $0x20] sm:$0xff] }
0x1bd5   : > { %v2116_v8 = vadd.f32 %v4673_v34, %v2113_v5  ;;  %v2274_v5 = vld [vmem:[%s5304_s7 + $0x18] sm:$0xff] }
0x1bd7   : > { %3799 = vtanh.f32 %v2116_v8  ;;  %v2731_v28 = vmul.f32 -1.442695, %v2116_v8 }
0x1bd9   : > { %3801 = vpow2.f32 %v2731_v28  ;;  %v2273_v28 = vld [vmem:[%s5304_s7 + $0x10] sm:$0xff] }
0x1be4   : > { %v3800_v9 = vpop.eup %3799 }
0x1be5   : > { %2131 = vrot.lane.b32.xlu1 %v3800_v9, %s3896_s13 }
0x1be6   : > { %v3802_v30 = vpop.eup %3801 }
0x1be7   : > { %v2121_v31 = vadd.f32 1.0, %v3802_v30  ;;  %v2272_v30 = vld [vmem:[%s5304_s7 + $0x8] sm:$0xff] }
0x1be9   : > { %2126 = vrot.lane.b32.xlu1 %v2117_v10, %s3896_s13  ;;  %3803 = vrcp.f32 %v2121_v31  ;;  %v2271_v31 = vld [vmem:[%s5304_s7] sm:$0xff] }
0x1bf6   : > { %v3804_v32 = vpop.eup %3803 }
0x1c57   : > { %v2132_v33 = vpop.permute.xlu1 %2131 }
0x1c58   : > { %v2134_v35 = vmul.f32 %v3804_v32, %v2132_v33 }
0x1c5a   : > { %2136 = vrot.lane.b32.xlu0 %v2134_v35, %s3896_s13 }
0x1c5b   : > { %v2127_v36 = vpop.permute.xlu1 %2126 }
0x1c5c   : > { %v2129_v39 = vmul.f32 %v3804_v32, %v2127_v36 }
0x1ccc   : > { %v2137_v34 = vpop.permute.xlu0 %2136 }
0x1ccd   : > { %v5024_v40 = vadd.f32 %v2137_v34, %v2129_v39  ;;  %v2360_v34 = vstv %s2359_s27 }
0x1cce   : > { %vm2361_vm15 = vcmp.eq.s32.totalorder %v2360_v34, 1 }
0x1ccf   : > { %3805 = vtanh.f32 %v5024_v40 }
0x1cdc   : > { %v3806_v11 = vpop.eup %3805 }
0x1cdd   : > { %2142 = vrot.lane.b32.xlu1 %v3806_v11, %s3896_s13 }
0x1d4f   : > { %v2143_v17 = vpop.permute.xlu1 %2142 }
0x1d50   : > { %v2145_v19 = vmul.f32 %v3804_v32, %v2143_v17 }
0x1d52   : > { %2152 = vrot.lane.b32.xlu0 %v2145_v19, %s5309_s15  ;;  %s5313_s15 = smov 64  }
0x1dc4   : > { %v2153_v23 = vpop.permute.xlu0 %2152 }
0x1dc5   : > { %2155 = vst.msk [vmem:[#allocation2] sm:$0xff] %vm465_vm1, %v2153_v23 }
0x1dcc   : > { %v2156_v27 = vld [vmem:[#allocation2] sm:$0xff] }
0x1dcd   : > { %3574 = vmatmul.mubr.f32.vlgmr.msra.gmra.mxu0 %v2156_v27 }
0x1dce   : > { %3612 = vmatpush3.msra.mxu0 %v2379_v25  ;;  %3643 = vmatprep.mubr.msk.f32.mxu0 %vm3895_vm0, %v3894_v12 }
0x1dcf   : > { %3613 = vmatprep.subr.mxu0 %v3894_v12 }
0x1dd0   : > { %3614 = vmatpush3.msra.mxu0 %v2378_v56 }
0x1dd1   : > { %3615 = vmatprep.subr.mxu0 %v3894_v12 }
0x1dd2   : > { %3616 = vmatpush3.msra.mxu0 %v2377_v58 }
0x1dd3   : > { %3617 = vmatprep.subr.mxu0 %v3894_v12 }
0x1dd4   : > { %3618 = vmatpush3.msra.mxu0 %v2376_v60 }
0x1dd5   : > { %3619 = vmatprep.subr.mxu0 %v3894_v12 }
0x1dd6   : > { %3620 = vmatpush3.msra.mxu0 %v2375_v62 }
0x1dd7   : > { %3621 = vmatprep.subr.mxu0 %v3894_v12 }
0x1dd8   : > { %3622 = vmatpush3.msra.mxu0 %v2374_v0 }
0x1dd9   : > { %3623 = vmatprep.subr.mxu0 %v3894_v12 }
0x1dda   : > { %3624 = vmatpush3.msra.mxu0 %v2373_v2 }
0x1ddb   : > { %3625 = vmatprep.subr.mxu0 %v3894_v12 }
0x1ddc   : > { %3626 = vmatpush3.msra.mxu0 %v2372_v41 }
0x1ddd   : > { %3627 = vmatprep.subr.mxu0 %v3894_v12 }
0x1dde   : > { %3628 = vmatpush3.msra.mxu0 %v2371_v54 }
0x1ddf   : > { %3629 = vmatprep.subr.mxu0 %v3894_v12 }
0x1de0   : > { %3630 = vmatpush3.msra.mxu0 %v2370_v42 }
0x1de1   : > { %3631 = vmatprep.subr.mxu0 %v3894_v12 }
0x1de2   : > { %3632 = vmatpush3.msra.mxu0 %v2369_v43  ;;  %v2506_v43 = vld [vmem:[%s5305_s8 + $0x78] sm:$0xff] }
0x1de3   : > { %3633 = vmatprep.subr.mxu0 %v3894_v12 }
0x1de4   : > { %3634 = vmatpush3.msra.mxu0 %v2368_v44  ;;  %v2505_v44 = vld [vmem:[%s5305_s8 + $0x70] sm:$0xff] }
0x1de5   : > { %3635 = vmatprep.subr.mxu0 %v3894_v12 }
0x1de6   : > { %3636 = vmatpush3.msra.mxu0 %v2367_v45  ;;  %v2504_v45 = vld [vmem:[%s5305_s8 + $0x68] sm:$0xff] }
0x1de7   : > { %3637 = vmatprep.subr.mxu0 %v3894_v12 }
0x1de8   : > { %3638 = vmatpush3.msra.mxu0 %v2366_v46  ;;  %v2503_v46 = vld [vmem:[%s5305_s8 + $0x60] sm:$0xff] }
0x1de9   : > { %3639 = vmatprep.subr.mxu0 %v3894_v12 }
0x1dea   : > { %3640 = vmatpush3.msra.mxu0 %v2365_v47  ;;  %v2502_v47 = vld [vmem:[%s5305_s8 + $0x58] sm:$0xff] }
0x1deb   : > { %3641 = vmatprep.subr.mxu0 %v3894_v12 }
0x1dec   : > { %3642 = vmatpush3.msra.mxu0 %v2364_v14 }
0x1ded   : > { %3644 = vmatmul.mubr.f32.vlgmr.msra.gmra.mxu0 %v2156_v27 }
0x1e8d   : > { %v2239_v15 = vpop.f32.mrf.mxu0 }
0x1e8e   : > { %v2240_v18 = vadd.f32 %v4876_v16, %v2239_v15  ;;  %v2501_v15 = vld [vmem:[%s5305_s8 + $0x50] sm:$0xff] }
0x1e8f   : > { %v3575_v20 = vpop.f32.mrf.mxu0 }
0x1e90   : > { %2732 = vst [vmem:[%s4797_s16 + $0x18] sm:$0xff] %v2240_v18  ;;  %v2245_v22 = vadd.f32 %v2240_v18, %v4878_v21  ;;  %v2286_v21 = vld [vmem:[%s5304_s7 + $0x78] sm:$0xff]  ;;  %v2500_v18 = vld [vmem:[%s5305_s8 + $0x48] sm:$0xff]  ;;  %v2499_v20 = vld [vmem:[%s5305_s8 + $0x40] sm:$0xff] }
0x1e91   : > { %3577 = vmatpush3.msra.mxu1 %v2286_v21 }
0x1e92   : > { %2246 = vmax.xlane.f32.xlu1 %v2245_v22  ;;  %3578 = vmatprep.subr.mxu1 %v3894_v12 }
0x1e93   : > { %3579 = vmatpush3.msra.mxu1 %v2285_v1 }
0x1e94   : > { %3580 = vmatprep.subr.mxu1 %v3894_v12 }
0x1e95   : > { %3581 = vmatpush3.msra.mxu1 %v2284_v3 }
0x1e96   : > { %3582 = vmatprep.subr.mxu1 %v3894_v12 }
0x1e97   : > { %3583 = vmatpush3.msra.mxu1 %v2283_v4 }
0x1e98   : > { %3584 = vmatprep.subr.mxu1 %v3894_v12 }
0x1e99   : > { %3585 = vmatpush3.msra.mxu1 %v2282_v48 }
0x1e9a   : > { %3586 = vmatprep.subr.mxu1 %v3894_v12 }
0x1e9b   : > { %3587 = vmatpush3.msra.mxu1 %v2281_v49 }
0x1e9c   : > { %3588 = vmatprep.subr.mxu1 %v3894_v12 }
0x1e9d   : > { %3589 = vmatpush3.msra.mxu1 %v2280_v7 }
0x1e9e   : > { %3590 = vmatprep.subr.mxu1 %v3894_v12 }
0x1e9f   : > { %3591 = vmatpush3.msra.mxu1 %v2279_v38 }
0x1ea0   : > { %3592 = vmatprep.subr.mxu1 %v3894_v12 }
0x1ea1   : > { %3593 = vmatpush3.msra.mxu1 %v2278_v50 }
0x1ea2   : > { %3594 = vmatprep.subr.mxu1 %v3894_v12 }
0x1ea3   : > { %2147 = vrot.lane.b32.xlu1 %v5024_v40, %s3897_s14  ;;  %3595 = vmatpush3.msra.mxu1 %v2277_v29  ;;  %v2735_v40 = vld [vmem:[%s4667_s24 + $0x18] sm:$0xff]  ;;  %s3901_s24 = smov [#allocation9]  }
0x1ea4   : > { %3596 = vmatprep.subr.mxu1 %v3894_v12  ;;  %s3833_s30 = sshll.u32 %s3901_s24, 4  ;;  %s3834_s30 = int_to_ptr.vmem [resolvable:$false] %s3833_s30 }
0x1ea5   : > { %3597 = vmatpush3.msra.mxu1 %v2276_v51 }
0x1ea6   : > { %3598 = vmatprep.subr.mxu1 %v3894_v12 }
0x1ea7   : > { %3599 = vmatpush3.msra.mxu1 %v2275_v52 }
0x1ea8   : > { %3600 = vmatprep.subr.mxu1 %v3894_v12 }
0x1ea9   : > { %3601 = vmatpush3.msra.mxu1 %v2274_v5 }
0x1eaa   : > { %3602 = vmatprep.subr.mxu1 %v3894_v12 }
0x1eab   : > { %3603 = vmatpush3.msra.mxu1 %v2273_v28 }
0x1eac   : > { %3604 = vmatprep.subr.mxu1 %v3894_v12 }
0x1ead   : > { %v5100_v24 = vpop.f32.mrf.mxu0  ;;  %3605 = vmatpush3.msra.mxu1 %v2272_v30 }
0x1eae   : > { %3606 = vmatprep.subr.mxu1 %v3894_v12 }
0x1eaf   : > { %v3645_v26 = vpop.f32.mrf.mxu0  ;;  %3607 = vmatpush3.msra.mxu1 %v2271_v31 }
0x1eb0   : > { %3646 = vmatprep.subr.mxu1 %v3894_v12  ;;  %v2496_v26 = vld [vmem:[%s5305_s8 + $0x28] sm:$0xff] }
0x1f1b   : > { %v2247_v53 = vpop.xlane.xlu1 %2246 }
0x1f1c   : > { %vm2248_vm12 = vcmp.eq.f32.partialorder %v2245_v22, %v2247_v53  ;;  %v2498_v22 = vld [vmem:[%s5305_s8 + $0x38] sm:$0xff]  ;;  %v2495_v53 = vld [vmem:[%s5305_s8 + $0x20] sm:$0xff] }
0x1f1d   : > { %v2249_v55 = vsel %vm2248_vm12, %v4870_v13, 128 }
0x1f1e   : > { %v2251_v57 = vshra.s32 %v2249_v55, 16  ;;  %v2250_v6 = vand.u32 65535, %v2249_v55  ;;  %v3816_v55 = vld [vmem:[%s4797_s16] sm:$0xff] }
0x1f1f   : > { %v2148_v59 = vpop.permute.xlu1 %2147 }
0x1f20   : > { %2150 = vst.msk [vmem:[#allocation3] sm:$0xff] %vm465_vm1, %v2148_v59  ;;  %v2253_v61 = vcvt.s32.f32 %v2251_v57  ;;  %v2252_v9 = vcvt.s32.f32 %v2250_v6  ;;  %v2494_v57 = vld [vmem:[%s5305_s8 + $0x18] sm:$0xff]  ;;  %v2493_v59 = vld [vmem:[%s5305_s8 + $0x10] sm:$0xff] }
0x1f22   : > { %2254 = vmin.xlane.f32.xlu0 %v2253_v61 }
0x1f27   : > { %v2451_v63 = vld [vmem:[#allocation3] sm:$0xff] }
0x1f28   : > { %2460 = vrot.lane.b32.xlu1 %v2451_v63, %s3896_s13 }
0x1f9a   : > { %v2461_v2 = vpop.permute.xlu1 %2460 }
0x1fab   : > { %v2255_v8 = vpop.xlane.xlu0 %2254 }
0x1fac   : > { %vm2256_vm13 = vcmp.eq.f32.partialorder %v2253_v61, %v2255_v8  ;;  %v2261_v32 = vcvt.f32.s32 %v2255_v8  ;;  %v2491_v61 = vld [vmem:[%s5305_s8] sm:$0xff] }
0x1fad   : > { %v2257_v10 = vsel %vm2256_vm13, %v2252_v9, inf }
0x1fae   : > { %2258 = vmin.xlane.f32.xlu0 %v2257_v10  ;;  %v2262_v35 = vshll.u32 %v2261_v32, 16 }
0x2037   : > { %v2259_v33 = vpop.xlane.xlu0 %2258 }
0x2038   : > { %v2260_v36 = vcvt.f32.s32 %v2259_v33 }
0x203a   : > { %v2263_v39 = vadd.s32 %v2262_v35, %v2260_v36 }
0x203c   : > { %vm2264_vm14 = vcmp.eq.s32.totalorder %v4870_v13, %v2263_v39  ;;  %v3815_v13 = vld [vmem:[%s5303_s6] ss:$0 sm:$0xff] }
0x203d   : > { %3609 = vmatmul.mubr.msk.f32.vlgmr.msra.gmra.mxu1 %vm2264_vm14, %v3900_v37 }
0x203e   : > { %3678 = vmatprep.mubr.msk.f32.mxu1 %vm3895_vm0, %v3894_v12  ;;  %3647 = vmatpush3.msra.mxu1 %v2506_v43 }
0x203f   : > { %3648 = vmatprep.subr.mxu1 %v3894_v12 }
0x2040   : > { %3649 = vmatpush3.msra.mxu1 %v2505_v44 }
0x2041   : > { %3650 = vmatprep.subr.mxu1 %v3894_v12 }
0x2042   : > { %3651 = vmatpush3.msra.mxu1 %v2504_v45 }
0x2043   : > { %3652 = vmatprep.subr.mxu1 %v3894_v12 }
0x2044   : > { %3653 = vmatpush3.msra.mxu1 %v2503_v46 }
0x2045   : > { %3654 = vmatprep.subr.mxu1 %v3894_v12 }
0x2046   : > { %3655 = vmatpush3.msra.mxu1 %v2502_v47 }
0x2047   : > { %3656 = vmatprep.subr.mxu1 %v3894_v12 }
0x2048   : > { %3657 = vmatpush3.msra.mxu1 %v2501_v15 }
0x2049   : > { %3658 = vmatprep.subr.mxu1 %v3894_v12 }
0x204a   : > { %3659 = vmatpush3.msra.mxu1 %v2500_v18 }
0x204b   : > { %3660 = vmatprep.subr.mxu1 %v3894_v12 }
0x204c   : > { %3661 = vmatpush3.msra.mxu1 %v2499_v20 }
0x204d   : > { %3662 = vmatprep.subr.mxu1 %v3894_v12 }
0x204e   : > { %3663 = vmatpush3.msra.mxu1 %v2498_v22 }
0x204f   : > { %3664 = vmatprep.subr.mxu1 %v3894_v12 }
0x20fd   : > { %v2353_v11 = vpop.f32.mrf.mxu1 }
0x20fe   : > { %v2362_v17 = vsel %vm2361_vm15, %v2735_v40, %v2353_v11 }
0x20ff   : > { %v2447_v19 = vadd.f32 %v5100_v24, %v2362_v17  ;;  %v3610_v23 = vpop.f32.mrf.mxu1  ;;  %v2497_v24 = vld [vmem:[%s5305_s8 + $0x30] sm:$0xff] }
0x2100   : > { %3665 = vmatpush3.msra.mxu1 %v2497_v24 }
0x2101   : > { %v2450_v25 = vadd.f32 %v3815_v13, %v2447_v19  ;;  %3666 = vmatprep.subr.mxu1 %v3894_v12  ;;  %v2492_v12 = vld [vmem:[%s5305_s8 + $0x8] sm:$0xff] }
0x2102   : > { %3667 = vmatpush3.msra.mxu1 %v2496_v26 }
0x2103   : > { %3807 = vtanh.f32 %v2450_v25  ;;  %v2736_v27 = vmul.f32 -1.442695, %v2450_v25  ;;  %3668 = vmatprep.subr.mxu1 %v3816_v55 }
0x2104   : > { %3669 = vmatpush3.msra.mxu1 %v2495_v53 }
0x2105   : > { %3809 = vpow2.f32 %v2736_v27  ;;  %3670 = vmatprep.subr.mxu1 %v3816_v55 }
0x2106   : > { %3671 = vmatpush3.msra.mxu1 %v2494_v57 }
0x2107   : > { %3672 = vmatprep.subr.mxu1 %v3816_v55 }
0x2108   : > { %3673 = vmatpush3.msra.mxu1 %v2493_v59 }
0x2109   : > { %3674 = vmatprep.subr.mxu1 %v3816_v55 }
0x210a   : > { %3675 = vmatpush3.msra.mxu1 %v2492_v12 }
0x210b   : > { %3676 = vmatprep.subr.mxu1 %v3816_v55 }
0x210c   : > { %3677 = vmatpush3.msra.mxu1 %v2491_v61 }
0x2110   : > { %v3808_v37 = vpop.eup %3807 }
0x2111   : > { %2465 = vrot.lane.b32.xlu0 %v3808_v37, %s3896_s13 }
0x2112   : > { %v3810_v56 = vpop.eup %3809 }
0x2113   : > { %v2455_v58 = vadd.f32 1.0, %v3810_v56 }
0x2115   : > { %3811 = vrcp.f32 %v2455_v58 }
0x2122   : > { %v3812_v60 = vpop.eup %3811 }
0x2123   : > { %v2463_v41 = vmul.f32 %v3812_v60, %v2461_v2 }
0x2183   : > { %v2466_v62 = vpop.permute.xlu0 %2465 }
0x2184   : > { %v2468_v0 = vmul.f32 %v3812_v60, %v2466_v62 }
0x2186   : > { %2470 = vrot.lane.b32.xlu1 %v2468_v0, %s3896_s13 }
0x21f8   : > { %v2471_v54 = vpop.permute.xlu1 %2470 }
0x21f9   : > { %v2473_v42 = vadd.f32 %v2471_v54, %v2463_v41 }
0x21fb   : > { %3813 = vtanh.f32 %v2473_v42 }
0x2208   : > { %v3814_v14 = vpop.eup %3813 }
0x2209   : > { %2476 = vrot.lane.b32.xlu0 %v3814_v14, %s3896_s13  ;;  %s5252_s13 = scalar_lea.hbm %s5307_s10, %s2739_s21 }
0x220d   : > { %2481 = vrot.lane.b32.xlu0 %v2473_v42, %s3897_s14  ;;  %s2615_s14 = sshll.u32 %s4797_s16, 4  ;;  %s5247_s14 = int_to_ptr.vmem [resolvable:$true] %s2615_s14 }
0x220e   : > { %s3829_s22 = scalar_lea.vmem %s5247_s14, 640  ;;  %p3836_p12 = scmp.lt.s32.totalorder %s5247_s14, %s3834_s30 }
0x220f   : > { %p3830_p8 = scmp.ne.s32.totalorder %s5247_s14, %s3829_s22 }
0x2211   : > { %p3831_p9 = pnand %p3830_p8, %p4005_p11 }
0x2213   : > { %p3832_p10 = pneg %p3831_p9 }
0x227b   : > { %v2477_v63 = vpop.permute.xlu0 %2476 }
0x227c   : > { %v2479_v21 = vmul.f32 %v3812_v60, %v2477_v63 }
0x227e   : > { %2486 = vrot.lane.b32.xlu1 %v2479_v21, %s5313_s15  ;;  %s3835_s15 = scalar_lea.vmem %s3834_s30, 1280 }
0x227f   : > { %v2482_v1 = vpop.permute.xlu0 %2481  ;;  %p3837_p1 = scmp.lt.s32.totalorder %s3835_s15, %s3829_s22 }
0x2280   : > { %2484 = vst.msk [vmem:[#allocation3] sm:$0xff] %vm465_vm1, %v2482_v1 }
0x2281   : > { %p3838_p2 = por %p3837_p1, %p3836_p12 }
0x2283   : > { %p3839_p3 = pnand %p3838_p2, %p3832_p10 }
0x22f0   : > { %v2487_v3 = vpop.permute.xlu1 %2486 }
0x22f1   : > { %2489 = vst.msk [vmem:[#allocation2] sm:$0xff] %vm465_vm1, %v2487_v3 }
0x22f8   : > { %v2490_v4 = vld [vmem:[#allocation2] sm:$0xff] }
0x22f9   : > { %3679 = vmatmul.mubr.f32.vlgmr.msra.gmra.mxu1 %v2490_v4 }
0x23b9   : > { %v2573_v48 = vpop.f32.mrf.mxu1 }
0x23ba   : > { %v2574_v49 = vadd.f32 %v4876_v16, %v2573_v48 }
0x23bb   : > { %v3680_v7 = vpop.f32.mrf.mxu1 }
0x23bc   : > { %2737 = vst [vmem:[%s4797_s16 + $0x20] sm:$0xff] %v2574_v49 }
0x23bd   : > { %3842 = shalt.err (!%p3839_p3)
}
0x23be   : > { %s3843_s16 = scalar_lea.hbm %s5252_s13, 640  ;;  %s3847_s12 = scalar_lea.hbm %s5307_s10, 1280 }
0x23bf   : > { %p3844_p4 = scmp.ne.s32.totalorder %s5252_s13, %s3843_s16  ;;  %p3848_p7 = scmp.lt.s32.totalorder %s5252_s13, %s5307_s10 }
0x23c0   : > { %p3849_p8 = scmp.lt.s32.totalorder %s3847_s12, %s3843_s16 }
0x23c1   : > { %p3845_p5 = pnand %p3844_p4, %p4005_p11 }
0x23c2   : > { %p3850_p9 = por %p3849_p8, %p3848_p7 }
0x23c3   : > { %p3846_p6 = pneg %p3845_p5 }
0x23c5   : > { %p3851_p10 = pnand %p3850_p9, %p3846_p6 }
0x23c7   : > { %3854 = shalt.err (!%p3851_p10)
}
0x23c8   : > { %s3902_s22 = smov 128   ;;  %s3903_s30 = smov 256  }
0x23c9   : > { %s3904_s15 = smov 8  }
0x23ca   : > { %3685 = dma.vmem_to_hbm [thread:$0]  (%p4005_p11), %s5247_s14, 640, %s5252_s13, %s2603_s17, %s3902_s22, %s3903_s30, %s3904_s15  }
0x23cb PF: > { %s2630_s11 = sand.u32 1, %s3879_s18   ;;  %p3688_p12 = pnand %p2703_p0, %p4009_p13 }
0x23cc   : > { %s2631_s16 = scalar_lea.sflag [#allocation10], %s2630_s11 }
0x23cd   : > { %p3689_p1 = pneg %p3688_p12 }
0x23cf   : > { %3874 = dma.done.wait (%p3689_p1), %s2631_s16, 640  }
0x23d0   : > { %3876 = vsyncadd (%p3689_p1), %s2631_s16, 4294966656  ;;  %p26_p2 = scmp.ge.s32.totalorder %s3986_s23, 4   ;;  %s5315_s18 = smov %s3883_s19 }
0x23d1   : > { %s5316_s19 = smov %s3887_s0  ;;  %s5317_s0 = smov %s3999_s26 }
0x23d2   : > { %s5318_s20 = smov %s3986_s23  ;;  %28 = sbr.rel (!%p26_p2) target bundleno = 18 (0x12), region = 192 }
0x23d7   :  { %2636 = vsyncpa [#allocation10], 1 }
0x23d8   :  { %2638 = vsyncpa [#allocation10 + $0x1], 1 }

</bundles_post_ra>
